<compile_context>
chip_gen: v7x
topology: tpu7x:2x2x1
jax: 0.10.0
libtpu: 0.0.40
codegen_flags: <defaults>
</compile_context>

<pallas_src>
import functools

import jax
import jax.numpy as jnp
from jax.experimental import pallas as pl
from jax.experimental.pallas import tpu as pltpu


# ---------------------------------------------------------------------------
# Fused kernel: conv3x3+BN+SiLU -> conv3x3+BN+SiLU -> (+x)
# ---------------------------------------------------------------------------
def _residual_kernel(x_ref, w1_ref, b1_ref, w2_ref, b2_ref, o_ref,
                     xpad_ref, hpad_ref, *, add):
    # x_ref:  (1, H, W, C)   NHWC input plane for this batch element
    # wK_ref: (9, C, C)      tap-major folded conv weights (tap = kh*3+kw)
    # bK_ref: (1, C)         folded BN bias
    # o_ref:  (1, H, W, C)
    # xpad_ref / hpad_ref: (H+2, W+2, C) VMEM staging buffers (zero halo)
    _, H, W, C = x_ref.shape
    HW = H * W

    # Stage zero-padded input for conv1 (also provides the residual interior).
    xpad_ref[...] = jnp.zeros_like(xpad_ref)
    xpad_ref[1:1 + H, 1:1 + W, :] = x_ref[0]

    def conv3x3_bn_silu(src_ref, w_ref, b_ref):
        acc = jnp.zeros((HW, C), jnp.float32)
        for kh in range(3):
            for kw in range(3):
                tap = src_ref[kh:kh + H, kw:kw + W, :].reshape(HW, C)
                acc = acc + jnp.dot(tap, w_ref[kh * 3 + kw],
                                    preferred_element_type=jnp.float32)
        y = acc + b_ref[...]                     # folded BN bias, broadcasts (1, C)
        return y * jax.nn.sigmoid(y)             # SiLU in f32

    h1 = conv3x3_bn_silu(xpad_ref, w1_ref, b1_ref)        # (HW, C)

    # Stage conv1 output (zero halo) for conv2 — stays in VMEM, never hits HBM.
    hpad_ref[...] = jnp.zeros_like(hpad_ref)
    hpad_ref[1:1 + H, 1:1 + W, :] = h1.reshape(H, W, C)

    h2 = conv3x3_bn_silu(hpad_ref, w2_ref, b2_ref)        # (HW, C)

    if add:
        h2 = h2 + x_ref[0].reshape(HW, C).astype(jnp.float32)

    o_ref[0] = h2.reshape(H, W, C).astype(o_ref.dtype)


def _residual_pallas(x_nhwc, w1, b1, w2, b2, *, add=True):
    N, H, W, C = x_nhwc.shape
    kernel = functools.partial(_residual_kernel, add=add)
    return pl.pallas_call(
        kernel,
        out_shape=jax.ShapeDtypeStruct((N, H, W, C), x_nhwc.dtype),
        grid_spec=pltpu.PrefetchScalarGridSpec(
            num_scalar_prefetch=0,
            grid=(N,),
            in_specs=[
                pl.BlockSpec((1, H, W, C), lambda n: (n, 0, 0, 0)),
                pl.BlockSpec((9, C, C), lambda n: (0, 0, 0)),
                pl.BlockSpec((1, C), lambda n: (0, 0)),
                pl.BlockSpec((9, C, C), lambda n: (0, 0, 0)),
                pl.BlockSpec((1, C), lambda n: (0, 0)),
            ],
            out_specs=pl.BlockSpec((1, H, W, C), lambda n: (n, 0, 0, 0)),
            scratch_shapes=[
                pltpu.VMEM((H + 2, W + 2, C), jnp.float32),
                pltpu.VMEM((H + 2, W + 2, C), jnp.float32),
            ],
        ),
        compiler_params=pltpu.CompilerParams(
            dimension_semantics=("parallel",),   # batch planes independent -> megacore
        ),
    )(x_nhwc, w1, b1, w2, b2)


# ---------------------------------------------------------------------------
# BN folding, parameter setup, public forward
# ---------------------------------------------------------------------------
def fold_conv_bn(w, gamma, beta, mean, var, eps=1e-3):
    """Fold eval-mode BatchNorm2d(eps=1e-3, as in the module) into a KxK conv.

    w: (Cout, Cin, K, K) PyTorch-layout conv weight.
    Returns tap-major weight (K*K, Cin, Cout) and bias (1, Cout)."""
    cout, cin, kh, kw = w.shape
    scale = gamma / jnp.sqrt(var + eps)                          # (Cout,)
    w_s = w * scale[:, None, None, None]                         # (Cout, Cin, K, K)
    w_taps = jnp.transpose(w_s, (2, 3, 1, 0)).reshape(kh * kw, cin, cout)
    b = (beta - mean * scale).reshape(1, cout)
    return w_taps.astype(jnp.float32), b.astype(jnp.float32)


def make_residual_params(key, ch):
    ks = jax.random.split(key, 10)

    def conv_bn(k0, k1, k2, k3, k4):
        return dict(
            w=0.05 * jax.random.normal(k0, (ch, ch, 3, 3), jnp.float32),
            gamma=1.0 + 0.05 * jax.random.normal(k1, (ch,), jnp.float32),
            beta=0.05 * jax.random.normal(k2, (ch,), jnp.float32),
            mean=0.05 * jax.random.normal(k3, (ch,), jnp.float32),
            var=1.0 + 0.05 * jax.nn.softplus(jax.random.normal(k4, (ch,), jnp.float32)),
        )

    return dict(conv1=conv_bn(*ks[:5]), conv2=conv_bn(*ks[5:]))


def residual_forward(x_nchw, params, *, add=True):
    """Public wrapper: NCHW in, NCHW out (PyTorch convention)."""
    w1, b1 = fold_conv_bn(**params["conv1"])
    w2, b2 = fold_conv_bn(**params["conv2"])
    x_nhwc = jnp.transpose(x_nchw, (0, 2, 3, 1))
    out_nhwc = _residual_pallas(x_nhwc, w1, b1, w2, b2, add=add)
    return jnp.transpose(out_nhwc, (0, 3, 1, 2))


# ---------------------------------------------------------------------------
# Pure-JAX reference (for correctness check)
# ---------------------------------------------------------------------------
def residual_reference(x_nchw, params, *, add=True, eps=1e-3):
    def block(x, p):
        y = jax.lax.conv_general_dilated(
            x, p["w"], window_strides=(1, 1), padding=((1, 1), (1, 1)),
            dimension_numbers=("NCHW", "OIHW", "NCHW"),
            precision=jax.lax.Precision.HIGHEST)
        scale = p["gamma"] / jnp.sqrt(p["var"] + eps)
        bias = p["beta"] - p["mean"] * scale
        y = y * scale[None, :, None, None] + bias[None, :, None, None]
        return y * jax.nn.sigmoid(y)

    h = block(x_nchw, params["conv1"])
    h = block(h, params["conv2"])
    return h + x_nchw if add else h


if __name__ == "__main__":
    N, ch, H, W = 2, 64, 16, 16
    key = jax.random.PRNGKey(0)
    kx, kp = jax.random.split(key)
    x = jax.random.normal(kx, (N, ch, H, W), jnp.float32)
    params = make_residual_params(kp, ch)

    out = jax.block_until_ready(residual_forward(x, params))
    ref = jax.block_until_ready(residual_reference(x, params))

    assert out.shape == (N, ch, H, W), out.shape
    max_err = float(jnp.max(jnp.abs(out - ref)))
    assert jnp.allclose(out, ref, atol=1e-3, rtol=1e-3), max_err
    print("KERNEL_OK")
</pallas_src>

<mosaic_0001>
module attributes {stable_mosaic.version = 11 : i64} {
  func.func @_residual_kernel(%arg0: i32, %arg1: memref<1x16x16x64xf32, #tpu.memory_space<vmem>>, %arg2: memref<9x64x64xf32, #tpu.memory_space<vmem>>, %arg3: memref<1x64xf32, #tpu.memory_space<vmem>>, %arg4: memref<9x64x64xf32, #tpu.memory_space<vmem>>, %arg5: memref<1x64xf32, #tpu.memory_space<vmem>>, %arg6: memref<1x16x16x64xf32, #tpu.memory_space<vmem>>, %arg7: memref<18x18x64xf32, #tpu.memory_space<vmem>>, %arg8: memref<18x18x64xf32, #tpu.memory_space<vmem>>) attributes {dimension_semantics = [#tpu.dimension_semantics<parallel>], iteration_bounds = array<i64: 2>, scalar_prefetch = 0 : i64, scratch_operands = 2 : i64, tpu.core_type = #tpu.core_type<tc>, window_params = [{transform_indices = @transform_0, window_bounds = array<i64: 1, 16, 16, 64>}, {pipeline_mode = #tpu.pipeline_mode<synchronous>, transform_indices = @transform_1, window_bounds = array<i64: 9, 64, 64>}, {pipeline_mode = #tpu.pipeline_mode<synchronous>, transform_indices = @transform_2, window_bounds = array<i64: 1, 64>}, {pipeline_mode = #tpu.pipeline_mode<synchronous>, transform_indices = @transform_3, window_bounds = array<i64: 9, 64, 64>}, {pipeline_mode = #tpu.pipeline_mode<synchronous>, transform_indices = @transform_4, window_bounds = array<i64: 1, 64>}, {transform_indices = @transform_5, window_bounds = array<i64: 1, 16, 16, 64>}]} {
    %cst = arith.constant 0.000000e+00 : f32
    %0 = vector.broadcast %cst : f32 to vector<18x18x64xf32>
    %c0 = arith.constant 0 : index
    %c0_0 = arith.constant 0 : index
    %c0_1 = arith.constant 0 : index
    %1 = vector.load %arg7[%c0, %c0_0, %c0_1] : memref<18x18x64xf32, #tpu.memory_space<vmem>>, vector<18x18x64xf32>
    tpu.vector_store %arg7[%c0, %c0_0, %c0_1], %0 {strides = array<i32>} : memref<18x18x64xf32, #tpu.memory_space<vmem>>, vector<18x18x64xf32>,
    %c0_2 = arith.constant 0 : index
    %c0_3 = arith.constant 0 : index
    %c0_4 = arith.constant 0 : index
    %c0_5 = arith.constant 0 : index
    %2 = vector.load %arg1[%c0_2, %c0_3, %c0_4, %c0_5] : memref<1x16x16x64xf32, #tpu.memory_space<vmem>>, vector<1x16x16x64xf32>
    %3 = vector.shape_cast %2 : vector<1x16x16x64xf32> to vector<16x16x64xf32>
    %c1 = arith.constant 1 : index
    %c1_6 = arith.constant 1 : index
    %c0_7 = arith.constant 0 : index
    %4 = vector.load %arg7[%c1, %c1_6, %c0_7] : memref<18x18x64xf32, #tpu.memory_space<vmem>>, vector<16x16x64xf32>
    tpu.vector_store %arg7[%c1, %c1_6, %c0_7], %3 {strides = array<i32>} : memref<18x18x64xf32, #tpu.memory_space<vmem>>, vector<16x16x64xf32>,
    %cst_8 = arith.constant 0.000000e+00 : f32
    %5 = vector.broadcast %cst_8 : f32 to vector<256x64xf32>
    %c0_9 = arith.constant 0 : index
    %c0_10 = arith.constant 0 : index
    %c0_11 = arith.constant 0 : index
    %6 = vector.load %arg7[%c0_9, %c0_10, %c0_11] : memref<18x18x64xf32, #tpu.memory_space<vmem>>, vector<16x16x64xf32>
    %7 = vector.shape_cast %6 : vector<16x16x64xf32> to vector<256x64xf32>
    %c0_12 = arith.constant 0 : index
    %c0_13 = arith.constant 0 : index
    %c0_14 = arith.constant 0 : index
    %8 = vector.load %arg2[%c0_12, %c0_13, %c0_14] : memref<9x64x64xf32, #tpu.memory_space<vmem>>, vector<1x64x64xf32>
    %9 = vector.shape_cast %8 : vector<1x64x64xf32> to vector<64x64xf32>
    %cst_15 = arith.constant dense<0.000000e+00> : vector<256x64xf32>
    %10 = tpu.matmul %7, %9, %cst_15 {dimension_numbers = #tpu.dot_dimension_numbers<[1], [0], [0], [1], [0, 0, 1, 1], [], []>} : vector<256x64xf32>, vector<64x64xf32>, vector<256x64xf32> -> vector<256x64xf32>
    %11 = arith.addf %5, %10 : vector<256x64xf32>
    %c0_16 = arith.constant 0 : index
    %c1_17 = arith.constant 1 : index
    %c0_18 = arith.constant 0 : index
    %12 = vector.load %arg7[%c0_16, %c1_17, %c0_18] : memref<18x18x64xf32, #tpu.memory_space<vmem>>, vector<16x16x64xf32>
    %13 = vector.shape_cast %12 : vector<16x16x64xf32> to vector<256x64xf32>
    %c1_19 = arith.constant 1 : index
    %c0_20 = arith.constant 0 : index
    %c0_21 = arith.constant 0 : index
    %14 = vector.load %arg2[%c1_19, %c0_20, %c0_21] : memref<9x64x64xf32, #tpu.memory_space<vmem>>, vector<1x64x64xf32>
    %15 = vector.shape_cast %14 : vector<1x64x64xf32> to vector<64x64xf32>
    %cst_22 = arith.constant dense<0.000000e+00> : vector<256x64xf32>
    %16 = tpu.matmul %13, %15, %cst_22 {dimension_numbers = #tpu.dot_dimension_numbers<[1], [0], [0], [1], [0, 0, 1, 1], [], []>} : vector<256x64xf32>, vector<64x64xf32>, vector<256x64xf32> -> vector<256x64xf32>
    %17 = arith.addf %11, %16 : vector<256x64xf32>
    %c0_23 = arith.constant 0 : index
    %c2 = arith.constant 2 : index
    %c0_24 = arith.constant 0 : index
    %18 = vector.load %arg7[%c0_23, %c2, %c0_24] : memref<18x18x64xf32, #tpu.memory_space<vmem>>, vector<16x16x64xf32>
    %19 = vector.shape_cast %18 : vector<16x16x64xf32> to vector<256x64xf32>
    %c2_25 = arith.constant 2 : index
    %c0_26 = arith.constant 0 : index
    %c0_27 = arith.constant 0 : index
    %20 = vector.load %arg2[%c2_25, %c0_26, %c0_27] : memref<9x64x64xf32, #tpu.memory_space<vmem>>, vector<1x64x64xf32>
    %21 = vector.shape_cast %20 : vector<1x64x64xf32> to vector<64x64xf32>
    %cst_28 = arith.constant dense<0.000000e+00> : vector<256x64xf32>
    %22 = tpu.matmul %19, %21, %cst_28 {dimension_numbers = #tpu.dot_dimension_numbers<[1], [0], [0], [1], [0, 0, 1, 1], [], []>} : vector<256x64xf32>, vector<64x64xf32>, vector<256x64xf32> -> vector<256x64xf32>
    %23 = arith.addf %17, %22 : vector<256x64xf32>
    %c1_29 = arith.constant 1 : index
    %c0_30 = arith.constant 0 : index
    %c0_31 = arith.constant 0 : index
    %24 = vector.load %arg7[%c1_29, %c0_30, %c0_31] : memref<18x18x64xf32, #tpu.memory_space<vmem>>, vector<16x16x64xf32>
    %25 = vector.shape_cast %24 : vector<16x16x64xf32> to vector<256x64xf32>
    %c3 = arith.constant 3 : index
    %c0_32 = arith.constant 0 : index
    %c0_33 = arith.constant 0 : index
    %26 = vector.load %arg2[%c3, %c0_32, %c0_33] : memref<9x64x64xf32, #tpu.memory_space<vmem>>, vector<1x64x64xf32>
    %27 = vector.shape_cast %26 : vector<1x64x64xf32> to vector<64x64xf32>
    %cst_34 = arith.constant dense<0.000000e+00> : vector<256x64xf32>
    %28 = tpu.matmul %25, %27, %cst_34 {dimension_numbers = #tpu.dot_dimension_numbers<[1], [0], [0], [1], [0, 0, 1, 1], [], []>} : vector<256x64xf32>, vector<64x64xf32>, vector<256x64xf32> -> vector<256x64xf32>
    %29 = arith.addf %23, %28 : vector<256x64xf32>
    %c1_35 = arith.constant 1 : index
    %c1_36 = arith.constant 1 : index
    %c0_37 = arith.constant 0 : index
    %30 = vector.load %arg7[%c1_35, %c1_36, %c0_37] : memref<18x18x64xf32, #tpu.memory_space<vmem>>, vector<16x16x64xf32>
    %31 = vector.shape_cast %30 : vector<16x16x64xf32> to vector<256x64xf32>
    %c4 = arith.constant 4 : index
    %c0_38 = arith.constant 0 : index
    %c0_39 = arith.constant 0 : index
    %32 = vector.load %arg2[%c4, %c0_38, %c0_39] : memref<9x64x64xf32, #tpu.memory_space<vmem>>, vector<1x64x64xf32>
    %33 = vector.shape_cast %32 : vector<1x64x64xf32> to vector<64x64xf32>
    %cst_40 = arith.constant dense<0.000000e+00> : vector<256x64xf32>
    %34 = tpu.matmul %31, %33, %cst_40 {dimension_numbers = #tpu.dot_dimension_numbers<[1], [0], [0], [1], [0, 0, 1, 1], [], []>} : vector<256x64xf32>, vector<64x64xf32>, vector<256x64xf32> -> vector<256x64xf32>
    %35 = arith.addf %29, %34 : vector<256x64xf32>
    %c1_41 = arith.constant 1 : index
    %c2_42 = arith.constant 2 : index
    %c0_43 = arith.constant 0 : index
    %36 = vector.load %arg7[%c1_41, %c2_42, %c0_43] : memref<18x18x64xf32, #tpu.memory_space<vmem>>, vector<16x16x64xf32>
    %37 = vector.shape_cast %36 : vector<16x16x64xf32> to vector<256x64xf32>
    %c5 = arith.constant 5 : index
    %c0_44 = arith.constant 0 : index
    %c0_45 = arith.constant 0 : index
    %38 = vector.load %arg2[%c5, %c0_44, %c0_45] : memref<9x64x64xf32, #tpu.memory_space<vmem>>, vector<1x64x64xf32>
    %39 = vector.shape_cast %38 : vector<1x64x64xf32> to vector<64x64xf32>
    %cst_46 = arith.constant dense<0.000000e+00> : vector<256x64xf32>
    %40 = tpu.matmul %37, %39, %cst_46 {dimension_numbers = #tpu.dot_dimension_numbers<[1], [0], [0], [1], [0, 0, 1, 1], [], []>} : vector<256x64xf32>, vector<64x64xf32>, vector<256x64xf32> -> vector<256x64xf32>
    %41 = arith.addf %35, %40 : vector<256x64xf32>
    %c2_47 = arith.constant 2 : index
    %c0_48 = arith.constant 0 : index
    %c0_49 = arith.constant 0 : index
    %42 = vector.load %arg7[%c2_47, %c0_48, %c0_49] : memref<18x18x64xf32, #tpu.memory_space<vmem>>, vector<16x16x64xf32>
    %43 = vector.shape_cast %42 : vector<16x16x64xf32> to vector<256x64xf32>
    %c6 = arith.constant 6 : index
    %c0_50 = arith.constant 0 : index
    %c0_51 = arith.constant 0 : index
    %44 = vector.load %arg2[%c6, %c0_50, %c0_51] : memref<9x64x64xf32, #tpu.memory_space<vmem>>, vector<1x64x64xf32>
    %45 = vector.shape_cast %44 : vector<1x64x64xf32> to vector<64x64xf32>
    %cst_52 = arith.constant dense<0.000000e+00> : vector<256x64xf32>
    %46 = tpu.matmul %43, %45, %cst_52 {dimension_numbers = #tpu.dot_dimension_numbers<[1], [0], [0], [1], [0, 0, 1, 1], [], []>} : vector<256x64xf32>, vector<64x64xf32>, vector<256x64xf32> -> vector<256x64xf32>
    %47 = arith.addf %41, %46 : vector<256x64xf32>
    %c2_53 = arith.constant 2 : index
    %c1_54 = arith.constant 1 : index
    %c0_55 = arith.constant 0 : index
    %48 = vector.load %arg7[%c2_53, %c1_54, %c0_55] : memref<18x18x64xf32, #tpu.memory_space<vmem>>, vector<16x16x64xf32>
    %49 = vector.shape_cast %48 : vector<16x16x64xf32> to vector<256x64xf32>
    %c7 = arith.constant 7 : index
    %c0_56 = arith.constant 0 : index
    %c0_57 = arith.constant 0 : index
    %50 = vector.load %arg2[%c7, %c0_56, %c0_57] : memref<9x64x64xf32, #tpu.memory_space<vmem>>, vector<1x64x64xf32>
    %51 = vector.shape_cast %50 : vector<1x64x64xf32> to vector<64x64xf32>
    %cst_58 = arith.constant dense<0.000000e+00> : vector<256x64xf32>
    %52 = tpu.matmul %49, %51, %cst_58 {dimension_numbers = #tpu.dot_dimension_numbers<[1], [0], [0], [1], [0, 0, 1, 1], [], []>} : vector<256x64xf32>, vector<64x64xf32>, vector<256x64xf32> -> vector<256x64xf32>
    %53 = arith.addf %47, %52 : vector<256x64xf32>
    %c2_59 = arith.constant 2 : index
    %c2_60 = arith.constant 2 : index
    %c0_61 = arith.constant 0 : index
    %54 = vector.load %arg7[%c2_59, %c2_60, %c0_61] : memref<18x18x64xf32, #tpu.memory_space<vmem>>, vector<16x16x64xf32>
    %55 = vector.shape_cast %54 : vector<16x16x64xf32> to vector<256x64xf32>
    %c8 = arith.constant 8 : index
    %c0_62 = arith.constant 0 : index
    %c0_63 = arith.constant 0 : index
    %56 = vector.load %arg2[%c8, %c0_62, %c0_63] : memref<9x64x64xf32, #tpu.memory_space<vmem>>, vector<1x64x64xf32>
    %57 = vector.shape_cast %56 : vector<1x64x64xf32> to vector<64x64xf32>
    %cst_64 = arith.constant dense<0.000000e+00> : vector<256x64xf32>
    %58 = tpu.matmul %55, %57, %cst_64 {dimension_numbers = #tpu.dot_dimension_numbers<[1], [0], [0], [1], [0, 0, 1, 1], [], []>} : vector<256x64xf32>, vector<64x64xf32>, vector<256x64xf32> -> vector<256x64xf32>
    %59 = arith.addf %53, %58 : vector<256x64xf32>
    %c0_65 = arith.constant 0 : index
    %c0_66 = arith.constant 0 : index
    %60 = vector.load %arg3[%c0_65, %c0_66] : memref<1x64xf32, #tpu.memory_space<vmem>>, vector<1x64xf32>
    %61 = vector.broadcast %60 : vector<1x64xf32> to vector<256x64xf32>
    %62 = arith.addf %59, %61 : vector<256x64xf32>
    %63 = arith.negf %62 : vector<256x64xf32>
    %64 = math.exp %63 : vector<256x64xf32>
    %cst_67 = arith.constant 1.000000e+00 : f32
    %65 = vector.broadcast %cst_67 : f32 to vector<256x64xf32>
    %66 = arith.addf %65, %64 : vector<256x64xf32>
    %67 = arith.divf %65, %66 : vector<256x64xf32>
    %68 = arith.mulf %62, %67 : vector<256x64xf32>
    %cst_68 = arith.constant 0.000000e+00 : f32
    %69 = vector.broadcast %cst_68 : f32 to vector<18x18x64xf32>
    %c0_69 = arith.constant 0 : index
    %c0_70 = arith.constant 0 : index
    %c0_71 = arith.constant 0 : index
    %70 = vector.load %arg8[%c0_69, %c0_70, %c0_71] : memref<18x18x64xf32, #tpu.memory_space<vmem>>, vector<18x18x64xf32>
    tpu.vector_store %arg8[%c0_69, %c0_70, %c0_71], %69 {strides = array<i32>} : memref<18x18x64xf32, #tpu.memory_space<vmem>>, vector<18x18x64xf32>,
    %71 = vector.shape_cast %68 : vector<256x64xf32> to vector<16x16x64xf32>
    %c1_72 = arith.constant 1 : index
    %c1_73 = arith.constant 1 : index
    %c0_74 = arith.constant 0 : index
    %72 = vector.load %arg8[%c1_72, %c1_73, %c0_74] : memref<18x18x64xf32, #tpu.memory_space<vmem>>, vector<16x16x64xf32>
    tpu.vector_store %arg8[%c1_72, %c1_73, %c0_74], %71 {strides = array<i32>} : memref<18x18x64xf32, #tpu.memory_space<vmem>>, vector<16x16x64xf32>,
    %cst_75 = arith.constant 0.000000e+00 : f32
    %73 = vector.broadcast %cst_75 : f32 to vector<256x64xf32>
    %c0_76 = arith.constant 0 : index
    %c0_77 = arith.constant 0 : index
    %c0_78 = arith.constant 0 : index
    %74 = vector.load %arg8[%c0_76, %c0_77, %c0_78] : memref<18x18x64xf32, #tpu.memory_space<vmem>>, vector<16x16x64xf32>
    %75 = vector.shape_cast %74 : vector<16x16x64xf32> to vector<256x64xf32>
    %c0_79 = arith.constant 0 : index
    %c0_80 = arith.constant 0 : index
    %c0_81 = arith.constant 0 : index
    %76 = vector.load %arg4[%c0_79, %c0_80, %c0_81] : memref<9x64x64xf32, #tpu.memory_space<vmem>>, vector<1x64x64xf32>
    %77 = vector.shape_cast %76 : vector<1x64x64xf32> to vector<64x64xf32>
    %cst_82 = arith.constant dense<0.000000e+00> : vector<256x64xf32>
    %78 = tpu.matmul %75, %77, %cst_82 {dimension_numbers = #tpu.dot_dimension_numbers<[1], [0], [0], [1], [0, 0, 1, 1], [], []>} : vector<256x64xf32>, vector<64x64xf32>, vector<256x64xf32> -> vector<256x64xf32>
    %79 = arith.addf %73, %78 : vector<256x64xf32>
    %c0_83 = arith.constant 0 : index
    %c1_84 = arith.constant 1 : index
    %c0_85 = arith.constant 0 : index
    %80 = vector.load %arg8[%c0_83, %c1_84, %c0_85] : memref<18x18x64xf32, #tpu.memory_space<vmem>>, vector<16x16x64xf32>
    %81 = vector.shape_cast %80 : vector<16x16x64xf32> to vector<256x64xf32>
    %c1_86 = arith.constant 1 : index
    %c0_87 = arith.constant 0 : index
    %c0_88 = arith.constant 0 : index
    %82 = vector.load %arg4[%c1_86, %c0_87, %c0_88] : memref<9x64x64xf32, #tpu.memory_space<vmem>>, vector<1x64x64xf32>
    %83 = vector.shape_cast %82 : vector<1x64x64xf32> to vector<64x64xf32>
    %cst_89 = arith.constant dense<0.000000e+00> : vector<256x64xf32>
    %84 = tpu.matmul %81, %83, %cst_89 {dimension_numbers = #tpu.dot_dimension_numbers<[1], [0], [0], [1], [0, 0, 1, 1], [], []>} : vector<256x64xf32>, vector<64x64xf32>, vector<256x64xf32> -> vector<256x64xf32>
    %85 = arith.addf %79, %84 : vector<256x64xf32>
    %c0_90 = arith.constant 0 : index
    %c2_91 = arith.constant 2 : index
    %c0_92 = arith.constant 0 : index
    %86 = vector.load %arg8[%c0_90, %c2_91, %c0_92] : memref<18x18x64xf32, #tpu.memory_space<vmem>>, vector<16x16x64xf32>
    %87 = vector.shape_cast %86 : vector<16x16x64xf32> to vector<256x64xf32>
    %c2_93 = arith.constant 2 : index
    %c0_94 = arith.constant 0 : index
    %c0_95 = arith.constant 0 : index
    %88 = vector.load %arg4[%c2_93, %c0_94, %c0_95] : memref<9x64x64xf32, #tpu.memory_space<vmem>>, vector<1x64x64xf32>
    %89 = vector.shape_cast %88 : vector<1x64x64xf32> to vector<64x64xf32>
    %cst_96 = arith.constant dense<0.000000e+00> : vector<256x64xf32>
    %90 = tpu.matmul %87, %89, %cst_96 {dimension_numbers = #tpu.dot_dimension_numbers<[1], [0], [0], [1], [0, 0, 1, 1], [], []>} : vector<256x64xf32>, vector<64x64xf32>, vector<256x64xf32> -> vector<256x64xf32>
    %91 = arith.addf %85, %90 : vector<256x64xf32>
    %c1_97 = arith.constant 1 : index
    %c0_98 = arith.constant 0 : index
    %c0_99 = arith.constant 0 : index
    %92 = vector.load %arg8[%c1_97, %c0_98, %c0_99] : memref<18x18x64xf32, #tpu.memory_space<vmem>>, vector<16x16x64xf32>
    %93 = vector.shape_cast %92 : vector<16x16x64xf32> to vector<256x64xf32>
    %c3_100 = arith.constant 3 : index
    %c0_101 = arith.constant 0 : index
    %c0_102 = arith.constant 0 : index
    %94 = vector.load %arg4[%c3_100, %c0_101, %c0_102] : memref<9x64x64xf32, #tpu.memory_space<vmem>>, vector<1x64x64xf32>
    %95 = vector.shape_cast %94 : vector<1x64x64xf32> to vector<64x64xf32>
    %cst_103 = arith.constant dense<0.000000e+00> : vector<256x64xf32>
    %96 = tpu.matmul %93, %95, %cst_103 {dimension_numbers = #tpu.dot_dimension_numbers<[1], [0], [0], [1], [0, 0, 1, 1], [], []>} : vector<256x64xf32>, vector<64x64xf32>, vector<256x64xf32> -> vector<256x64xf32>
    %97 = arith.addf %91, %96 : vector<256x64xf32>
    %c1_104 = arith.constant 1 : index
    %c1_105 = arith.constant 1 : index
    %c0_106 = arith.constant 0 : index
    %98 = vector.load %arg8[%c1_104, %c1_105, %c0_106] : memref<18x18x64xf32, #tpu.memory_space<vmem>>, vector<16x16x64xf32>
    %99 = vector.shape_cast %98 : vector<16x16x64xf32> to vector<256x64xf32>
    %c4_107 = arith.constant 4 : index
    %c0_108 = arith.constant 0 : index
    %c0_109 = arith.constant 0 : index
    %100 = vector.load %arg4[%c4_107, %c0_108, %c0_109] : memref<9x64x64xf32, #tpu.memory_space<vmem>>, vector<1x64x64xf32>
    %101 = vector.shape_cast %100 : vector<1x64x64xf32> to vector<64x64xf32>
    %cst_110 = arith.constant dense<0.000000e+00> : vector<256x64xf32>
    %102 = tpu.matmul %99, %101, %cst_110 {dimension_numbers = #tpu.dot_dimension_numbers<[1], [0], [0], [1], [0, 0, 1, 1], [], []>} : vector<256x64xf32>, vector<64x64xf32>, vector<256x64xf32> -> vector<256x64xf32>
    %103 = arith.addf %97, %102 : vector<256x64xf32>
    %c1_111 = arith.constant 1 : index
    %c2_112 = arith.constant 2 : index
    %c0_113 = arith.constant 0 : index
    %104 = vector.load %arg8[%c1_111, %c2_112, %c0_113] : memref<18x18x64xf32, #tpu.memory_space<vmem>>, vector<16x16x64xf32>
    %105 = vector.shape_cast %104 : vector<16x16x64xf32> to vector<256x64xf32>
    %c5_114 = arith.constant 5 : index
    %c0_115 = arith.constant 0 : index
    %c0_116 = arith.constant 0 : index
    %106 = vector.load %arg4[%c5_114, %c0_115, %c0_116] : memref<9x64x64xf32, #tpu.memory_space<vmem>>, vector<1x64x64xf32>
    %107 = vector.shape_cast %106 : vector<1x64x64xf32> to vector<64x64xf32>
    %cst_117 = arith.constant dense<0.000000e+00> : vector<256x64xf32>
    %108 = tpu.matmul %105, %107, %cst_117 {dimension_numbers = #tpu.dot_dimension_numbers<[1], [0], [0], [1], [0, 0, 1, 1], [], []>} : vector<256x64xf32>, vector<64x64xf32>, vector<256x64xf32> -> vector<256x64xf32>
    %109 = arith.addf %103, %108 : vector<256x64xf32>
    %c2_118 = arith.constant 2 : index
    %c0_119 = arith.constant 0 : index
    %c0_120 = arith.constant 0 : index
    %110 = vector.load %arg8[%c2_118, %c0_119, %c0_120] : memref<18x18x64xf32, #tpu.memory_space<vmem>>, vector<16x16x64xf32>
    %111 = vector.shape_cast %110 : vector<16x16x64xf32> to vector<256x64xf32>
    %c6_121 = arith.constant 6 : index
    %c0_122 = arith.constant 0 : index
    %c0_123 = arith.constant 0 : index
    %112 = vector.load %arg4[%c6_121, %c0_122, %c0_123] : memref<9x64x64xf32, #tpu.memory_space<vmem>>, vector<1x64x64xf32>
    %113 = vector.shape_cast %112 : vector<1x64x64xf32> to vector<64x64xf32>
    %cst_124 = arith.constant dense<0.000000e+00> : vector<256x64xf32>
    %114 = tpu.matmul %111, %113, %cst_124 {dimension_numbers = #tpu.dot_dimension_numbers<[1], [0], [0], [1], [0, 0, 1, 1], [], []>} : vector<256x64xf32>, vector<64x64xf32>, vector<256x64xf32> -> vector<256x64xf32>
    %115 = arith.addf %109, %114 : vector<256x64xf32>
    %c2_125 = arith.constant 2 : index
    %c1_126 = arith.constant 1 : index
    %c0_127 = arith.constant 0 : index
    %116 = vector.load %arg8[%c2_125, %c1_126, %c0_127] : memref<18x18x64xf32, #tpu.memory_space<vmem>>, vector<16x16x64xf32>
    %117 = vector.shape_cast %116 : vector<16x16x64xf32> to vector<256x64xf32>
    %c7_128 = arith.constant 7 : index
    %c0_129 = arith.constant 0 : index
    %c0_130 = arith.constant 0 : index
    %118 = vector.load %arg4[%c7_128, %c0_129, %c0_130] : memref<9x64x64xf32, #tpu.memory_space<vmem>>, vector<1x64x64xf32>
    %119 = vector.shape_cast %118 : vector<1x64x64xf32> to vector<64x64xf32>
    %cst_131 = arith.constant dense<0.000000e+00> : vector<256x64xf32>
    %120 = tpu.matmul %117, %119, %cst_131 {dimension_numbers = #tpu.dot_dimension_numbers<[1], [0], [0], [1], [0, 0, 1, 1], [], []>} : vector<256x64xf32>, vector<64x64xf32>, vector<256x64xf32> -> vector<256x64xf32>
    %121 = arith.addf %115, %120 : vector<256x64xf32>
    %c2_132 = arith.constant 2 : index
    %c2_133 = arith.constant 2 : index
    %c0_134 = arith.constant 0 : index
    %122 = vector.load %arg8[%c2_132, %c2_133, %c0_134] : memref<18x18x64xf32, #tpu.memory_space<vmem>>, vector<16x16x64xf32>
    %123 = vector.shape_cast %122 : vector<16x16x64xf32> to vector<256x64xf32>
    %c8_135 = arith.constant 8 : index
    %c0_136 = arith.constant 0 : index
    %c0_137 = arith.constant 0 : index
    %124 = vector.load %arg4[%c8_135, %c0_136, %c0_137] : memref<9x64x64xf32, #tpu.memory_space<vmem>>, vector<1x64x64xf32>
    %125 = vector.shape_cast %124 : vector<1x64x64xf32> to vector<64x64xf32>
    %cst_138 = arith.constant dense<0.000000e+00> : vector<256x64xf32>
    %126 = tpu.matmul %123, %125, %cst_138 {dimension_numbers = #tpu.dot_dimension_numbers<[1], [0], [0], [1], [0, 0, 1, 1], [], []>} : vector<256x64xf32>, vector<64x64xf32>, vector<256x64xf32> -> vector<256x64xf32>
    %127 = arith.addf %121, %126 : vector<256x64xf32>
    %c0_139 = arith.constant 0 : index
    %c0_140 = arith.constant 0 : index
    %128 = vector.load %arg5[%c0_139, %c0_140] : memref<1x64xf32, #tpu.memory_space<vmem>>, vector<1x64xf32>
    %129 = vector.broadcast %128 : vector<1x64xf32> to vector<256x64xf32>
    %130 = arith.addf %127, %129 : vector<256x64xf32>
    %131 = arith.negf %130 : vector<256x64xf32>
    %132 = math.exp %131 : vector<256x64xf32>
    %cst_141 = arith.constant 1.000000e+00 : f32
    %133 = vector.broadcast %cst_141 : f32 to vector<256x64xf32>
    %134 = arith.addf %133, %132 : vector<256x64xf32>
    %135 = arith.divf %133, %134 : vector<256x64xf32>
    %136 = arith.mulf %130, %135 : vector<256x64xf32>
    %c0_142 = arith.constant 0 : index
    %c0_143 = arith.constant 0 : index
    %c0_144 = arith.constant 0 : index
    %c0_145 = arith.constant 0 : index
    %137 = vector.load %arg1[%c0_142, %c0_143, %c0_144, %c0_145] : memref<1x16x16x64xf32, #tpu.memory_space<vmem>>, vector<1x16x16x64xf32>
    %138 = vector.shape_cast %137 : vector<1x16x16x64xf32> to vector<16x16x64xf32>
    %139 = vector.shape_cast %138 : vector<16x16x64xf32> to vector<256x64xf32>
    %140 = arith.addf %136, %139 : vector<256x64xf32>
    %141 = vector.shape_cast %140 : vector<256x64xf32> to vector<16x16x64xf32>
    %c0_146 = arith.constant 0 : index
    %c0_147 = arith.constant 0 : index
    %c0_148 = arith.constant 0 : index
    %c0_149 = arith.constant 0 : index
    %142 = vector.load %arg6[%c0_146, %c0_147, %c0_148, %c0_149] : memref<1x16x16x64xf32, #tpu.memory_space<vmem>>, vector<1x16x16x64xf32>
    %143 = vector.shape_cast %142 : vector<1x16x16x64xf32> to vector<16x16x64xf32>
    %144 = vector.shape_cast %141 : vector<16x16x64xf32> to vector<1x16x16x64xf32>
    tpu.vector_store %arg6[%c0_146, %c0_147, %c0_148, %c0_149], %144 {strides = array<i32>} : memref<1x16x16x64xf32, #tpu.memory_space<vmem>>, vector<1x16x16x64xf32>,
    return
  }
  func.func @transform_0(%arg0: i32) -> (i32, i32, i32, i32) {
    %c0_i32 = arith.constant 0 : i32
    %c0_i32_0 = arith.constant 0 : i32
    %c0_i32_1 = arith.constant 0 : i32
    %c0_i32_2 = arith.constant 0 : i32
    return %arg0, %c0_i32, %c0_i32_0, %c0_i32_1 : i32, i32, i32, i32
  }
  func.func @transform_1(%arg0: i32) -> (i32, i32, i32) {
    %c0_i32 = arith.constant 0 : i32
    %c0_i32_0 = arith.constant 0 : i32
    %c0_i32_1 = arith.constant 0 : i32
    %c0_i32_2 = arith.constant 0 : i32
    return %c0_i32, %c0_i32_0, %c0_i32_1 : i32, i32, i32
  }
  func.func @transform_2(%arg0: i32) -> (i32, i32) {
    %c0_i32 = arith.constant 0 : i32
    %c0_i32_0 = arith.constant 0 : i32
    %c0_i32_1 = arith.constant 0 : i32
    return %c0_i32, %c0_i32_0 : i32, i32
  }
  func.func @transform_3(%arg0: i32) -> (i32, i32, i32) {
    %c0_i32 = arith.constant 0 : i32
    %c0_i32_0 = arith.constant 0 : i32
    %c0_i32_1 = arith.constant 0 : i32
    %c0_i32_2 = arith.constant 0 : i32
    return %c0_i32, %c0_i32_0, %c0_i32_1 : i32, i32, i32
  }
  func.func @transform_4(%arg0: i32) -> (i32, i32) {
    %c0_i32 = arith.constant 0 : i32
    %c0_i32_0 = arith.constant 0 : i32
    %c0_i32_1 = arith.constant 0 : i32
    return %c0_i32, %c0_i32_0 : i32, i32
  }
  func.func @transform_5(%arg0: i32) -> (i32, i32, i32, i32) {
    %c0_i32 = arith.constant 0 : i32
    %c0_i32_0 = arith.constant 0 : i32
    %c0_i32_1 = arith.constant 0 : i32
    %c0_i32_2 = arith.constant 0 : i32
    return %arg0, %c0_i32, %c0_i32_0, %c0_i32_1 : i32, i32, i32, i32
  }
}

</mosaic_0001>

<bundles_post_ra>
// kernel: tpu_custom_call.1
= control target key start
LH: loop header
LB: loop body
LE: loop exit
PB: predicated region body
PF: predicated region fallthrough
CT: control target
= control target key end

     0   :  { %10 = vsyncpa [#allocation5], 0  ;;  %s14489_s0 = inlined_call_operand.hbm [shape: f32[2,16,16,64], index: 0, kind: input, shape index: {}]   ;;  %s14490_s1 = inlined_call_operand.hbm [shape: f32[9,64,64], index: 1, kind: input, shape index: {}]   ;;  %s14491_s2 = inlined_call_operand.vmem [shape: f32[1,64], index: 2, kind: input, shape index: {}]   ;;  %s14492_s3 = inlined_call_operand.hbm [shape: f32[9,64,64], index: 3, kind: input, shape index: {}]   ;;  %s14493_s4 = inlined_call_operand.vmem [shape: f32[1,64], index: 4, kind: input, shape index: {}]   ;;  %s14494_s5 = inlined_call_operand.hbm [shape: f32[2,16,16,64], index: 5, kind: output, shape index: {}]  }
   0x1   :  { %12 = vsyncpa [#allocation5 + $0x1], 0 }
   0x2   :  { %13 = vsyncpa [#allocation8], 0 }
   0x3   :  { %14 = vsyncpa [#allocation6], 0 }
   0x4   :  { %16 = vsyncpa [#allocation6 + $0x1], 0  ;;  %s12031_s18 = smov 0   ;;  %s12033_s19 = smov 0  }
   0x5   :  { %s12035_s20 = smov 0   ;;  %s12037_s21 = smov 0  }
   0x6 LB: > { %s12052_s22 = sadd.s32 4294967295, %s11990_s21   ;;  %s8172_s23 = sadd.s32 4294967294, %s11990_s21   ;;  %s11990_s21 = sphi %s12037_s21, %s14796_s21   ;;  %s11986_s20 = sphi %s12035_s20, %s14795_s20   ;;  %s11982_s19 = sphi %s12033_s19, %s14794_s19   ;;  %s11978_s18 = sphi %s12031_s18, %s14793_s18  }
   0x7   : > { %p42_p0 = scmp.ne.s32.totalorder %s11982_s19, %s11978_s18  ;;  %p14495_p1 = scmp.eq.s32.totalorder %s12052_s22, 0 }
   0x8   : > { %p156_p3 = scmp.eq.s32.totalorder %s8172_s23, 1  ;;  %p8173_p5 = scmp.ge.s32.totalorder %s11990_s21, 1 }
   0x9   : > { %p12061_p4 = por %p14495_p1, %p42_p0  ;;  %p163_p7 = scmp.lt.s32.totalorder %s11990_s21, 3 }
   0xa   : > { %p12066_p6 = por %p156_p3, %p42_p0  ;;  %s11992_s27 = smov [#allocation7]  }
   0xb   : > { %s14622_s24 = scalar_select %p12061_p4, 1, 0 }
   0xc   : > { %s14623_s25 = scalar_select %p12066_p6, 1, 0 }
   0xd   : > { %p12071_p8 = pnand %p8173_p5, %p163_p7  ;;  %s175_s28 = sshll.u32 %s11992_s27, 4  ;;  %s12075_s28 = int_to_ptr.vmem [resolvable:$true] %s175_s28 }
   0xe   : > { %s11993_s30 = smov [#allocation9]   ;;  %s11834_s9 = scalar_lea.hbm %s14490_s1, 9216 }
   0xf   : > { %p11518_p9 = pneg %p12071_p8  ;;  %s191_s6 = sshll.u32 %s11993_s30, 4  ;;  %s12086_s6 = int_to_ptr.vmem [resolvable:$true] %s191_s6 }
  0x10   : > { %p11835_p12 = scmp.ne.s32.totalorder %s14490_s1, %s11834_s9  ;;  %p11841_p5 = scmp.lt.u32.totalorder %s11834_s9, %s14490_s1 }
  0x11   : > { %p12082_p11 = pnand %p11518_p9, %p14495_p1 }
  0x13   : > { %p11836_p13 = pneg %p12082_p11 }
  0x15   : > { %p11837_p0 = pnand %p11836_p13, %p11835_p12 }
  0x17   : > { %p11838_p3 = pneg %p11837_p0 }
  0x19   : > { %p11843_p7 = pnand %p11841_p5, %p11838_p3 }
  0x1b   : > { %11846 = shalt.err (!%p11843_p7)
}
  0x1c   : > { %s11847_s14 = scalar_lea.vmem %s12075_s28, 9216  ;;  %p11855_p2 = scmp.lt.s32.totalorder %s12075_s28, %s12075_s28 }
  0x1d   : > { %p11848_p9 = scmp.ne.s32.totalorder %s12075_s28, %s11847_s14  ;;  %p11856_p12 = scmp.lt.s32.totalorder %s11847_s14, %s11847_s14 }
  0x1f   : > { %p11850_p10 = pnand %p11848_p9, %p11836_p13  ;;  %p11857_p0 = por %p11856_p12, %p11855_p2 }
  0x21   : > { %p11851_p1 = pneg %p11850_p10 }
  0x23   : > { %p11858_p6 = pnand %p11857_p0, %p11851_p1 }
  0x25   : > { %11861 = shalt.err (!%p11858_p6)
}
  0x26   : > { %s11994_s15 = smov 128   ;;  %s11995_s16 = smov 8  }
  0x27   : > { %11521 = dma.hbm_to_vmem [thread:$0]  (!%p12082_p11), %s14490_s1, 9216, %s12075_s28, [#allocation8], %s11994_s15, %s11994_s15, %s11995_s16  }
  0x28   : > { %s11862_s7 = scalar_lea.hbm %s14492_s3, 9216 }
  0x29   : > { %p11863_p1 = scmp.ne.s32.totalorder %s14492_s3, %s11862_s7  ;;  %p11869_p10 = scmp.lt.u32.totalorder %s11862_s7, %s14492_s3 }
  0x2b   : > { %p11865_p2 = pnand %p11863_p1, %p11836_p13 }
  0x2d   : > { %p11866_p6 = pneg %p11865_p2 }
  0x2f   : > { %p11871_p3 = pnand %p11869_p10, %p11866_p6 }
  0x31   : > { %11874 = shalt.err (!%p11871_p3)
}
  0x32   : > { %s11875_s28 = scalar_lea.vmem %s12086_s6, 9216  ;;  %p11883_p12 = scmp.lt.s32.totalorder %s12086_s6, %s12086_s6 }
  0x33   : > { %p11876_p5 = scmp.ne.s32.totalorder %s12086_s6, %s11875_s28  ;;  %p11884_p0 = scmp.lt.s32.totalorder %s11875_s28, %s11875_s28 }
  0x35   : > { %p11878_p7 = pnand %p11876_p5, %p11836_p13  ;;  %p11885_p1 = por %p11884_p0, %p11883_p12 }
  0x37   : > { %p11879_p9 = pneg %p11878_p7 }
  0x39   : > { %p11886_p2 = pnand %p11885_p1, %p11879_p9 }
  0x3b   : > { %11889 = shalt.err (!%p11886_p2)
}
  0x3c   : > { %11524 = dma.hbm_to_vmem [thread:$0]  (!%p12082_p11), %s14492_s3, 9216, %s12086_s6, [#allocation8], %s11994_s15, %s11994_s15, %s11995_s16  }
  0x3d   : > { %s12147_s29 = sadd.s32 1, %s11990_s21   ;;  %s29_s14 = sadd.s32 1, %s11986_s20 }
  0x3e   : > { %s26_s17 = ssub.s32 %s11990_s21, %s12147_s29  ;;  %p36_p13 = scmp.ne.s32.totalorder %s11986_s20, %s11982_s19 }
  0x3f   : > { %p27_p6 = scmp.eq.s32.totalorder %s26_s17, 0  ;;  %p37_p10 = scmp.eq.s32.totalorder %s11990_s21, 0 }
  0x40   : > { %p14626_p3 = scmp.eq.s32.totalorder %s12052_s22, 1  ;;  %p11535_p7 = scmp.lt.s32.totalorder %s11990_s21, 2 }
  0x41   : > { %s12163_s27 = scalar_select %p27_p6, %s11986_s20, %s29_s14  }
  0x42   : > { %p12157_p5 = por %p14626_p3, %p36_p13  ;;  %p38_p9 = por %p37_p10, %p36_p13 }
  0x43   : > { %s208_s30 = sand.u32 1, %s11986_s20   ;;  %s8832_s6 = sshll.u32 %s11990_s21, 12 }
  0x44   : > { %s14627_s23 = scalar_select %p12157_p5, 1, 0 }
  0x45   : > { %s8177_s7 = sshll.u32 %s208_s30, 8  ;;  %s12170_s10 = scalar_lea.hbm %s14489_s0, %s8832_s6 }
  0x46   : > { %s212_s11 = scalar_lea.vmem [#allocation4], %s8177_s7  ;;  %p12174_p11 = pnand %p11535_p7, %p38_p9 }
  0x47   : > { %s219_s28 = sshll.u32 %s212_s11, 4  ;;  %s12178_s13 = scalar_lea.sflag [#allocation5], %s208_s30  ;;  %s12172_s28 = int_to_ptr.vmem [resolvable:$true] %s219_s28 }
  0x48   : > { %s11890_s14 = scalar_lea.hbm %s12170_s10, 4096  ;;  %p11892_p0 = pneg %p12174_p11 }
  0x49   : > { %p11891_p12 = scmp.ne.s32.totalorder %s12170_s10, %s11890_s14  ;;  %s11895_s6 = scalar_lea.hbm %s14489_s0, 8192 }
  0x4a   : > { %p11896_p13 = scmp.lt.u32.totalorder %s12170_s10, %s14489_s0  ;;  %p11897_p6 = scmp.lt.u32.totalorder %s11895_s6, %s11890_s14 }
  0x4b   : > { %p11893_p1 = pnand %p11892_p0, %p11891_p12  ;;  %p11899_p3 = scmp.lt.u32.totalorder %s11890_s14, %s12170_s10 }
  0x4c   : > { %p11898_p10 = por %p11897_p6, %p11896_p13 }
  0x4d   : > { %p11894_p2 = pneg %p11893_p1 }
  0x4e   : > { %p11900_p7 = por %p11899_p3, %p11898_p10 }
  0x50   : > { %p11901_p9 = pnand %p11900_p7, %p11894_p2 }
  0x52   : > { %11904 = shalt.err (!%p11901_p9)
}
  0x53   : > { %s11905_s30 = scalar_lea.vmem %s12172_s28, 4096  ;;  %s11996_s11 = smov [#allocation4]  }
  0x54   : > { %p11906_p12 = scmp.ne.s32.totalorder %s12172_s28, %s11905_s30  ;;  %s11910_s17 = sshll.u32 %s11996_s11, 4  ;;  %s11911_s17 = int_to_ptr.vmem [resolvable:$false] %s11910_s17 }
  0x55   : > { %s11912_s7 = scalar_lea.vmem %s11911_s17, 8192  ;;  %p11913_p4 = scmp.lt.s32.totalorder %s12172_s28, %s11911_s17 }
  0x56   : > { %p11908_p1 = pnand %p11906_p12, %p11892_p0  ;;  %p11914_p13 = scmp.lt.s32.totalorder %s11912_s7, %s11905_s30 }
  0x58   : > { %p11909_p5 = pneg %p11908_p1  ;;  %p11915_p6 = por %p11914_p13, %p11913_p4 }
  0x5a   : > { %p11916_p10 = pnand %p11915_p6, %p11909_p5 }
  0x5c   : > { %11919 = shalt.err (!%p11916_p10)
}
  0x5d   : > { %11528 = dma.hbm_to_vmem [thread:$0]  (!%p12174_p11), %s12170_s10, 4096, %s12172_s28, %s12178_s13, %s11994_s15, %s11994_s15, %s11995_s16  }
  0x5e   : > { %231 = sbr.rel (%p12071_p8) target bundleno = 1766 (0x6e6), region = 40 }
  0x65   : > { %s12212_s14 = sand.u32 1, %s11982_s19   ;;  %p14629_p4 = scmp.ne.s32.totalorder %s14622_s24, 0 }
  0x66   : > { %s8181_s6 = sshll.u32 %s12212_s14, 8  ;;  %s234_s8 = scalar_lea.sflag [#allocation5], %s12212_s14 }
  0x67   : > { %s12218_s12 = scalar_lea.vmem [#allocation4], %s8181_s6 }
  0x68   : > { %11965 = dma.done.wait (%p14629_p4), %s234_s8, 4096  }
  0x69   : > { %11967 = vsyncadd (%p14629_p4), %s234_s8, 4294963200  ;;  %p14630_p5 = scmp.eq.s32.totalorder %s12052_s22, 0 }
  0x6b   : > { %11969 = dma.done.wait (%p14630_p5), [#allocation8], 18432   ;;  %p14631_p8 = pmov %p14630_p5 }
  0x6c   : > { %vm272_vm0 = vcmask 523264   ;;  %vm275_vm1 = vcmask 517120   ;;  %v11997_v0 = vmov 0.0   ;;  %v466_v1 = vld [vmem:[#allocation7 + $0x40] sm:$0xff]  ;;  %v467_v2 = vld [vmem:[#allocation7 + $0x48] sm:$0xff]  ;;  %v468_v3 = vld [vmem:[#allocation7 + $0x50] sm:$0xff] }
  0x6d   : > { %11971 = vsyncadd (%p14631_p8), [#allocation8], 4294948864  ;;  %273 = vst.msk [vmem:[#allocation2] sm:$0xff] %vm272_vm0, %v11997_v0  ;;  %v10706_v4 = vpack.c.bf16 %v467_v2, %v466_v1  ;;  %v469_v5 = vld [vmem:[#allocation7 + $0x58] sm:$0xff]  ;;  %v470_v7 = vld [vmem:[#allocation7 + $0x60] sm:$0xff]  ;;  %s14249_s10 = scalar_lea.vmem [#allocation10], %s8181_s6 }
  0x6e   : > { %274 = vst.msk [vmem:[#allocation2 + $0x8] sm:$0xff] %vm272_vm0, %v11997_v0  ;;  %277 = vst.msk [vmem:[#allocation2 + $0x18] sm:$0xff] %vm272_vm0, %v11997_v0  ;;  %v10710_v6 = vpack.c.bf16 %v469_v5, %v468_v3  ;;  %v471_v8 = vld [vmem:[#allocation7 + $0x68] sm:$0xff]  ;;  %v472_v10 = vld [vmem:[#allocation7 + $0x70] sm:$0xff]  ;;  %s8833_s28 = sshll.u32 %s12052_s22, 12  ;;  %s8080_s13 = sshll.u32 %s14249_s10, 4  ;;  %s14443_s13 = int_to_ptr.vmem [resolvable:$true] %s8080_s13 }
  0x6f   : > { %278 = vst.msk [vmem:[#allocation2 + $0x20] sm:$0xff] %vm272_vm0, %v11997_v0  ;;  %280 = vst.msk [vmem:[#allocation2 + $0x30] sm:$0xff] %vm272_vm0, %v11997_v0  ;;  %10707 = vmatprep.subr.bf16.mxu0 %v10706_v4  ;;  %v328_v11 = vld [vmem:[%s12218_s12] sm:$0xff]  ;;  %v329_v12 = vld [vmem:[%s12218_s12 + $0x8] sm:$0xff]  ;;  %v10714_v14 = vpack.c.bf16 %v471_v8, %v470_v7  ;;  %s14441_s11 = scalar_lea.hbm %s14494_s5, %s8833_s28  ;;  %s8067_s22 = scalar_lea.sflag [#allocation6], %s12212_s14 }
  0x70   : > { %281 = vst.msk [vmem:[#allocation2 + $0x38] sm:$0xff] %vm272_vm0, %v11997_v0  ;;  %283 = vst.msk [vmem:[#allocation2 + $0x48] sm:$0xff] %vm272_vm0, %v11997_v0  ;;  %10709 = vmatpush3.bf16.msra.mxu0 %v10706_v4  ;;  %v330_v13 = vld [vmem:[%s12218_s12 + $0x10] sm:$0xff]  ;;  %v331_v15 = vld [vmem:[%s12218_s12 + $0x18] sm:$0xff]  ;;  %s11920_s17 = scalar_lea.vmem %s14443_s13, 4096  ;;  %p14790_p0 = scmp.ne.s32.totalorder %s14627_s23, 0 }
  0x71   : > { %284 = vst.msk [vmem:[#allocation2 + $0x50] sm:$0xff] %vm272_vm0, %v11997_v0  ;;  %286 = vst.msk [vmem:[#allocation2 + $0x60] sm:$0xff] %vm272_vm0, %v11997_v0  ;;  %10711 = vmatprep.subr.bf16.mxu0 %v10710_v6  ;;  %v332_v16 = vld [vmem:[%s12218_s12 + $0x20] sm:$0xff]  ;;  %v333_v17 = vld [vmem:[%s12218_s12 + $0x28] sm:$0xff]  ;;  %p11921_p11 = scmp.ne.s32.totalorder %s14443_s13, %s11920_s17  ;;  %s11998_s7 = smov [#allocation10]  }
  0x72   : > { %287 = vst.msk [vmem:[#allocation2 + $0x68] sm:$0xff] %vm272_vm0, %v11997_v0  ;;  %289 = vst.msk [vmem:[#allocation2 + $0x78] sm:$0xff] %vm272_vm0, %v11997_v0  ;;  %v473_v18 = vld [vmem:[#allocation7 + $0x78] sm:$0xff]  ;;  %v334_v19 = vld [vmem:[%s12218_s12 + $0x30] sm:$0xff]  ;;  %s11924_s6 = sshll.u32 %s11998_s7, 4  ;;  %s11925_s6 = int_to_ptr.vmem [resolvable:$false] %s11924_s6 }
  0x73   : > { %290 = vst.msk [vmem:[#allocation2 + $0x80] sm:$0xff] %vm272_vm0, %v11997_v0  ;;  %292 = vst.msk [vmem:[#allocation2 + $0x90] sm:$0xff] %vm272_vm0, %v11997_v0  ;;  %v335_v20 = vld [vmem:[%s12218_s12 + $0x38] sm:$0xff]  ;;  %v336_v21 = vld [vmem:[%s12218_s12 + $0x40] sm:$0xff]  ;;  %v10718_v26 = vpack.c.bf16 %v473_v18, %v472_v10  ;;  %p11922_p2 = pnand %p11921_p11, %p14790_p0  ;;  %s11926_s8 = scalar_lea.vmem %s11925_s6, 8192 }
  0x74   : > { %293 = vst.msk [vmem:[#allocation2 + $0x98] sm:$0xff] %vm272_vm0, %v11997_v0  ;;  %295 = vst.msk [vmem:[#allocation2 + $0xa8] sm:$0xff] %vm272_vm0, %v11997_v0  ;;  %v337_v22 = vld [vmem:[%s12218_s12 + $0x48] sm:$0xff]  ;;  %10713 = vmatpush3.bf16.msra.mxu0 %v10710_v6  ;;  %v338_v23 = vld [vmem:[%s12218_s12 + $0x50] sm:$0xff]  ;;  %p11927_p7 = scmp.lt.s32.totalorder %s14443_s13, %s11925_s6  ;;  %p11928_p9 = scmp.lt.s32.totalorder %s11926_s8, %s11920_s17 }
  0x75   : > { %296 = vst.msk [vmem:[#allocation2 + $0xb0] sm:$0xff] %vm272_vm0, %v11997_v0  ;;  %298 = vst.msk [vmem:[#allocation2 + $0xc0] sm:$0xff] %vm272_vm0, %v11997_v0  ;;  %v433_v9 = vld [vmem:[#allocation2 + $0x1] sm:$0xff]  ;;  %v339_v24 = vld [vmem:[%s12218_s12 + $0x58] sm:$0xff]  ;;  %10715 = vmatprep.subr.bf16.mxu0 %v10714_v14  ;;  %p11923_p3 = pneg %p11922_p2 }
  0x76   : > { %299 = vst.msk [vmem:[#allocation2 + $0xc8] sm:$0xff] %vm272_vm0, %v11997_v0  ;;  %301 = vst.msk [vmem:[#allocation2 + $0xd8] sm:$0xff] %vm272_vm0, %v11997_v0  ;;  %9570 = vmatprep.mubr.msk.f32.mxu0 %vm272_vm0, %v433_v9  ;;  %v340_v25 = vld [vmem:[%s12218_s12 + $0x60] sm:$0xff]  ;;  %v341_v27 = vld [vmem:[%s12218_s12 + $0x68] sm:$0xff]  ;;  %p11929_p12 = por %p11928_p9, %p11927_p7 }
  0x77   : > { %302 = vst.msk [vmem:[#allocation2 + $0xe0] sm:$0xff] %vm272_vm0, %v11997_v0  ;;  %304 = vst.msk [vmem:[#allocation2 + $0xf0] sm:$0xff] %vm272_vm0, %v11997_v0  ;;  %v342_v28 = vld [vmem:[%s12218_s12 + $0x70] sm:$0xff]  ;;  %v343_v29 = vld [vmem:[%s12218_s12 + $0x78] sm:$0xff] }
  0x78   : > { %305 = vst.msk [vmem:[#allocation2 + $0xf8] sm:$0xff] %vm272_vm0, %v11997_v0  ;;  %307 = vst.msk [vmem:[#allocation2 + $0x108] sm:$0xff] %vm272_vm0, %v11997_v0  ;;  %v425_v30 = vld [vmem:[#allocation7] sm:$0xff]  ;;  %v426_v31 = vld [vmem:[#allocation7 + $0x8] sm:$0xff]  ;;  %10717 = vmatpush3.bf16.msra.mxu0 %v10714_v14  ;;  %p11930_p1 = pnand %p11929_p12, %p11923_p3 }
  0x79   : > { %308 = vst.msk [vmem:[#allocation2 + $0x110] sm:$0xff] %vm272_vm0, %v11997_v0  ;;  %310 = vst.msk [vmem:[#allocation2 + $0x120] sm:$0xff] %vm272_vm0, %v11997_v0  ;;  %v344_v32 = vld [vmem:[%s12218_s12 + $0x80] sm:$0xff]  ;;  %v345_v33 = vld [vmem:[%s12218_s12 + $0x88] sm:$0xff]  ;;  %10719 = vmatprep.subr.bf16.mxu0 %v10718_v26  ;;  %v10722_v36 = vpack.c.bf16 %v426_v31, %v425_v30 }
  0x7a   : > { %311 = vst.msk [vmem:[#allocation2 + $0x128] sm:$0xff] %vm272_vm0, %v11997_v0  ;;  %313 = vst.msk [vmem:[#allocation2 + $0x138] sm:$0xff] %vm272_vm0, %v11997_v0  ;;  %v346_v34 = vld [vmem:[%s12218_s12 + $0x90] sm:$0xff]  ;;  %v347_v35 = vld [vmem:[%s12218_s12 + $0x98] sm:$0xff] }
  0x7b   : > { %314 = vst.msk [vmem:[#allocation2 + $0x140] sm:$0xff] %vm272_vm0, %v11997_v0  ;;  %316 = vst.msk [vmem:[#allocation2 + $0x150] sm:$0xff] %vm272_vm0, %v11997_v0  ;;  %v427_v37 = vld [vmem:[#allocation7 + $0x10] sm:$0xff]  ;;  %v428_v38 = vld [vmem:[#allocation7 + $0x18] sm:$0xff] }
  0x7c   : > { %317 = vst.msk [vmem:[#allocation2 + $0x158] sm:$0xff] %vm272_vm0, %v11997_v0  ;;  %319 = vst.msk [vmem:[#allocation2 + $0x168] sm:$0xff] %vm272_vm0, %v11997_v0  ;;  %v348_v39 = vld [vmem:[%s12218_s12 + $0xa0] sm:$0xff]  ;;  %v349_v40 = vld [vmem:[%s12218_s12 + $0xa8] sm:$0xff]  ;;  %10721 = vmatpush3.bf16.msra.mxu0 %v10718_v26  ;;  %v10726_v43 = vpack.c.bf16 %v428_v38, %v427_v37 }
  0x7d   : > { %320 = vst.msk [vmem:[#allocation2 + $0x170] sm:$0xff] %vm272_vm0, %v11997_v0  ;;  %322 = vst.msk [vmem:[#allocation2 + $0x180] sm:$0xff] %vm272_vm0, %v11997_v0  ;;  %10723 = vmatprep.subr.bf16.mxu0 %v10722_v36  ;;  %v429_v44 = vld [vmem:[#allocation7 + $0x20] sm:$0xff]  ;;  %v430_v45 = vld [vmem:[#allocation7 + $0x28] sm:$0xff] }
  0x7e   : > { %323 = vst.msk [vmem:[#allocation2 + $0x188] sm:$0xff] %vm272_vm0, %v11997_v0  ;;  %325 = vst.msk [vmem:[#allocation2 + $0x198] sm:$0xff] %vm272_vm0, %v11997_v0  ;;  %v350_v46 = vld [vmem:[%s12218_s12 + $0xb0] sm:$0xff]  ;;  %v351_v47 = vld [vmem:[%s12218_s12 + $0xb8] sm:$0xff]  ;;  %v10730_v52 = vpack.c.bf16 %v430_v45, %v429_v44 }
  0x7f   : > { %326 = vst.msk [vmem:[#allocation2 + $0x1a0] sm:$0xff] %vm272_vm0, %v11997_v0  ;;  %4138 = vst.msk [vmem:[#allocation3] sm:$0xff] %vm272_vm0, %v11997_v0  ;;  %v431_v50 = vld [vmem:[#allocation7 + $0x30] sm:$0xff]  ;;  %v352_v51 = vld [vmem:[%s12218_s12 + $0xc0] sm:$0xff] }
  0x80   : > { %4139 = vst.msk [vmem:[#allocation3 + $0x8] sm:$0xff] %vm272_vm0, %v11997_v0  ;;  %4141 = vst.msk [vmem:[#allocation3 + $0x18] sm:$0xff] %vm272_vm0, %v11997_v0  ;;  %v353_v53 = vld [vmem:[%s12218_s12 + $0xc8] sm:$0xff]  ;;  %v354_v54 = vld [vmem:[%s12218_s12 + $0xd0] sm:$0xff] }
  0x81   : > { %4142 = vst.msk [vmem:[#allocation3 + $0x20] sm:$0xff] %vm272_vm0, %v11997_v0  ;;  %4144 = vst.msk [vmem:[#allocation3 + $0x30] sm:$0xff] %vm272_vm0, %v11997_v0  ;;  %v355_v55 = vld [vmem:[%s12218_s12 + $0xd8] sm:$0xff]  ;;  %v356_v57 = vld [vmem:[%s12218_s12 + $0xe0] sm:$0xff] }
  0x82   : > { %4145 = vst.msk [vmem:[#allocation3 + $0x38] sm:$0xff] %vm272_vm0, %v11997_v0  ;;  %4147 = vst.msk [vmem:[#allocation3 + $0x48] sm:$0xff] %vm272_vm0, %v11997_v0  ;;  %v432_v56 = vld [vmem:[#allocation7 + $0x38] sm:$0xff]  ;;  %v357_v58 = vld [vmem:[%s12218_s12 + $0xe8] sm:$0xff] }
  0x83   : > { %4148 = vst.msk [vmem:[#allocation3 + $0x50] sm:$0xff] %vm272_vm0, %v11997_v0  ;;  %4150 = vst.msk [vmem:[#allocation3 + $0x60] sm:$0xff] %vm272_vm0, %v11997_v0  ;;  %v10734_v61 = vpack.c.bf16 %v432_v56, %v431_v50  ;;  %v1149_v62 = vld [vmem:[#allocation7 + $0x80] sm:$0xff]  ;;  %v1150_v63 = vld [vmem:[#allocation7 + $0x88] sm:$0xff] }
  0x84   : > { %4151 = vst.msk [vmem:[#allocation3 + $0x68] sm:$0xff] %vm272_vm0, %v11997_v0  ;;  %4153 = vst.msk [vmem:[#allocation3 + $0x78] sm:$0xff] %vm272_vm0, %v11997_v0  ;;  %v10738_v2 = vpack.c.bf16 %v1150_v63, %v1149_v62  ;;  %v393_v26 = vld [vmem:[#allocation2] sm:$0xff]  ;;  %v1155_v37 = vld [vmem:[#allocation7 + $0xb0] sm:$0xff] }
  0x85   : > { %4154 = vst.msk [vmem:[#allocation3 + $0x80] sm:$0xff] %vm272_vm0, %v11997_v0  ;;  %4156 = vst.msk [vmem:[#allocation3 + $0x90] sm:$0xff] %vm272_vm0, %v11997_v0  ;;  %v1156_v38 = vld [vmem:[#allocation7 + $0xb8] sm:$0xff]  ;;  %v1544_v44 = vld [vmem:[#allocation7 + $0xc8] sm:$0xff] }
  0x86   : > { %4157 = vst.msk [vmem:[#allocation3 + $0x98] sm:$0xff] %vm272_vm0, %v11997_v0  ;;  %4159 = vst.msk [vmem:[#allocation3 + $0xa8] sm:$0xff] %vm272_vm0, %v11997_v0 }
  0x87   : > { %4160 = vst.msk [vmem:[#allocation3 + $0xb0] sm:$0xff] %vm272_vm0, %v11997_v0  ;;  %4162 = vst.msk [vmem:[#allocation3 + $0xc0] sm:$0xff] %vm272_vm0, %v11997_v0 }
  0x88   : > { %4163 = vst.msk [vmem:[#allocation3 + $0xc8] sm:$0xff] %vm272_vm0, %v11997_v0  ;;  %4165 = vst.msk [vmem:[#allocation3 + $0xd8] sm:$0xff] %vm272_vm0, %v11997_v0 }
  0x89   : > { %4166 = vst.msk [vmem:[#allocation3 + $0xe0] sm:$0xff] %vm272_vm0, %v11997_v0  ;;  %4168 = vst.msk [vmem:[#allocation3 + $0xf0] sm:$0xff] %vm272_vm0, %v11997_v0 }
  0x8a   : > { %4169 = vst.msk [vmem:[#allocation3 + $0xf8] sm:$0xff] %vm272_vm0, %v11997_v0  ;;  %4171 = vst.msk [vmem:[#allocation3 + $0x108] sm:$0xff] %vm272_vm0, %v11997_v0 }
  0x8b   : > { %4172 = vst.msk [vmem:[#allocation3 + $0x110] sm:$0xff] %vm272_vm0, %v11997_v0  ;;  %4174 = vst.msk [vmem:[#allocation3 + $0x120] sm:$0xff] %vm272_vm0, %v11997_v0 }
  0x8c   : > { %4175 = vst.msk [vmem:[#allocation3 + $0x128] sm:$0xff] %vm272_vm0, %v11997_v0  ;;  %4177 = vst.msk [vmem:[#allocation3 + $0x138] sm:$0xff] %vm272_vm0, %v11997_v0 }
  0x8d   : > { %4178 = vst.msk [vmem:[#allocation3 + $0x140] sm:$0xff] %vm272_vm0, %v11997_v0  ;;  %4180 = vst.msk [vmem:[#allocation3 + $0x150] sm:$0xff] %vm272_vm0, %v11997_v0 }
  0x8e   : > { %4181 = vst.msk [vmem:[#allocation3 + $0x158] sm:$0xff] %vm272_vm0, %v11997_v0  ;;  %4183 = vst.msk [vmem:[#allocation3 + $0x168] sm:$0xff] %vm272_vm0, %v11997_v0 }
  0x8f   : > { %4184 = vst.msk [vmem:[#allocation3 + $0x170] sm:$0xff] %vm272_vm0, %v11997_v0  ;;  %4186 = vst.msk [vmem:[#allocation3 + $0x180] sm:$0xff] %vm272_vm0, %v11997_v0 }
  0x90   : > { %4187 = vst.msk [vmem:[#allocation3 + $0x188] sm:$0xff] %vm272_vm0, %v11997_v0  ;;  %4189 = vst.msk [vmem:[#allocation3 + $0x198] sm:$0xff] %vm272_vm0, %v11997_v0 }
  0x91   : > { %4190 = vst.msk [vmem:[#allocation3 + $0x1a0] sm:$0xff] %vm272_vm0, %v11997_v0  ;;  %361 = vst.msk [vmem:[#allocation2 + $0x19] sm:$0xff] %vm272_vm0, %v328_v11 }
  0x92   : > { %276 = vst.msk [vmem:[#allocation2 + $0x10] sm:$0x3] %vm275_vm1, %v11997_v0  ;;  %279 = vst.msk [vmem:[#allocation2 + $0x28] sm:$0x3] %vm275_vm1, %v11997_v0 }
  0x93   : > { %282 = vst.msk [vmem:[#allocation2 + $0x40] sm:$0x3] %vm275_vm1, %v11997_v0  ;;  %285 = vst.msk [vmem:[#allocation2 + $0x58] sm:$0x3] %vm275_vm1, %v11997_v0 }
  0x94   : > { %288 = vst.msk [vmem:[#allocation2 + $0x70] sm:$0x3] %vm275_vm1, %v11997_v0  ;;  %291 = vst.msk [vmem:[#allocation2 + $0x88] sm:$0x3] %vm275_vm1, %v11997_v0 }
  0x95   : > { %294 = vst.msk [vmem:[#allocation2 + $0xa0] sm:$0x3] %vm275_vm1, %v11997_v0  ;;  %297 = vst.msk [vmem:[#allocation2 + $0xb8] sm:$0x3] %vm275_vm1, %v11997_v0 }
  0x96   : > { %300 = vst.msk [vmem:[#allocation2 + $0xd0] sm:$0x3] %vm275_vm1, %v11997_v0  ;;  %303 = vst.msk [vmem:[#allocation2 + $0xe8] sm:$0x3] %vm275_vm1, %v11997_v0 }
  0x97   : > { %306 = vst.msk [vmem:[#allocation2 + $0x100] sm:$0x3] %vm275_vm1, %v11997_v0  ;;  %309 = vst.msk [vmem:[#allocation2 + $0x118] sm:$0x3] %vm275_vm1, %v11997_v0 }
  0x98   : > { %312 = vst.msk [vmem:[#allocation2 + $0x130] sm:$0x3] %vm275_vm1, %v11997_v0  ;;  %315 = vst.msk [vmem:[#allocation2 + $0x148] sm:$0x3] %vm275_vm1, %v11997_v0  ;;  %v12489_v42 = vld [vmem:[#allocation2 + $0x19] sm:$0xff] }
  0x99   : > { %318 = vst.msk [vmem:[#allocation2 + $0x160] sm:$0x3] %vm275_vm1, %v11997_v0  ;;  %321 = vst.msk [vmem:[#allocation2 + $0x178] sm:$0x3] %vm275_vm1, %v11997_v0  ;;  %v434_v41 = vld [vmem:[#allocation2 + $0x9] sm:$0xff]  ;;  %v12627_v30 = vld [vmem:[#allocation2 + $0x18] sm:$0xff] }
  0x9a   : > { %324 = vst.msk [vmem:[#allocation2 + $0x190] sm:$0x3] %vm275_vm1, %v11997_v0  ;;  %327 = vst.msk [vmem:[#allocation2 + $0x1a8] sm:$0x3] %vm275_vm1, %v11997_v0  ;;  %9571 = vmatmul.mubr.msk.f32.vlgmr.msra.gmra.mrb[0].mxu0 %vm272_vm0, %v434_v41  ;;  %v10750_v41 = vpack.c.bf16 %v1156_v38, %v1155_v37  ;;  %v359_v37 = vld [vmem:[%s12218_s12 + $0xf8] sm:$0xff] }
  0x9b   : > { %4140 = vst.msk [vmem:[#allocation3 + $0x10] sm:$0x3] %vm275_vm1, %v11997_v0  ;;  %4143 = vst.msk [vmem:[#allocation3 + $0x28] sm:$0x3] %vm275_vm1, %v11997_v0  ;;  %10725 = vmatpush3.bf16.msra.mxu0 %v10722_v36  ;;  %9573 = vmatprep.mubr.msk.f32.mxu0 %vm272_vm0, %v12489_v42 }
  0x9c   : > { %4146 = vst.msk [vmem:[#allocation3 + $0x40] sm:$0x3] %vm275_vm1, %v11997_v0  ;;  %4149 = vst.msk [vmem:[#allocation3 + $0x58] sm:$0x3] %vm275_vm1, %v11997_v0  ;;  %10727 = vmatprep.subr.bf16.mxu0 %v10726_v43 }
  0x9d   : > { %4152 = vst.msk [vmem:[#allocation3 + $0x70] sm:$0x3] %vm275_vm1, %v11997_v0  ;;  %4155 = vst.msk [vmem:[#allocation3 + $0x88] sm:$0x3] %vm275_vm1, %v11997_v0 }
  0x9e   : > { %4158 = vst.msk [vmem:[#allocation3 + $0xa0] sm:$0x3] %vm275_vm1, %v11997_v0  ;;  %4161 = vst.msk [vmem:[#allocation3 + $0xb8] sm:$0x3] %vm275_vm1, %v11997_v0 }
  0x9f   : > { %4164 = vst.msk [vmem:[#allocation3 + $0xd0] sm:$0x3] %vm275_vm1, %v11997_v0  ;;  %4167 = vst.msk [vmem:[#allocation3 + $0xe8] sm:$0x3] %vm275_vm1, %v11997_v0  ;;  %10729 = vmatpush3.bf16.msra.mxu0 %v10726_v43  ;;  %v1543_v43 = vld [vmem:[#allocation7 + $0xc0] sm:$0xff] }
  0xa0   : > { %4170 = vst.msk [vmem:[#allocation3 + $0x100] sm:$0x3] %vm275_vm1, %v11997_v0  ;;  %4173 = vst.msk [vmem:[#allocation3 + $0x118] sm:$0x3] %vm275_vm1, %v11997_v0  ;;  %10731 = vmatprep.subr.bf16.mxu0 %v10730_v52 }
  0xa1   : > { %4176 = vst.msk [vmem:[#allocation3 + $0x130] sm:$0x3] %vm275_vm1, %v11997_v0  ;;  %4179 = vst.msk [vmem:[#allocation3 + $0x148] sm:$0x3] %vm275_vm1, %v11997_v0 }
  0xa2   : > { %4182 = vst.msk [vmem:[#allocation3 + $0x160] sm:$0x3] %vm275_vm1, %v11997_v0  ;;  %4185 = vst.msk [vmem:[#allocation3 + $0x178] sm:$0x3] %vm275_vm1, %v11997_v0 }
  0xa3   : > { %4188 = vst.msk [vmem:[#allocation3 + $0x190] sm:$0x3] %vm275_vm1, %v11997_v0  ;;  %4191 = vst.msk [vmem:[#allocation3 + $0x1a8] sm:$0x3] %vm275_vm1, %v11997_v0  ;;  %10733 = vmatpush3.bf16.msra.mxu0 %v10730_v52 }
  0xa4   : > { %362 = vst.msk [vmem:[#allocation2 + $0x21] sm:$0xff] %vm272_vm0, %v329_v12  ;;  %363 = vst.msk [vmem:[#allocation2 + $0x31] sm:$0xff] %vm272_vm0, %v330_v13  ;;  %10735 = vmatprep.subr.bf16.mxu0 %v10734_v61 }
  0xa5   : > { %364 = vst.msk [vmem:[#allocation2 + $0x39] sm:$0xff] %vm272_vm0, %v331_v15  ;;  %365 = vst.msk [vmem:[#allocation2 + $0x49] sm:$0xff] %vm272_vm0, %v332_v16 }
  0xa6   : > { %366 = vst.msk [vmem:[#allocation2 + $0x51] sm:$0xff] %vm272_vm0, %v333_v17  ;;  %367 = vst.msk [vmem:[#allocation2 + $0x61] sm:$0xff] %vm272_vm0, %v334_v19 }
  0xa7   : > { %368 = vst.msk [vmem:[#allocation2 + $0x69] sm:$0xff] %vm272_vm0, %v335_v20  ;;  %369 = vst.msk [vmem:[#allocation2 + $0x79] sm:$0xff] %vm272_vm0, %v336_v21  ;;  %10737 = vmatpush3.bf16.msra.mxu0 %v10734_v61 }
  0xa8   : > { %370 = vst.msk [vmem:[#allocation2 + $0x81] sm:$0xff] %vm272_vm0, %v337_v22  ;;  %371 = vst.msk [vmem:[#allocation2 + $0x91] sm:$0xff] %vm272_vm0, %v338_v23  ;;  %10739 = vmatprep.subr.bf16.mxu0 %v10738_v2 }
  0xa9   : > { %372 = vst.msk [vmem:[#allocation2 + $0x99] sm:$0xff] %vm272_vm0, %v339_v24  ;;  %373 = vst.msk [vmem:[#allocation2 + $0xa9] sm:$0xff] %vm272_vm0, %v340_v25 }
  0xaa   : > { %374 = vst.msk [vmem:[#allocation2 + $0xb1] sm:$0xff] %vm272_vm0, %v341_v27  ;;  %375 = vst.msk [vmem:[#allocation2 + $0xc1] sm:$0xff] %vm272_vm0, %v342_v28  ;;  %v1151_v27 = vld [vmem:[#allocation7 + $0x90] sm:$0xff]  ;;  %v1152_v28 = vld [vmem:[#allocation7 + $0x98] sm:$0xff] }
  0xab   : > { %376 = vst.msk [vmem:[#allocation2 + $0xc9] sm:$0xff] %vm272_vm0, %v343_v29  ;;  %377 = vst.msk [vmem:[#allocation2 + $0xd9] sm:$0xff] %vm272_vm0, %v344_v32  ;;  %v12494_v48 = vld [vmem:[#allocation2 + $0x21] sm:$0xff]  ;;  %v12500_v49 = vld [vmem:[#allocation2 + $0x31] sm:$0xff]  ;;  %v10742_v31 = vpack.c.bf16 %v1152_v28, %v1151_v27 }
  0xac   : > { %378 = vst.msk [vmem:[#allocation2 + $0xe1] sm:$0xff] %vm272_vm0, %v345_v33  ;;  %379 = vst.msk [vmem:[#allocation2 + $0xf1] sm:$0xff] %vm272_vm0, %v346_v34  ;;  %9574 = vmatmul.mubr.msk.f32.gmra.mrb[2].mxu0 %vm272_vm0, %v12494_v48  ;;  %v12518_v59 = vld [vmem:[#allocation2 + $0x39] sm:$0xff]  ;;  %v12520_v60 = vld [vmem:[#allocation2 + $0x49] sm:$0xff] }
  0xad   : > { %380 = vst.msk [vmem:[#allocation2 + $0xf9] sm:$0xff] %vm272_vm0, %v347_v35  ;;  %381 = vst.msk [vmem:[#allocation2 + $0x109] sm:$0xff] %vm272_vm0, %v348_v39  ;;  %9576 = vmatprep.mubr.msk.f32.mxu0 %vm272_vm0, %v12500_v49  ;;  %v12526_v0 = vld [vmem:[#allocation2 + $0x51] sm:$0xff]  ;;  %v12528_v1 = vld [vmem:[#allocation2 + $0x61] sm:$0xff] }
  0xae   : > { %382 = vst.msk [vmem:[#allocation2 + $0x111] sm:$0xff] %vm272_vm0, %v349_v40  ;;  %383 = vst.msk [vmem:[#allocation2 + $0x121] sm:$0xff] %vm272_vm0, %v350_v46  ;;  %v12534_v3 = vld [vmem:[#allocation2 + $0x69] sm:$0xff]  ;;  %v12536_v4 = vld [vmem:[#allocation2 + $0x79] sm:$0xff] }
  0xaf   : > { %384 = vst.msk [vmem:[#allocation2 + $0x129] sm:$0xff] %vm272_vm0, %v351_v47  ;;  %385 = vst.msk [vmem:[#allocation2 + $0x139] sm:$0xff] %vm272_vm0, %v352_v51  ;;  %v12542_v5 = vld [vmem:[#allocation2 + $0x81] sm:$0xff]  ;;  %v12544_v6 = vld [vmem:[#allocation2 + $0x91] sm:$0xff]  ;;  %v12652_v47 = vpack.c.bf16 %v1544_v44, %v1543_v43 }
  0xb0   : > { %386 = vst.msk [vmem:[#allocation2 + $0x141] sm:$0xff] %vm272_vm0, %v353_v53  ;;  %387 = vst.msk [vmem:[#allocation2 + $0x151] sm:$0xff] %vm272_vm0, %v354_v54  ;;  %9577 = vmatmul.mubr.msk.f32.gmra.mrb[4].mxu0 %vm272_vm0, %v12518_v59  ;;  %v12550_v7 = vld [vmem:[#allocation2 + $0x99] sm:$0xff]  ;;  %v12552_v8 = vld [vmem:[#allocation2 + $0xa9] sm:$0xff] }
  0xb1   : > { %388 = vst.msk [vmem:[#allocation2 + $0x159] sm:$0xff] %vm272_vm0, %v355_v55  ;;  %389 = vst.msk [vmem:[#allocation2 + $0x169] sm:$0xff] %vm272_vm0, %v356_v57  ;;  %9579 = vmatprep.mubr.msk.f32.mxu0 %vm272_vm0, %v12520_v60  ;;  %v12558_v9 = vld [vmem:[#allocation2 + $0xb1] sm:$0xff]  ;;  %v12560_v10 = vld [vmem:[#allocation2 + $0xc1] sm:$0xff] }
  0xb2   : > { %390 = vst.msk [vmem:[#allocation2 + $0x171] sm:$0xff] %vm272_vm0, %v357_v58  ;;  %v12566_v11 = vld [vmem:[#allocation2 + $0xc9] sm:$0xff]  ;;  %v12568_v12 = vld [vmem:[#allocation2 + $0xd9] sm:$0xff]  ;;  %392 = vst.msk [vmem:[#allocation2 + $0x189] sm:$0xff] %vm272_vm0, %v359_v37 }
  0xb3   : > { %v12574_v13 = vld [vmem:[#allocation2 + $0xe1] sm:$0xff]  ;;  %v12576_v14 = vld [vmem:[#allocation2 + $0xf1] sm:$0xff] }
  0xb4   : > { %9580 = vmatmul.mubr.msk.f32.gmra.mrb[6].mxu0 %vm272_vm0, %v12526_v0  ;;  %v12582_v15 = vld [vmem:[#allocation2 + $0xf9] sm:$0xff]  ;;  %v12584_v16 = vld [vmem:[#allocation2 + $0x109] sm:$0xff] }
  0xb5   : > { %9582 = vmatprep.mubr.msk.f32.mxu0 %vm272_vm0, %v12528_v1  ;;  %v12590_v17 = vld [vmem:[#allocation2 + $0x111] sm:$0xff]  ;;  %v12592_v18 = vld [vmem:[#allocation2 + $0x121] sm:$0xff] }
  0xb6   : > { %14632 = vst [vmem:[#allocation14_spill] sm:$0xff] %v12590_v17  ;;  %14633 = vst [vmem:[#allocation15_spill] sm:$0xff] %v12592_v18  ;;  %v12598_v19 = vld [vmem:[#allocation2 + $0x129] sm:$0xff]  ;;  %v12600_v20 = vld [vmem:[#allocation2 + $0x139] sm:$0xff] }
  0xb7   : > { %14634 = vst [vmem:[#allocation16_spill] sm:$0xff] %v12598_v19  ;;  %14635 = vst [vmem:[#allocation17_spill] sm:$0xff] %v12600_v20  ;;  %v12606_v21 = vld [vmem:[#allocation2 + $0x141] sm:$0xff]  ;;  %v12608_v22 = vld [vmem:[#allocation2 + $0x151] sm:$0xff] }
  0xb8   : > { %9583 = vmatmul.mubr.msk.f32.gmra.mrb[8].mxu0 %vm272_vm0, %v12534_v3  ;;  %14636 = vst [vmem:[#allocation18_spill] sm:$0xff] %v12606_v21  ;;  %14637 = vst [vmem:[#allocation19_spill] sm:$0xff] %v12608_v22  ;;  %v12614_v23 = vld [vmem:[#allocation2 + $0x159] sm:$0xff]  ;;  %v12616_v24 = vld [vmem:[#allocation2 + $0x169] sm:$0xff] }
  0xb9   : > { %9585 = vmatprep.mubr.msk.f32.mxu0 %vm272_vm0, %v12536_v4  ;;  %14638 = vst [vmem:[#allocation20_spill] sm:$0xff] %v12614_v23  ;;  %14639 = vst [vmem:[#allocation21_spill] sm:$0xff] %v12616_v24  ;;  %v12622_v25 = vld [vmem:[#allocation2 + $0x171] sm:$0xff]  ;;  %v394_v29 = vld [vmem:[#allocation2 + $0x8] sm:$0xff] }
  0xba   : > { %14640 = vst [vmem:[#allocation22_spill] sm:$0xff] %v12622_v25  ;;  %v1153_v32 = vld [vmem:[#allocation7 + $0xa0] sm:$0xff]  ;;  %v1154_v33 = vld [vmem:[#allocation7 + $0xa8] sm:$0xff]  ;;  %v12634_v35 = vld [vmem:[#allocation2 + $0x30] sm:$0xff] }
  0xbb   : > { %v12632_v34 = vld [vmem:[#allocation2 + $0x20] sm:$0xff]  ;;  %v10746_v36 = vpack.c.bf16 %v1154_v33, %v1153_v32  ;;  %v12640_v39 = vld [vmem:[#allocation2 + $0x38] sm:$0xff]  ;;  %v12642_v40 = vld [vmem:[#allocation2 + $0x48] sm:$0xff] }
  0xbc   : > { %9586 = vmatmul.mubr.msk.f32.gmra.mrb[10].mxu0 %vm272_vm0, %v12542_v5  ;;  %v12648_v45 = vld [vmem:[#allocation2 + $0x50] sm:$0xff]  ;;  %v12650_v46 = vld [vmem:[#allocation2 + $0x60] sm:$0xff]  ;;  %v12658_v50 = vld [vmem:[#allocation2 + $0x68] sm:$0xff] }
  0xbd   : > { %9588 = vmatprep.mubr.msk.f32.mxu0 %vm272_vm0, %v12544_v6  ;;  %v12660_v51 = vld [vmem:[#allocation2 + $0x78] sm:$0xff]  ;;  %v12667_v52 = vld [vmem:[#allocation2 + $0x80] sm:$0xff]  ;;  %v12669_v53 = vld [vmem:[#allocation2 + $0x90] sm:$0xff] }
  0xbe   : > { %v12675_v54 = vld [vmem:[#allocation2 + $0x98] sm:$0xff]  ;;  %v12677_v55 = vld [vmem:[#allocation2 + $0xa8] sm:$0xff]  ;;  %v12683_v56 = vld [vmem:[#allocation2 + $0xb0] sm:$0xff] }
  0xbf   : > { %v12685_v57 = vld [vmem:[#allocation2 + $0xc0] sm:$0xff]  ;;  %v12691_v58 = vld [vmem:[#allocation2 + $0xc8] sm:$0xff]  ;;  %v12693_v61 = vld [vmem:[#allocation2 + $0xd8] sm:$0xff] }
  0xc0   : > { %9589 = vmatmul.mubr.msk.f32.gmra.mrb[12].mxu0 %vm272_vm0, %v12550_v7  ;;  %v12699_v62 = vld [vmem:[#allocation2 + $0xe0] sm:$0xff]  ;;  %v12701_v63 = vld [vmem:[#allocation2 + $0xf0] sm:$0xff]  ;;  %v12743_v38 = vld [vmem:[#allocation2 + $0x158] sm:$0xff] }
  0xc1   : > { %9591 = vmatprep.mubr.msk.f32.mxu0 %vm272_vm0, %v12552_v8  ;;  %v12715_v27 = vld [vmem:[#allocation2 + $0x110] sm:$0xff]  ;;  %v12717_v28 = vld [vmem:[#allocation2 + $0x120] sm:$0xff] }
  0xc2   : > { %v12731_v32 = vld [vmem:[#allocation2 + $0x140] sm:$0xff]  ;;  %v12733_v33 = vld [vmem:[#allocation2 + $0x150] sm:$0xff] }
  0xc3   : > { %v12751_v43 = vld [vmem:[#allocation2 + $0x170] sm:$0xff]  ;;  %v1116_v44 = vld [vmem:[#allocation2 + $0x2] sm:$0xff] }
  0xc4   : > { %9592 = vmatmul.mubr.msk.f32.gmra.mrb[14].mxu0 %vm272_vm0, %v12558_v9  ;;  %v1117_v37 = vld [vmem:[#allocation2 + $0xa] sm:$0xff] }
  0xc5   : > { %9594 = vmatprep.mubr.msk.f32.mxu0 %vm272_vm0, %v12560_v10 }
  0xc8   : > { %9595 = vmatmul.mubr.msk.f32.gmra.mrb[16].mxu0 %vm272_vm0, %v12566_v11 }
  0xc9   : > { %9597 = vmatprep.mubr.msk.f32.mxu0 %vm272_vm0, %v12568_v12 }
  0xcc   : > { %9598 = vmatmul.mubr.msk.f32.gmra.mrb[18].mxu0 %vm272_vm0, %v12574_v13 }
  0xcd   : > { %9600 = vmatprep.mubr.msk.f32.mxu0 %vm272_vm0, %v12576_v14 }
  0xd0   : > { %9601 = vmatmul.mubr.msk.f32.gmra.mrb[20].mxu0 %vm272_vm0, %v12582_v15 }
  0xd1   : > { %9603 = vmatprep.mubr.msk.f32.mxu0 %vm272_vm0, %v12584_v16 }
  0xd4   : > { %9604 = vmatmul.mubr.msk.f32.gmra.mrb[22].mxu0 %vm272_vm0, %v12590_v17  ;;  %v1550_v17 = vld [vmem:[#allocation7 + $0xf8] sm:$0xff] }
  0xd5   : > { %9606 = vmatprep.mubr.msk.f32.mxu0 %vm272_vm0, %v12592_v18 }
  0xd8   : > { %9607 = vmatmul.mubr.msk.f32.gmra.mrb[24].mxu0 %vm272_vm0, %v12598_v19  ;;  %v12764_v19 = vld [vmem:[#allocation2 + $0x32] sm:$0xff] }
  0xd9   : > { %9609 = vmatprep.mubr.msk.f32.mxu0 %vm272_vm0, %v12600_v20  ;;  %v12762_v20 = vld [vmem:[#allocation2 + $0x22] sm:$0xff]  ;;  %14642 = vst [vmem:[#allocation24_spill] sm:$0xff] %v12764_v19 }
  0xdc   : > { %9610 = vmatmul.mubr.msk.f32.gmra.mrb[26].mxu0 %vm272_vm0, %v12606_v21  ;;  %v1548_v21 = vld [vmem:[#allocation7 + $0xe8] sm:$0xff] }
  0xdd   : > { %9612 = vmatprep.mubr.msk.f32.mxu0 %vm272_vm0, %v12608_v22  ;;  %v1547_v22 = vld [vmem:[#allocation7 + $0xe0] sm:$0xff] }
  0xde   : > { %v10762_v18 = vpack.c.bf16 %v1548_v21, %v1547_v22  ;;  %v12778_v21 = vld [vmem:[#allocation2 + $0x52] sm:$0xff]  ;;  %v12780_v22 = vld [vmem:[#allocation2 + $0x62] sm:$0xff] }
  0xdf   : > { %14643 = vst [vmem:[#allocation25_spill] sm:$0xff] %v12778_v21  ;;  %14644 = vst [vmem:[#allocation26_spill] sm:$0xff] %v12780_v22 }
  0xe0   : > { %9613 = vmatmul.mubr.msk.f32.gmra.mrb[28].mxu0 %vm272_vm0, %v12614_v23 }
  0xe1   : > { %9615 = vmatprep.mubr.msk.f32.mxu0 %vm272_vm0, %v12616_v24  ;;  %v12756_v24 = vld [vmem:[#allocation2 + $0x1a] sm:$0xff] }
  0xe2   : > { %14641 = vst [vmem:[#allocation23_spill] sm:$0xff] %v12756_v24 }
  0xe4   : > { %9616 = vmatmul.mubr.msk.f32.gmra.mrb[30].mxu0 %vm272_vm0, %v12622_v25  ;;  %v1546_v25 = vld [vmem:[#allocation7 + $0xd8] sm:$0xff] }
  0xe5   : > { %9634 = vmatprep.mubr.msk.f32.mxu0 %vm272_vm0, %v393_v26  ;;  %v12709_v26 = vld [vmem:[#allocation2 + $0x108] sm:$0xff] }
  0xe8   : > { %9635 = vmatmul.mubr.msk.f32.vlgmr.msra.gmra.mrb[0].mxu0 %vm272_vm0, %v394_v29  ;;  %v12723_v29 = vld [vmem:[#allocation2 + $0x128] sm:$0xff] }
  0xe9   : > { %10741 = vmatpush3.bf16.msra.mxu0 %v10738_v2  ;;  %9637 = vmatprep.mubr.msk.f32.mxu0 %vm272_vm0, %v12627_v30  ;;  %v12707_v2 = vld [vmem:[#allocation2 + $0xf8] sm:$0xff] }
  0xea   : > { %10743 = vmatprep.subr.bf16.mxu0 %v10742_v31 }
  0xec   : > { %9638 = vmatmul.mubr.msk.f32.gmra.mrb[2].mxu0 %vm272_vm0, %v12632_v34 }
  0xed   : > { %9640 = vmatprep.mubr.msk.f32.mxu0 %vm272_vm0, %v12634_v35  ;;  %10745 = vmatpush3.bf16.msra.mxu0 %v10742_v31  ;;  %v12725_v31 = vld [vmem:[#allocation2 + $0x138] sm:$0xff] }
  0xee   : > { %10747 = vmatprep.subr.bf16.mxu0 %v10746_v36 }
  0xf0   : > { %9641 = vmatmul.mubr.msk.f32.gmra.mrb[4].mxu0 %vm272_vm0, %v12640_v39 }
  0xf1   : > { %9643 = vmatprep.mubr.msk.f32.mxu0 %vm272_vm0, %v12642_v40  ;;  %10749 = vmatpush3.bf16.msra.mxu0 %v10746_v36  ;;  %v358_v36 = vld [vmem:[%s12218_s12 + $0xf0] sm:$0xff] }
  0xf2   : > { %10751 = vmatprep.subr.bf16.mxu0 %v10750_v41  ;;  %391 = vst.msk [vmem:[#allocation2 + $0x181] sm:$0xff] %vm272_vm0, %v358_v36  ;;  %v1545_v36 = vld [vmem:[#allocation7 + $0xd0] sm:$0xff] }
  0xf3   : > { %v10758_v23 = vpack.c.bf16 %v1546_v25, %v1545_v36  ;;  %v12770_v25 = vld [vmem:[#allocation2 + $0x3a] sm:$0xff] }
  0xf4   : > { %9644 = vmatmul.mubr.msk.f32.gmra.mrb[6].mxu0 %vm272_vm0, %v12648_v45 }
  0xf5   : > { %9646 = vmatprep.mubr.msk.f32.mxu0 %vm272_vm0, %v12650_v46  ;;  %10753 = vmatpush3.bf16.msra.mxu0 %v10750_v41  ;;  %v12745_v41 = vld [vmem:[#allocation2 + $0x168] sm:$0xff] }
  0xf6   : > { %10755 = vmatprep.subr.bf16.mxu0 %v12652_v47 }
  0xf8   : > { %9647 = vmatmul.mubr.msk.f32.gmra.mrb[8].mxu0 %vm272_vm0, %v12658_v50 }
  0xf9   : > { %9649 = vmatprep.mubr.msk.f32.mxu0 %vm272_vm0, %v12660_v51 }
  0xfc   : > { %9650 = vmatmul.mubr.msk.f32.gmra.mrb[10].mxu0 %vm272_vm0, %v12667_v52 }
  0xfd   : > { %9652 = vmatprep.mubr.msk.f32.mxu0 %vm272_vm0, %v12669_v53 }
 0x100   : > { %9653 = vmatmul.mubr.msk.f32.gmra.mrb[12].mxu0 %vm272_vm0, %v12675_v54 }
 0x101   : > { %9655 = vmatprep.mubr.msk.f32.mxu0 %vm272_vm0, %v12677_v55 }
 0x104   : > { %9656 = vmatmul.mubr.msk.f32.gmra.mrb[14].mxu0 %vm272_vm0, %v12683_v56 }
 0x105   : > { %9658 = vmatprep.mubr.msk.f32.mxu0 %vm272_vm0, %v12685_v57 }
 0x108   : > { %9659 = vmatmul.mubr.msk.f32.gmra.mrb[16].mxu0 %vm272_vm0, %v12691_v58 }
 0x109   : > { %9661 = vmatprep.mubr.msk.f32.mxu0 %vm272_vm0, %v12693_v61 }
 0x10c   : > { %9662 = vmatmul.mubr.msk.f32.gmra.mrb[18].mxu0 %vm272_vm0, %v12699_v62 }
 0x10d   : > { %9664 = vmatprep.mubr.msk.f32.mxu0 %vm272_vm0, %v12701_v63 }
 0x110   : > { %9665 = vmatmul.mubr.msk.f32.gmra.mrb[20].mxu0 %vm272_vm0, %v12707_v2 }
 0x111   : > { %9667 = vmatprep.mubr.msk.f32.mxu0 %vm272_vm0, %v12709_v26 }
 0x114   : > { %9668 = vmatmul.mubr.msk.f32.gmra.mrb[22].mxu0 %vm272_vm0, %v12715_v27 }
 0x115   : > { %9670 = vmatprep.mubr.msk.f32.mxu0 %vm272_vm0, %v12717_v28 }
 0x118   : > { %9671 = vmatmul.mubr.msk.f32.gmra.mrb[24].mxu0 %vm272_vm0, %v12723_v29 }
 0x119   : > { %9673 = vmatprep.mubr.msk.f32.mxu0 %vm272_vm0, %v12725_v31 }
 0x11c   : > { %9674 = vmatmul.mubr.msk.f32.gmra.mrb[26].mxu0 %vm272_vm0, %v12731_v32 }
 0x11d   : > { %9676 = vmatprep.mubr.msk.f32.mxu0 %vm272_vm0, %v12733_v33 }
 0x120   : > { %9677 = vmatmul.mubr.msk.f32.gmra.mrb[28].mxu0 %vm272_vm0, %v12743_v38 }
 0x121   : > { %9679 = vmatprep.mubr.msk.f32.mxu0 %vm272_vm0, %v12745_v41 }
 0x124   : > { %9680 = vmatmul.mubr.msk.f32.gmra.mrb[30].mxu0 %vm272_vm0, %v12751_v43 }
 0x125   : > { %9698 = vmatprep.mubr.msk.f32.mxu0 %vm272_vm0, %v1116_v44  ;;  %v1549_v44 = vld [vmem:[#allocation7 + $0xf0] sm:$0xff] }
 0x126   : > { %v10766_v36 = vpack.c.bf16 %v1550_v17, %v1549_v44  ;;  %v12786_v17 = vld [vmem:[#allocation2 + $0x6a] sm:$0xff]  ;;  %v12802_v44 = vld [vmem:[#allocation2 + $0x9a] sm:$0xff] }
 0x127   : > { %14645 = vst [vmem:[#allocation27_spill] sm:$0xff] %v12786_v17  ;;  %14649 = vst [vmem:[#allocation31_spill] sm:$0xff] %v12802_v44 }
 0x128   : > { %9699 = vmatmul.mubr.msk.f32.vlgmr.msra.gmra.mrb[0].mxu0 %vm272_vm0, %v1117_v37  ;;  %v1937_v37 = vld [vmem:[#allocation7 + $0x100] sm:$0xff] }
 0x129   : > { %10757 = vmatpush3.bf16.msra.mxu0 %v12652_v47  ;;  %9701 = vmatprep.mubr.msk.f32.mxu0 %vm272_vm0, %v12756_v24  ;;  %v12772_v47 = vld [vmem:[#allocation2 + $0x4a] sm:$0xff] }
 0x12a   : > { %10759 = vmatprep.subr.bf16.mxu0 %v10758_v23  ;;  %v1938_v24 = vld [vmem:[#allocation7 + $0x108] sm:$0xff] }
 0x12c   : > { %9702 = vmatmul.mubr.msk.f32.gmra.mrb[2].mxu0 %vm272_vm0, %v12762_v20 }
 0x12d   : > { %9704 = vmatprep.mubr.msk.f32.mxu0 %vm272_vm0, %v12764_v19  ;;  %10761 = vmatpush3.bf16.msra.mxu0 %v10758_v23  ;;  %v10770_v19 = vpack.c.bf16 %v1938_v24, %v1937_v37  ;;  %v12788_v23 = vld [vmem:[#allocation2 + $0x7a] sm:$0xff]  ;;  %v12796_v24 = vld [vmem:[#allocation2 + $0x92] sm:$0xff] }
 0x12e   : > { %10763 = vmatprep.subr.bf16.mxu0 %v10762_v18  ;;  %14646 = vst [vmem:[#allocation28_spill] sm:$0xff] %v12788_v23  ;;  %14648 = vst [vmem:[#allocation30_spill] sm:$0xff] %v12796_v24  ;;  %v12810_v37 = vld [vmem:[#allocation2 + $0xb2] sm:$0xff] }
 0x12f   : > { %14651 = vst [vmem:[#allocation33_spill] sm:$0xff] %v12810_v37 }
 0x130   : > { %9705 = vmatmul.mubr.msk.f32.gmra.mrb[4].mxu0 %vm272_vm0, %v12770_v25 }
 0x131   : > { %9707 = vmatprep.mubr.msk.f32.mxu0 %vm272_vm0, %v12772_v47  ;;  %10765 = vmatpush3.bf16.msra.mxu0 %v10762_v18  ;;  %v12794_v18 = vld [vmem:[#allocation2 + $0x82] sm:$0xff] }
 0x132   : > { %10767 = vmatprep.subr.bf16.mxu0 %v10766_v36  ;;  %14647 = vst [vmem:[#allocation29_spill] sm:$0xff] %v12794_v18 }
 0x134   : > { %9708 = vmatmul.mubr.msk.f32.gmra.mrb[6].mxu0 %vm272_vm0, %v12778_v21  ;;  %v1944_v21 = vld [vmem:[#allocation7 + $0x138] sm:$0xff] }
 0x135   : > { %9710 = vmatprep.mubr.msk.f32.mxu0 %vm272_vm0, %v12780_v22  ;;  %10769 = vmatpush3.bf16.msra.mxu0 %v10766_v36  ;;  %v12804_v36 = vld [vmem:[#allocation2 + $0xaa] sm:$0xff] }
 0x136   : > { %10771 = vmatprep.subr.bf16.mxu0 %v10770_v19  ;;  %14650 = vst [vmem:[#allocation32_spill] sm:$0xff] %v12804_v36  ;;  %v1942_v22 = vld [vmem:[#allocation7 + $0x128] sm:$0xff] }
 0x138   : > { %9711 = vmatmul.mubr.msk.f32.gmra.mrb[8].mxu0 %vm272_vm0, %v12786_v17  ;;  %v1940_v17 = vld [vmem:[#allocation7 + $0x118] sm:$0xff] }
 0x139   : > { %9713 = vmatprep.mubr.msk.f32.mxu0 %vm272_vm0, %v12788_v23  ;;  %v12812_v23 = vld [vmem:[#allocation2 + $0xc2] sm:$0xff] }
 0x13a   : > { %14652 = vst [vmem:[#allocation34_spill] sm:$0xff] %v12812_v23 }
 0x13c   : > { %9714 = vmatmul.mubr.msk.f32.gmra.mrb[10].mxu0 %vm272_vm0, %v12794_v18  ;;  %v12820_v18 = vld [vmem:[#allocation2 + $0xda] sm:$0xff] }
 0x13d   : > { %9716 = vmatprep.mubr.msk.f32.mxu0 %vm272_vm0, %v12796_v24  ;;  %v12818_v24 = vld [vmem:[#allocation2 + $0xca] sm:$0xff]  ;;  %14654 = vst [vmem:[#allocation36_spill] sm:$0xff] %v12820_v18 }
 0x13e   : > { %14653 = vst [vmem:[#allocation35_spill] sm:$0xff] %v12818_v24 }
 0x140   : > { %9717 = vmatmul.mubr.msk.f32.gmra.mrb[12].mxu0 %vm272_vm0, %v12802_v44  ;;  %v12828_v44 = vld [vmem:[#allocation2 + $0xf2] sm:$0xff] }
 0x141   : > { %9719 = vmatprep.mubr.msk.f32.mxu0 %vm272_vm0, %v12804_v36  ;;  %v12826_v36 = vld [vmem:[#allocation2 + $0xe2] sm:$0xff]  ;;  %14656 = vst [vmem:[#allocation38_spill] sm:$0xff] %v12828_v44 }
 0x142   : > { %14655 = vst [vmem:[#allocation37_spill] sm:$0xff] %v12826_v36 }
 0x144   : > { %9720 = vmatmul.mubr.msk.f32.gmra.mrb[14].mxu0 %vm272_vm0, %v12810_v37  ;;  %v12836_v37 = vld [vmem:[#allocation2 + $0x10a] sm:$0xff] }
 0x145   : > { %9722 = vmatprep.mubr.msk.f32.mxu0 %vm272_vm0, %v12812_v23  ;;  %v12834_v23 = vld [vmem:[#allocation2 + $0xfa] sm:$0xff]  ;;  %14658 = vst [vmem:[#allocation40_spill] sm:$0xff] %v12836_v37 }
 0x146   : > { %14657 = vst [vmem:[#allocation39_spill] sm:$0xff] %v12834_v23 }
 0x148   : > { %9723 = vmatmul.mubr.msk.f32.gmra.mrb[16].mxu0 %vm272_vm0, %v12818_v24  ;;  %v12844_v24 = vld [vmem:[#allocation2 + $0x122] sm:$0xff] }
 0x149   : > { %9725 = vmatprep.mubr.msk.f32.mxu0 %vm272_vm0, %v12820_v18  ;;  %v12842_v18 = vld [vmem:[#allocation2 + $0x112] sm:$0xff]  ;;  %14660 = vst [vmem:[#allocation42_spill] sm:$0xff] %v12844_v24 }
 0x14a   : > { %14659 = vst [vmem:[#allocation41_spill] sm:$0xff] %v12842_v18 }
 0x14c   : > { %9726 = vmatmul.mubr.msk.f32.gmra.mrb[18].mxu0 %vm272_vm0, %v12826_v36  ;;  %v12852_v36 = vld [vmem:[#allocation2 + $0x13a] sm:$0xff] }
 0x14d   : > { %9728 = vmatprep.mubr.msk.f32.mxu0 %vm272_vm0, %v12828_v44  ;;  %v12850_v44 = vld [vmem:[#allocation2 + $0x12a] sm:$0xff]  ;;  %14662 = vst [vmem:[#allocation44_spill] sm:$0xff] %v12852_v36 }
 0x14e   : > { %14661 = vst [vmem:[#allocation43_spill] sm:$0xff] %v12850_v44 }
 0x150   : > { %9729 = vmatmul.mubr.msk.f32.gmra.mrb[20].mxu0 %vm272_vm0, %v12834_v23  ;;  %v12860_v23 = vld [vmem:[#allocation2 + $0x152] sm:$0xff] }
 0x151   : > { %9731 = vmatprep.mubr.msk.f32.mxu0 %vm272_vm0, %v12836_v37  ;;  %v12858_v37 = vld [vmem:[#allocation2 + $0x142] sm:$0xff]  ;;  %14664 = vst [vmem:[#allocation46_spill] sm:$0xff] %v12860_v23 }
 0x152   : > { %14663 = vst [vmem:[#allocation45_spill] sm:$0xff] %v12858_v37 }
 0x154   : > { %9732 = vmatmul.mubr.msk.f32.gmra.mrb[22].mxu0 %vm272_vm0, %v12842_v18  ;;  %v12868_v18 = vld [vmem:[#allocation2 + $0x16a] sm:$0xff] }
 0x155   : > { %9734 = vmatprep.mubr.msk.f32.mxu0 %vm272_vm0, %v12844_v24  ;;  %v12866_v24 = vld [vmem:[#allocation2 + $0x15a] sm:$0xff]  ;;  %14666 = vst [vmem:[#allocation48_spill] sm:$0xff] %v12868_v18 }
 0x156   : > { %14665 = vst [vmem:[#allocation47_spill] sm:$0xff] %v12866_v24 }
 0x158   : > { %9735 = vmatmul.mubr.msk.f32.gmra.mrb[24].mxu0 %vm272_vm0, %v12850_v44  ;;  %v1939_v44 = vld [vmem:[#allocation7 + $0x110] sm:$0xff] }
 0x159   : > { %9737 = vmatprep.mubr.msk.f32.mxu0 %vm272_vm0, %v12852_v36  ;;  %v12874_v36 = vld [vmem:[#allocation2 + $0x172] sm:$0xff] }
 0x15a   : > { %14667 = vst [vmem:[#allocation49_spill] sm:$0xff] %v12874_v36 }
 0x15c   : > { %9738 = vmatmul.mubr.msk.f32.gmra.mrb[26].mxu0 %vm272_vm0, %v12858_v37  ;;  %v1941_v37 = vld [vmem:[#allocation7 + $0x120] sm:$0xff] }
 0x15d   : > { %9740 = vmatprep.mubr.msk.f32.mxu0 %vm272_vm0, %v12860_v23  ;;  %v10774_v23 = vpack.c.bf16 %v1940_v17, %v1939_v44  ;;  %v2331_v17 = vld [vmem:[#allocation7 + $0x140] sm:$0xff]  ;;  %v2332_v44 = vld [vmem:[#allocation7 + $0x148] sm:$0xff] }
 0x160   : > { %9741 = vmatmul.mubr.msk.f32.gmra.mrb[28].mxu0 %vm272_vm0, %v12866_v24  ;;  %v1943_v24 = vld [vmem:[#allocation7 + $0x130] sm:$0xff] }
 0x161   : > { %9743 = vmatprep.mubr.msk.f32.mxu0 %vm272_vm0, %v12868_v18  ;;  %v10778_v18 = vpack.c.bf16 %v1942_v22, %v1941_v37  ;;  %v2333_v22 = vld [vmem:[#allocation7 + $0x150] sm:$0xff]  ;;  %v2336_v37 = vld [vmem:[#allocation7 + $0x168] sm:$0xff] }
 0x164   : > { %9744 = vmatmul.mubr.msk.f32.gmra.mrb[30].mxu0 %vm272_vm0, %v12874_v36 }
 0x165   : > { %9762 = vmatprep.mubr.msk.f32.mxu0 %vm272_vm0, %v12627_v30  ;;  %v10782_v30 = vpack.c.bf16 %v1944_v21, %v1943_v24  ;;  %v12942_v21 = vld [vmem:[#allocation2 + $0x188] sm:$0xff]  ;;  %v2335_v24 = vld [vmem:[#allocation7 + $0x160] sm:$0xff] }
 0x168   : > { %9763 = vmatmul.mubr.msk.f32.vlgmr.msra.gmra.mrb[0].mxu0 %vm272_vm0, %v12632_v34  ;;  %v12936_v34 = vld [vmem:[#allocation2 + $0x180] sm:$0xff] }
 0x169   : > { %10773 = vmatpush3.bf16.msra.mxu0 %v10770_v19  ;;  %9765 = vmatprep.mubr.msk.f32.mxu0 %vm272_vm0, %v12634_v35  ;;  %v10786_v19 = vpack.c.bf16 %v2332_v44, %v2331_v17  ;;  %v2337_v17 = vld [vmem:[#allocation7 + $0x170] sm:$0xff]  ;;  %v2338_v44 = vld [vmem:[#allocation7 + $0x178] sm:$0xff] }
 0x16a   : > { %10775 = vmatprep.subr.bf16.mxu0 %v10774_v23 }
 0x16c   : > { %9766 = vmatmul.mubr.msk.f32.gmra.mrb[2].mxu0 %vm272_vm0, %v12640_v39 }
 0x16d   : > { %9768 = vmatprep.mubr.msk.f32.mxu0 %vm272_vm0, %v12642_v40  ;;  %10777 = vmatpush3.bf16.msra.mxu0 %v10774_v23  ;;  %v2334_v23 = vld [vmem:[#allocation7 + $0x158] sm:$0xff] }
 0x16e   : > { %10779 = vmatprep.subr.bf16.mxu0 %v10778_v18 }
 0x170   : > { %9769 = vmatmul.mubr.msk.f32.gmra.mrb[4].mxu0 %vm272_vm0, %v12648_v45 }
 0x171   : > { %9771 = vmatprep.mubr.msk.f32.mxu0 %vm272_vm0, %v12650_v46  ;;  %10781 = vmatpush3.bf16.msra.mxu0 %v10778_v18  ;;  %v10790_v18 = vpack.c.bf16 %v2334_v23, %v2333_v22  ;;  %v2726_v22 = vld [vmem:[#allocation7 + $0x180] sm:$0xff]  ;;  %v2727_v23 = vld [vmem:[#allocation7 + $0x188] sm:$0xff] }
 0x172   : > { %10783 = vmatprep.subr.bf16.mxu0 %v10782_v30 }
 0x174   : > { %9772 = vmatmul.mubr.msk.f32.gmra.mrb[6].mxu0 %vm272_vm0, %v12658_v50 }
 0x175   : > { %9774 = vmatprep.mubr.msk.f32.mxu0 %vm272_vm0, %v12660_v51  ;;  %10785 = vmatpush3.bf16.msra.mxu0 %v10782_v30  ;;  %v10794_v30 = vpack.c.bf16 %v2336_v37, %v2335_v24  ;;  %v3120_v37 = vld [vmem:[#allocation7 + $0x1c0] sm:$0xff] }
 0x176   : > { %10787 = vmatprep.subr.bf16.mxu0 %v10786_v19 }
 0x178   : > { %9775 = vmatmul.mubr.msk.f32.gmra.mrb[8].mxu0 %vm272_vm0, %v12667_v52 }
 0x179   : > { %9777 = vmatprep.mubr.msk.f32.mxu0 %vm272_vm0, %v12669_v53 }
 0x17c   : > { %9778 = vmatmul.mubr.msk.f32.gmra.mrb[10].mxu0 %vm272_vm0, %v12675_v54 }
 0x17d   : > { %9780 = vmatprep.mubr.msk.f32.mxu0 %vm272_vm0, %v12677_v55 }
 0x180   : > { %9781 = vmatmul.mubr.msk.f32.gmra.mrb[12].mxu0 %vm272_vm0, %v12683_v56 }
 0x181   : > { %9783 = vmatprep.mubr.msk.f32.mxu0 %vm272_vm0, %v12685_v57 }
 0x184   : > { %9784 = vmatmul.mubr.msk.f32.gmra.mrb[14].mxu0 %vm272_vm0, %v12691_v58 }
 0x185   : > { %9786 = vmatprep.mubr.msk.f32.mxu0 %vm272_vm0, %v12693_v61 }
 0x188   : > { %9787 = vmatmul.mubr.msk.f32.gmra.mrb[16].mxu0 %vm272_vm0, %v12699_v62 }
 0x189   : > { %9789 = vmatprep.mubr.msk.f32.mxu0 %vm272_vm0, %v12701_v63 }
 0x18c   : > { %9790 = vmatmul.mubr.msk.f32.gmra.mrb[18].mxu0 %vm272_vm0, %v12707_v2 }
 0x18d   : > { %9792 = vmatprep.mubr.msk.f32.mxu0 %vm272_vm0, %v12709_v26 }
 0x190   : > { %9793 = vmatmul.mubr.msk.f32.gmra.mrb[20].mxu0 %vm272_vm0, %v12715_v27 }
 0x191   : > { %9795 = vmatprep.mubr.msk.f32.mxu0 %vm272_vm0, %v12717_v28 }
 0x194   : > { %9796 = vmatmul.mubr.msk.f32.gmra.mrb[22].mxu0 %vm272_vm0, %v12723_v29 }
 0x195   : > { %9798 = vmatprep.mubr.msk.f32.mxu0 %vm272_vm0, %v12725_v31 }
 0x198   : > { %9799 = vmatmul.mubr.msk.f32.gmra.mrb[24].mxu0 %vm272_vm0, %v12731_v32 }
 0x199   : > { %9801 = vmatprep.mubr.msk.f32.mxu0 %vm272_vm0, %v12733_v33 }
 0x19c   : > { %9802 = vmatmul.mubr.msk.f32.gmra.mrb[26].mxu0 %vm272_vm0, %v12743_v38 }
 0x19d   : > { %9804 = vmatprep.mubr.msk.f32.mxu0 %vm272_vm0, %v12745_v41 }
 0x1a0   : > { %9805 = vmatmul.mubr.msk.f32.gmra.mrb[28].mxu0 %vm272_vm0, %v12751_v43 }
 0x1a1   : > { %9807 = vmatprep.mubr.msk.f32.mxu0 %vm272_vm0, %v12936_v34 }
 0x1a4   : > { %9808 = vmatmul.mubr.msk.f32.gmra.mrb[30].mxu0 %vm272_vm0, %v12942_v21 }
 0x1a5   : > { %9826 = vmatprep.mubr.msk.f32.mxu0 %vm272_vm0, %v12489_v42  ;;  %v10798_v42 = vpack.c.bf16 %v2338_v44, %v2337_v17  ;;  %v14680_v17 = vld [vmem:[#allocation26_spill] sm:$0xff] }
 0x1a8   : > { %9827 = vmatmul.mubr.msk.f32.vlgmr.msra.gmra.mrb[0].mxu0 %vm272_vm0, %v12494_v48  ;;  %v10802_v48 = vpack.c.bf16 %v2727_v23, %v2726_v22  ;;  %v14682_v22 = vld [vmem:[#allocation28_spill] sm:$0xff]  ;;  %v14683_v23 = vld [vmem:[#allocation29_spill] sm:$0xff] }
 0x1a9   : > { %10789 = vmatpush3.bf16.msra.mxu0 %v10786_v19  ;;  %9829 = vmatprep.mubr.msk.f32.mxu0 %vm272_vm0, %v12500_v49  ;;  %v14668_v49 = vld [vmem:[#allocation14_spill] sm:$0xff]  ;;  %v2732_v19 = vld [vmem:[#allocation7 + $0x1b0] sm:$0xff] }
 0x1aa   : > { %10791 = vmatprep.subr.bf16.mxu0 %v10790_v18 }
 0x1ac   : > { %9830 = vmatmul.mubr.msk.f32.gmra.mrb[2].mxu0 %vm272_vm0, %v12518_v59  ;;  %v14669_v59 = vld [vmem:[#allocation15_spill] sm:$0xff] }
 0x1ad   : > { %9832 = vmatprep.mubr.msk.f32.mxu0 %vm272_vm0, %v12520_v60  ;;  %10793 = vmatpush3.bf16.msra.mxu0 %v10790_v18  ;;  %v14670_v60 = vld [vmem:[#allocation16_spill] sm:$0xff]  ;;  %v2733_v18 = vld [vmem:[#allocation7 + $0x1b8] sm:$0xff] }
 0x1ae   : > { %10795 = vmatprep.subr.bf16.mxu0 %v10794_v30  ;;  %v10814_v24 = vpack.c.bf16 %v2733_v18, %v2732_v19  ;;  %v14701_v19 = vld [vmem:[#allocation47_spill] sm:$0xff]  ;;  %v14702_v18 = vld [vmem:[#allocation48_spill] sm:$0xff] }
 0x1b0   : > { %9833 = vmatmul.mubr.msk.f32.gmra.mrb[4].mxu0 %vm272_vm0, %v12526_v0  ;;  %v14671_v0 = vld [vmem:[#allocation17_spill] sm:$0xff] }
 0x1b1   : > { %9835 = vmatprep.mubr.msk.f32.mxu0 %vm272_vm0, %v12528_v1  ;;  %10797 = vmatpush3.bf16.msra.mxu0 %v10794_v30  ;;  %v14672_v1 = vld [vmem:[#allocation18_spill] sm:$0xff]  ;;  %v3121_v30 = vld [vmem:[#allocation7 + $0x1c8] sm:$0xff] }
 0x1b2   : > { %10799 = vmatprep.subr.bf16.mxu0 %v10798_v42  ;;  %v10818_v44 = vpack.c.bf16 %v3121_v30, %v3120_v37  ;;  %v13078_v37 = vld [vmem:[#allocation2 + $0x18a] sm:$0xff] }
 0x1b3   : > { %v3122_v30 = vld [vmem:[#allocation7 + $0x1d0] sm:$0xff] }
 0x1b4   : > { %9836 = vmatmul.mubr.msk.f32.gmra.mrb[6].mxu0 %vm272_vm0, %v12534_v3  ;;  %v14673_v3 = vld [vmem:[#allocation19_spill] sm:$0xff] }
 0x1b5   : > { %9838 = vmatprep.mubr.msk.f32.mxu0 %vm272_vm0, %v12536_v4  ;;  %10801 = vmatpush3.bf16.msra.mxu0 %v10798_v42  ;;  %v14674_v4 = vld [vmem:[#allocation20_spill] sm:$0xff]  ;;  %v14681_v42 = vld [vmem:[#allocation27_spill] sm:$0xff] }
 0x1b6   : > { %10803 = vmatprep.subr.bf16.mxu0 %v10802_v48 }
 0x1b8   : > { %9839 = vmatmul.mubr.msk.f32.gmra.mrb[8].mxu0 %vm272_vm0, %v12542_v5  ;;  %v14675_v5 = vld [vmem:[#allocation21_spill] sm:$0xff] }
 0x1b9   : > { %9841 = vmatprep.mubr.msk.f32.mxu0 %vm272_vm0, %v12544_v6  ;;  %v13004_v6 = vld [vmem:[#allocation2 + $0x181] sm:$0xff] }
 0x1bc   : > { %9842 = vmatmul.mubr.msk.f32.gmra.mrb[10].mxu0 %vm272_vm0, %v12550_v7  ;;  %v14676_v7 = vld [vmem:[#allocation22_spill] sm:$0xff] }
 0x1bd   : > { %9844 = vmatprep.mubr.msk.f32.mxu0 %vm272_vm0, %v12552_v8  ;;  %v13010_v8 = vld [vmem:[#allocation2 + $0x189] sm:$0xff] }
 0x1c0   : > { %9845 = vmatmul.mubr.msk.f32.gmra.mrb[12].mxu0 %vm272_vm0, %v12558_v9  ;;  %v2728_v9 = vld [vmem:[#allocation7 + $0x190] sm:$0xff] }
 0x1c1   : > { %9847 = vmatprep.mubr.msk.f32.mxu0 %vm272_vm0, %v12560_v10  ;;  %v2729_v10 = vld [vmem:[#allocation7 + $0x198] sm:$0xff] }
 0x1c4   : > { %9848 = vmatmul.mubr.msk.f32.gmra.mrb[14].mxu0 %vm272_vm0, %v12566_v11  ;;  %v14677_v11 = vld [vmem:[#allocation23_spill] sm:$0xff] }
 0x1c5   : > { %9850 = vmatprep.mubr.msk.f32.mxu0 %vm272_vm0, %v12568_v12  ;;  %v10806_v12 = vpack.c.bf16 %v2729_v10, %v2728_v9  ;;  %v14694_v9 = vld [vmem:[#allocation40_spill] sm:$0xff]  ;;  %v14695_v10 = vld [vmem:[#allocation41_spill] sm:$0xff] }
 0x1c8   : > { %9851 = vmatmul.mubr.msk.f32.gmra.mrb[16].mxu0 %vm272_vm0, %v12574_v13  ;;  %v2730_v13 = vld [vmem:[#allocation7 + $0x1a0] sm:$0xff] }
 0x1c9   : > { %9853 = vmatprep.mubr.msk.f32.mxu0 %vm272_vm0, %v12576_v14  ;;  %v2731_v14 = vld [vmem:[#allocation7 + $0x1a8] sm:$0xff] }
 0x1cc   : > { %9854 = vmatmul.mubr.msk.f32.gmra.mrb[18].mxu0 %vm272_vm0, %v12582_v15  ;;  %v14678_v15 = vld [vmem:[#allocation24_spill] sm:$0xff] }
 0x1cd   : > { %9856 = vmatprep.mubr.msk.f32.mxu0 %vm272_vm0, %v12584_v16  ;;  %v10810_v16 = vpack.c.bf16 %v2731_v14, %v2730_v13  ;;  %v14698_v13 = vld [vmem:[#allocation44_spill] sm:$0xff]  ;;  %v14699_v14 = vld [vmem:[#allocation45_spill] sm:$0xff] }
 0x1d0   : > { %9857 = vmatmul.mubr.msk.f32.gmra.mrb[20].mxu0 %vm272_vm0, %v14668_v49  ;;  %v14685_v49 = vld [vmem:[#allocation31_spill] sm:$0xff] }
 0x1d1   : > { %9859 = vmatprep.mubr.msk.f32.mxu0 %vm272_vm0, %v14669_v59  ;;  %v14686_v59 = vld [vmem:[#allocation32_spill] sm:$0xff] }
 0x1d4   : > { %9860 = vmatmul.mubr.msk.f32.gmra.mrb[22].mxu0 %vm272_vm0, %v14670_v60  ;;  %v14687_v60 = vld [vmem:[#allocation33_spill] sm:$0xff] }
 0x1d5   : > { %9862 = vmatprep.mubr.msk.f32.mxu0 %vm272_vm0, %v14671_v0  ;;  %v14688_v0 = vld [vmem:[#allocation34_spill] sm:$0xff] }
 0x1d8   : > { %9863 = vmatmul.mubr.msk.f32.gmra.mrb[24].mxu0 %vm272_vm0, %v14672_v1  ;;  %v14689_v1 = vld [vmem:[#allocation35_spill] sm:$0xff] }
 0x1d9   : > { %9865 = vmatprep.mubr.msk.f32.mxu0 %vm272_vm0, %v14673_v3  ;;  %v14690_v3 = vld [vmem:[#allocation36_spill] sm:$0xff] }
 0x1dc   : > { %9866 = vmatmul.mubr.msk.f32.gmra.mrb[26].mxu0 %vm272_vm0, %v14674_v4  ;;  %v14691_v4 = vld [vmem:[#allocation37_spill] sm:$0xff] }
 0x1dd   : > { %9868 = vmatprep.mubr.msk.f32.mxu0 %vm272_vm0, %v14675_v5  ;;  %v14692_v5 = vld [vmem:[#allocation38_spill] sm:$0xff] }
 0x1e0   : > { %9869 = vmatmul.mubr.msk.f32.gmra.mrb[28].mxu0 %vm272_vm0, %v14676_v7  ;;  %v14693_v7 = vld [vmem:[#allocation39_spill] sm:$0xff] }
 0x1e1   : > { %9871 = vmatprep.mubr.msk.f32.mxu0 %vm272_vm0, %v13004_v6 }
 0x1e4   : > { %9872 = vmatmul.mubr.msk.f32.gmra.mrb[30].mxu0 %vm272_vm0, %v13010_v8 }
 0x1e5   : > { %9890 = vmatprep.mubr.msk.f32.mxu0 %vm272_vm0, %v14677_v11  ;;  %v14696_v11 = vld [vmem:[#allocation42_spill] sm:$0xff] }
 0x1e8   : > { %9891 = vmatmul.mubr.msk.f32.vlgmr.msra.gmra.mrb[0].mxu0 %vm272_vm0, %v12762_v20  ;;  %v14679_v20 = vld [vmem:[#allocation25_spill] sm:$0xff] }
 0x1e9   : > { %10805 = vmatpush3.bf16.msra.mxu0 %v10802_v48  ;;  %9893 = vmatprep.mubr.msk.f32.mxu0 %vm272_vm0, %v14678_v15  ;;  %v14684_v48 = vld [vmem:[#allocation30_spill] sm:$0xff] }
 0x1ea   : > { %10807 = vmatprep.subr.bf16.mxu0 %v10806_v12 }
 0x1ec   : > { %9894 = vmatmul.mubr.msk.f32.gmra.mrb[2].mxu0 %vm272_vm0, %v12770_v25 }
 0x1ed   : > { %9896 = vmatprep.mubr.msk.f32.mxu0 %vm272_vm0, %v12772_v47  ;;  %10809 = vmatpush3.bf16.msra.mxu0 %v10806_v12  ;;  %v14697_v12 = vld [vmem:[#allocation43_spill] sm:$0xff] }
 0x1ee   : > { %10811 = vmatprep.subr.bf16.mxu0 %v10810_v16 }
 0x1f0   : > { %9897 = vmatmul.mubr.msk.f32.gmra.mrb[4].mxu0 %vm272_vm0, %v14679_v20 }
 0x1f1   : > { %9899 = vmatprep.mubr.msk.f32.mxu0 %vm272_vm0, %v14680_v17  ;;  %10813 = vmatpush3.bf16.msra.mxu0 %v10810_v16  ;;  %v14700_v16 = vld [vmem:[#allocation46_spill] sm:$0xff] }
 0x1f2   : > { %10815 = vmatprep.subr.bf16.mxu0 %v10814_v24 }
 0x1f4   : > { %9900 = vmatmul.mubr.msk.f32.gmra.mrb[6].mxu0 %vm272_vm0, %v14681_v42 }
 0x1f5   : > { %9902 = vmatprep.mubr.msk.f32.mxu0 %vm272_vm0, %v14682_v22  ;;  %10817 = vmatpush3.bf16.msra.mxu0 %v10814_v24  ;;  %v13072_v24 = vld [vmem:[#allocation2 + $0x182] sm:$0xff] }
 0x1f6   : > { %10819 = vmatprep.subr.bf16.mxu0 %v10818_v44  ;;  %14703 = vst [vmem:[#allocation14_spill] sm:$0xff] %v13072_v24 }
 0x1f8   : > { %9903 = vmatmul.mubr.msk.f32.gmra.mrb[8].mxu0 %vm272_vm0, %v14683_v23 }
 0x1f9   : > { %9905 = vmatprep.mubr.msk.f32.mxu0 %vm272_vm0, %v14684_v48 }
 0x1fc   : > { %9906 = vmatmul.mubr.msk.f32.gmra.mrb[10].mxu0 %vm272_vm0, %v14685_v49 }
 0x1fd   : > { %9908 = vmatprep.mubr.msk.f32.mxu0 %vm272_vm0, %v14686_v59 }
 0x200   : > { %9909 = vmatmul.mubr.msk.f32.gmra.mrb[12].mxu0 %vm272_vm0, %v14687_v60 }
 0x201   : > { %9911 = vmatprep.mubr.msk.f32.mxu0 %vm272_vm0, %v14688_v0 }
 0x204   : > { %9912 = vmatmul.mubr.msk.f32.gmra.mrb[14].mxu0 %vm272_vm0, %v14689_v1 }
 0x205   : > { %9914 = vmatprep.mubr.msk.f32.mxu0 %vm272_vm0, %v14690_v3 }
 0x208   : > { %9915 = vmatmul.mubr.msk.f32.gmra.mrb[16].mxu0 %vm272_vm0, %v14691_v4 }
 0x209   : > { %9917 = vmatprep.mubr.msk.f32.mxu0 %vm272_vm0, %v14692_v5 }
 0x20c   : > { %9918 = vmatmul.mubr.msk.f32.gmra.mrb[18].mxu0 %vm272_vm0, %v14693_v7 }
 0x20d   : > { %9920 = vmatprep.mubr.msk.f32.mxu0 %vm272_vm0, %v14694_v9 }
 0x210   : > { %9921 = vmatmul.mubr.msk.f32.gmra.mrb[20].mxu0 %vm272_vm0, %v14695_v10 }
 0x211   : > { %9923 = vmatprep.mubr.msk.f32.mxu0 %vm272_vm0, %v14696_v11 }
 0x214   : > { %9924 = vmatmul.mubr.msk.f32.gmra.mrb[22].mxu0 %vm272_vm0, %v14697_v12 }
 0x215   : > { %9926 = vmatprep.mubr.msk.f32.mxu0 %vm272_vm0, %v14698_v13  ;;  %v3127_v13 = vld [vmem:[#allocation7 + $0x1f8] sm:$0xff] }
 0x218   : > { %9927 = vmatmul.mubr.msk.f32.gmra.mrb[24].mxu0 %vm272_vm0, %v14699_v14  ;;  %v3123_v14 = vld [vmem:[#allocation7 + $0x1d8] sm:$0xff] }
 0x219   : > { %9929 = vmatprep.mubr.msk.f32.mxu0 %vm272_vm0, %v14700_v16  ;;  %v3125_v16 = vld [vmem:[#allocation7 + $0x1e8] sm:$0xff] }
 0x21c   : > { %9930 = vmatmul.mubr.msk.f32.gmra.mrb[26].mxu0 %vm272_vm0, %v14701_v19  ;;  %v10822_v19 = vpack.c.bf16 %v3123_v14, %v3122_v30  ;;  %v3514_v14 = vld [vmem:[#allocation7 + $0x200] sm:$0xff]  ;;  %v3515_v30 = vld [vmem:[#allocation7 + $0x208] sm:$0xff] }
 0x21d   : > { %9932 = vmatprep.mubr.msk.f32.mxu0 %vm272_vm0, %v14702_v18  ;;  %v3124_v18 = vld [vmem:[#allocation7 + $0x1e0] sm:$0xff] }
 0x220   : > { %9933 = vmatmul.mubr.msk.f32.gmra.mrb[28].mxu0 %vm272_vm0, %v12874_v36  ;;  %v3126_v36 = vld [vmem:[#allocation7 + $0x1f0] sm:$0xff] }
 0x221   : > { %9935 = vmatprep.mubr.msk.f32.mxu0 %vm272_vm0, %v13072_v24  ;;  %v10826_v24 = vpack.c.bf16 %v3125_v16, %v3124_v18  ;;  %v3107_v16 = vld [vmem:[#allocation2 + $0x121] sm:$0xff]  ;;  %v3109_v18 = vld [vmem:[#allocation2 + $0x139] sm:$0xff] }
 0x224   : > { %9936 = vmatmul.mubr.msk.f32.gmra.mrb[30].mxu0 %vm272_vm0, %v13078_v37 }
 0x225   : > { %9954 = vmatprep.mubr.msk.f32.mxu0 %vm272_vm0, %v12634_v35  ;;  %v10830_v35 = vpack.c.bf16 %v3127_v13, %v3126_v36  ;;  %v3102_v36 = vld [vmem:[#allocation2 + $0xe1] sm:$0xff]  ;;  %v3106_v13 = vld [vmem:[#allocation2 + $0x111] sm:$0xff] }
 0x228   : > { %9955 = vmatmul.mubr.msk.f32.vlgmr.msra.gmra.mrb[0].mxu0 %vm272_vm0, %v12640_v39  ;;  %v10834_v39 = vpack.c.bf16 %v3515_v30, %v3514_v14  ;;  %v3112_v14 = vld [vmem:[#allocation2 + $0x159] sm:$0xff]  ;;  %v3113_v30 = vld [vmem:[#allocation2 + $0x169] sm:$0xff] }
 0x229   : > { %10821 = vmatpush3.bf16.msra.mxu0 %v10818_v44  ;;  %9957 = vmatprep.mubr.msk.f32.mxu0 %vm272_vm0, %v12642_v40  ;;  %v2723_v40 = vld [vmem:[#allocation2 + $0x198] sm:$0xff]  ;;  %v3105_v44 = vld [vmem:[#allocation2 + $0x109] sm:$0xff] }
 0x22a   : > { %10823 = vmatprep.subr.bf16.mxu0 %v10822_v19 }
 0x22c   : > { %9958 = vmatmul.mubr.msk.f32.gmra.mrb[2].mxu0 %vm272_vm0, %v12648_v45  ;;  %v2724_v45 = vld [vmem:[#allocation2 + $0x1a0] sm:$0xff] }
 0x22d   : > { %9960 = vmatprep.mubr.msk.f32.mxu0 %vm272_vm0, %v12650_v46  ;;  %10825 = vmatpush3.bf16.msra.mxu0 %v10822_v19  ;;  %v3087_v46 = vld [vmem:[#allocation2 + $0x31] sm:$0xff]  ;;  %v3108_v19 = vld [vmem:[#allocation2 + $0x129] sm:$0xff] }
 0x22e   : > { %10827 = vmatprep.subr.bf16.mxu0 %v10826_v24 }
 0x230   : > { %9961 = vmatmul.mubr.msk.f32.gmra.mrb[4].mxu0 %vm272_vm0, %v12658_v50  ;;  %v3516_v50 = vld [vmem:[#allocation7 + $0x210] sm:$0xff] }
 0x231   : > { %9963 = vmatprep.mubr.msk.f32.mxu0 %vm272_vm0, %v12660_v51  ;;  %10829 = vmatpush3.bf16.msra.mxu0 %v10826_v24  ;;  %v3517_v51 = vld [vmem:[#allocation7 + $0x218] sm:$0xff]  ;;  %v3110_v24 = vld [vmem:[#allocation2 + $0x141] sm:$0xff] }
 0x232   : > { %10831 = vmatprep.subr.bf16.mxu0 %v10830_v35 }
 0x234   : > { %9964 = vmatmul.mubr.msk.f32.gmra.mrb[6].mxu0 %vm272_vm0, %v12667_v52  ;;  %v3088_v52 = vld [vmem:[#allocation2 + $0x39] sm:$0xff] }
 0x235   : > { %9966 = vmatprep.mubr.msk.f32.mxu0 %vm272_vm0, %v12669_v53  ;;  %10833 = vmatpush3.bf16.msra.mxu0 %v10830_v35  ;;  %v3089_v53 = vld [vmem:[#allocation2 + $0x49] sm:$0xff]  ;;  %v3111_v35 = vld [vmem:[#allocation2 + $0x151] sm:$0xff] }
 0x236   : > { %10835 = vmatprep.subr.bf16.mxu0 %v10834_v39 }
 0x238   : > { %9967 = vmatmul.mubr.msk.f32.gmra.mrb[8].mxu0 %vm272_vm0, %v12675_v54  ;;  %v10838_v54 = vpack.c.bf16 %v3517_v51, %v3516_v50  ;;  %v4259_v50 = vld [vmem:[#allocation9 + $0x10] sm:$0xff]  ;;  %v4260_v51 = vld [vmem:[#allocation9 + $0x18] sm:$0xff] }
 0x239   : > { %9969 = vmatprep.mubr.msk.f32.mxu0 %vm272_vm0, %v12677_v55  ;;  %v3518_v55 = vld [vmem:[#allocation7 + $0x220] sm:$0xff] }
 0x23c   : > { %9970 = vmatmul.mubr.msk.f32.gmra.mrb[10].mxu0 %vm272_vm0, %v12683_v56  ;;  %v3519_v56 = vld [vmem:[#allocation7 + $0x228] sm:$0xff] }
 0x23d   : > { %9972 = vmatprep.mubr.msk.f32.mxu0 %vm272_vm0, %v12685_v57  ;;  %v3090_v57 = vld [vmem:[#allocation2 + $0x51] sm:$0xff] }
 0x240   : > { %9973 = vmatmul.mubr.msk.f32.gmra.mrb[12].mxu0 %vm272_vm0, %v12691_v58  ;;  %v3091_v58 = vld [vmem:[#allocation2 + $0x61] sm:$0xff] }
 0x241   : > { %9975 = vmatprep.mubr.msk.f32.mxu0 %vm272_vm0, %v12693_v61  ;;  %v10842_v61 = vpack.c.bf16 %v3519_v56, %v3518_v55  ;;  %v4263_v56 = vld [vmem:[#allocation9 + $0x30] sm:$0xff] }
 0x244   : > { %9976 = vmatmul.mubr.msk.f32.gmra.mrb[14].mxu0 %vm272_vm0, %v12699_v62  ;;  %v3520_v62 = vld [vmem:[#allocation7 + $0x230] sm:$0xff] }
 0x245   : > { %9978 = vmatprep.mubr.msk.f32.mxu0 %vm272_vm0, %v12701_v63  ;;  %v3521_v63 = vld [vmem:[#allocation7 + $0x238] sm:$0xff] }
 0x248   : > { %9979 = vmatmul.mubr.msk.f32.gmra.mrb[16].mxu0 %vm272_vm0, %v12707_v2  ;;  %v3092_v2 = vld [vmem:[#allocation2 + $0x69] sm:$0xff] }
 0x249   : > { %9981 = vmatprep.mubr.msk.f32.mxu0 %vm272_vm0, %v12709_v26  ;;  %v3093_v26 = vld [vmem:[#allocation2 + $0x79] sm:$0xff] }
 0x24c   : > { %9982 = vmatmul.mubr.msk.f32.gmra.mrb[18].mxu0 %vm272_vm0, %v12715_v27  ;;  %v10846_v27 = vpack.c.bf16 %v3521_v63, %v3520_v62  ;;  %v4982_v62 = vld [vmem:[#allocation9 + $0x88] sm:$0xff] }
 0x24d   : > { %9984 = vmatprep.mubr.msk.f32.mxu0 %vm272_vm0, %v12717_v28  ;;  %v3094_v28 = vld [vmem:[#allocation2 + $0x81] sm:$0xff] }
 0x250   : > { %9985 = vmatmul.mubr.msk.f32.gmra.mrb[20].mxu0 %vm272_vm0, %v12723_v29  ;;  %v3095_v29 = vld [vmem:[#allocation2 + $0x91] sm:$0xff] }
 0x251   : > { %9987 = vmatprep.mubr.msk.f32.mxu0 %vm272_vm0, %v12725_v31  ;;  %v3096_v31 = vld [vmem:[#allocation2 + $0x99] sm:$0xff] }
 0x254   : > { %9988 = vmatmul.mubr.msk.f32.gmra.mrb[22].mxu0 %vm272_vm0, %v12731_v32  ;;  %v3097_v32 = vld [vmem:[#allocation2 + $0xa9] sm:$0xff] }
 0x255   : > { %9990 = vmatprep.mubr.msk.f32.mxu0 %vm272_vm0, %v12733_v33  ;;  %v3098_v33 = vld [vmem:[#allocation2 + $0xb1] sm:$0xff] }
 0x258   : > { %9991 = vmatmul.mubr.msk.f32.gmra.mrb[24].mxu0 %vm272_vm0, %v12743_v38  ;;  %v3099_v38 = vld [vmem:[#allocation2 + $0xc1] sm:$0xff] }
 0x259   : > { %9993 = vmatprep.mubr.msk.f32.mxu0 %vm272_vm0, %v12745_v41  ;;  %v3100_v41 = vld [vmem:[#allocation2 + $0xc9] sm:$0xff] }
 0x25c   : > { %9994 = vmatmul.mubr.msk.f32.gmra.mrb[26].mxu0 %vm272_vm0, %v12751_v43  ;;  %v3101_v43 = vld [vmem:[#allocation2 + $0xd9] sm:$0xff] }
 0x25d   : > { %9996 = vmatprep.mubr.msk.f32.mxu0 %vm272_vm0, %v12936_v34  ;;  %v3103_v34 = vld [vmem:[#allocation2 + $0xf1] sm:$0xff] }
 0x260   : > { %9997 = vmatmul.mubr.msk.f32.gmra.mrb[28].mxu0 %vm272_vm0, %v12942_v21  ;;  %v3104_v21 = vld [vmem:[#allocation2 + $0xf9] sm:$0xff] }
 0x261   : > { %9999 = vmatprep.mubr.msk.f32.mxu0 %vm272_vm0, %v2723_v40  ;;  %v3117_v40 = vld [vmem:[#allocation2 + $0x199] sm:$0xff] }
 0x264   : > { %10000 = vmatmul.mubr.msk.f32.gmra.mrb[30].mxu0 %vm272_vm0, %v2724_v45  ;;  %v3118_v45 = vld [vmem:[#allocation2 + $0x1a1] sm:$0xff] }
 0x265   : > { %10018 = vmatprep.mubr.msk.f32.mxu0 %vm272_vm0, %v3087_v46 }
 0x268   : > { %10019 = vmatmul.mubr.msk.f32.vlgmr.msra.gmra.mrb[0].mxu0 %vm272_vm0, %v3088_v52  ;;  %v10870_v52 = vpack.c.bf16 %v4260_v51, %v4259_v50 }
 0x269   : > { %10837 = vmatpush3.bf16.msra.mxu0 %v10834_v39  ;;  %10021 = vmatprep.mubr.msk.f32.mxu0 %vm272_vm0, %v3089_v53  ;;  %v3114_v39 = vld [vmem:[#allocation2 + $0x171] sm:$0xff]  ;;  %v4261_v53 = vld [vmem:[#allocation9 + $0x20] sm:$0xff] }
 0x26a   : > { %10839 = vmatprep.subr.bf16.mxu0 %v10838_v54 }
 0x26c   : > { %10022 = vmatmul.mubr.msk.f32.gmra.mrb[2].mxu0 %vm272_vm0, %v3090_v57  ;;  %v4264_v57 = vld [vmem:[#allocation9 + $0x38] sm:$0xff] }
 0x26d   : > { %10024 = vmatprep.mubr.msk.f32.mxu0 %vm272_vm0, %v3091_v58  ;;  %10841 = vmatpush3.bf16.msra.mxu0 %v10838_v54  ;;  %v4262_v54 = vld [vmem:[#allocation9 + $0x28] sm:$0xff]  ;;  %v10878_v58 = vpack.c.bf16 %v4264_v57, %v4263_v56 }
 0x26e   : > { %10843 = vmatprep.subr.bf16.mxu0 %v10842_v61  ;;  %v10874_v55 = vpack.c.bf16 %v4262_v54, %v4261_v53 }
 0x270   : > { %10025 = vmatmul.mubr.msk.f32.gmra.mrb[4].mxu0 %vm272_vm0, %v3092_v2  ;;  %v13248_v2 = vld [vmem:[%s14491_s2] ss:$0 sm:$0xff] }
 0x271   : > { %10027 = vmatprep.mubr.msk.f32.mxu0 %vm272_vm0, %v3093_v26  ;;  %10845 = vmatpush3.bf16.msra.mxu0 %v10842_v61  ;;  %v4981_v61 = vld [vmem:[#allocation9 + $0x80] sm:$0xff] }
 0x272   : > { %10847 = vmatprep.subr.bf16.mxu0 %v10846_v27  ;;  %v13242_v63 = vpack.c.bf16 %v4982_v62, %v4981_v61 }
 0x274   : > { %10028 = vmatmul.mubr.msk.f32.gmra.mrb[6].mxu0 %vm272_vm0, %v3094_v28 }
 0x275   : > { %10030 = vmatprep.mubr.msk.f32.mxu0 %vm272_vm0, %v3095_v29  ;;  %10849 = vmatpush3.bf16.msra.mxu0 %v10846_v27 }
 0x278   : > { %10031 = vmatmul.mubr.msk.f32.gmra.mrb[8].mxu0 %vm272_vm0, %v3096_v31 }
 0x279   : > { %10033 = vmatprep.mubr.msk.f32.mxu0 %vm272_vm0, %v3097_v32 }
 0x27c   : > { %10034 = vmatmul.mubr.msk.f32.gmra.mrb[10].mxu0 %vm272_vm0, %v3098_v33 }
 0x27d   : > { %10036 = vmatprep.mubr.msk.f32.mxu0 %vm272_vm0, %v3099_v38 }
 0x280   : > { %10037 = vmatmul.mubr.msk.f32.gmra.mrb[12].mxu0 %vm272_vm0, %v3100_v41 }
 0x281   : > { %10039 = vmatprep.mubr.msk.f32.mxu0 %vm272_vm0, %v3101_v43 }
 0x284   : > { %10040 = vmatmul.mubr.msk.f32.gmra.mrb[14].mxu0 %vm272_vm0, %v3102_v36 }
 0x285   : > { %10042 = vmatprep.mubr.msk.f32.mxu0 %vm272_vm0, %v3103_v34 }
 0x288   : > { %10043 = vmatmul.mubr.msk.f32.gmra.mrb[16].mxu0 %vm272_vm0, %v3104_v21 }
 0x289   : > { %10045 = vmatprep.mubr.msk.f32.mxu0 %vm272_vm0, %v3105_v44 }
 0x28c   : > { %10046 = vmatmul.mubr.msk.f32.gmra.mrb[18].mxu0 %vm272_vm0, %v3106_v13 }
 0x28d   : > { %10048 = vmatprep.mubr.msk.f32.mxu0 %vm272_vm0, %v3107_v16 }
 0x290   : > { %10049 = vmatmul.mubr.msk.f32.gmra.mrb[20].mxu0 %vm272_vm0, %v3108_v19 }
 0x291   : > { %10051 = vmatprep.mubr.msk.f32.mxu0 %vm272_vm0, %v3109_v18 }
 0x294   : > { %10052 = vmatmul.mubr.msk.f32.gmra.mrb[22].mxu0 %vm272_vm0, %v3110_v24 }
 0x295   : > { %10054 = vmatprep.mubr.msk.f32.mxu0 %vm272_vm0, %v3111_v35 }
 0x298   : > { %10055 = vmatmul.mubr.msk.f32.gmra.mrb[24].mxu0 %vm272_vm0, %v3112_v14 }
 0x299   : > { %10057 = vmatprep.mubr.msk.f32.mxu0 %vm272_vm0, %v3113_v30 }
 0x29c   : > { %10058 = vmatmul.mubr.msk.f32.gmra.mrb[26].mxu0 %vm272_vm0, %v3114_v39 }
 0x29d   : > { %10060 = vmatprep.mubr.msk.f32.mxu0 %vm272_vm0, %v13004_v6  ;;  %v14706_v6 = vld [vmem:[#allocation46_spill] sm:$0xff] }
 0x2a0   : > { %10061 = vmatmul.mubr.msk.f32.gmra.mrb[28].mxu0 %vm272_vm0, %v13010_v8  ;;  %v14707_v8 = vld [vmem:[#allocation47_spill] sm:$0xff] }
 0x2a1   : > { %10063 = vmatprep.mubr.msk.f32.mxu0 %vm272_vm0, %v3117_v40 }
 0x2a4   : > { %10064 = vmatmul.mubr.msk.f32.gmra.mrb[30].mxu0 %vm272_vm0, %v3118_v45 }
 0x2a5   : > { %10082 = vmatprep.mubr.msk.f32.mxu0 %vm272_vm0, %v14678_v15  ;;  %v14708_v15 = vld [vmem:[#allocation48_spill] sm:$0xff] }
 0x2a8   : > { %10083 = vmatmul.mubr.msk.f32.vlgmr.msra.gmra.mrb[0].mxu0 %vm272_vm0, %v12770_v25  ;;  %v14704_v25 = vld [vmem:[#allocation44_spill] sm:$0xff] }
 0x2a9   : > { %10085 = vmatprep.mubr.msk.f32.mxu0 %vm272_vm0, %v12772_v47  ;;  %v14705_v47 = vld [vmem:[#allocation45_spill] sm:$0xff] }
 0x2ac   : > { %10086 = vmatmul.mubr.msk.f32.gmra.mrb[2].mxu0 %vm272_vm0, %v14679_v20  ;;  %v14709_v20 = vld [vmem:[#allocation49_spill] sm:$0xff] }
 0x2ad   : > { %10088 = vmatprep.mubr.msk.f32.mxu0 %vm272_vm0, %v14680_v17  ;;  %v14710_v17 = vld [vmem:[#allocation14_spill] sm:$0xff] }
 0x2b0   : > { %10089 = vmatmul.mubr.msk.f32.gmra.mrb[4].mxu0 %vm272_vm0, %v14681_v42  ;;  %v3511_v42 = vld [vmem:[#allocation2 + $0x19a] sm:$0xff] }
 0x2b1   : > { %10091 = vmatprep.mubr.msk.f32.mxu0 %vm272_vm0, %v14682_v22  ;;  %v3512_v22 = vld [vmem:[#allocation2 + $0x1a2] sm:$0xff] }
 0x2b4   : > { %10092 = vmatmul.mubr.msk.f32.gmra.mrb[6].mxu0 %vm272_vm0, %v14683_v23  ;;  %v4298_v23 = vld [vmem:[#allocation9 + $0x40] sm:$0xff] }
 0x2b5   : > { %10094 = vmatprep.mubr.msk.f32.mxu0 %vm272_vm0, %v14684_v48  ;;  %v4299_v48 = vld [vmem:[#allocation9 + $0x48] sm:$0xff] }
 0x2b8   : > { %10095 = vmatmul.mubr.msk.f32.gmra.mrb[8].mxu0 %vm272_vm0, %v14685_v49  ;;  %v10850_v49 = vpack.c.bf16 %v4299_v48, %v4298_v23 }
 0x2b9   : > { %10097 = vmatprep.mubr.msk.f32.mxu0 %vm272_vm0, %v14686_v59  ;;  %v4300_v59 = vld [vmem:[#allocation9 + $0x50] sm:$0xff] }
 0x2ba   : > { %10851 = vmatprep.subr.bf16.mxu1 %v10850_v49 }
 0x2bb   : > { %10853 = vmatpush3.bf16.msra.mxu1 %v10850_v49 }
 0x2bc   : > { %10098 = vmatmul.mubr.msk.f32.gmra.mrb[10].mxu0 %vm272_vm0, %v14687_v60  ;;  %v4301_v60 = vld [vmem:[#allocation9 + $0x58] sm:$0xff] }
 0x2bd   : > { %10100 = vmatprep.mubr.msk.f32.mxu0 %vm272_vm0, %v14688_v0  ;;  %v10854_v0 = vpack.c.bf16 %v4301_v60, %v4300_v59 }
 0x2bf   : > { %10855 = vmatprep.subr.bf16.mxu1 %v10854_v0 }
 0x2c0   : > { %10101 = vmatmul.mubr.msk.f32.gmra.mrb[12].mxu0 %vm272_vm0, %v14689_v1  ;;  %10857 = vmatpush3.bf16.msra.mxu1 %v10854_v0  ;;  %v4302_v1 = vld [vmem:[#allocation9 + $0x60] sm:$0xff] }
 0x2c1   : > { %10103 = vmatprep.mubr.msk.f32.mxu0 %vm272_vm0, %v14690_v3  ;;  %v4303_v3 = vld [vmem:[#allocation9 + $0x68] sm:$0xff] }
 0x2c4   : > { %10104 = vmatmul.mubr.msk.f32.gmra.mrb[14].mxu0 %vm272_vm0, %v14691_v4  ;;  %v10858_v4 = vpack.c.bf16 %v4303_v3, %v4302_v1 }
 0x2c5   : > { %10106 = vmatprep.mubr.msk.f32.mxu0 %vm272_vm0, %v14692_v5  ;;  %v4304_v5 = vld [vmem:[#allocation9 + $0x70] sm:$0xff] }
 0x2c6   : > { %10859 = vmatprep.subr.bf16.mxu1 %v10858_v4 }
 0x2c7   : > { %10861 = vmatpush3.bf16.msra.mxu1 %v10858_v4 }
 0x2c8   : > { %10107 = vmatmul.mubr.msk.f32.gmra.mrb[16].mxu0 %vm272_vm0, %v14693_v7  ;;  %v4305_v7 = vld [vmem:[#allocation9 + $0x78] sm:$0xff] }
 0x2c9   : > { %10109 = vmatprep.mubr.msk.f32.mxu0 %vm272_vm0, %v14694_v9  ;;  %v10862_v9 = vpack.c.bf16 %v4305_v7, %v4304_v5 }
 0x2cb   : > { %10863 = vmatprep.subr.bf16.mxu1 %v10862_v9 }
 0x2cc   : > { %10110 = vmatmul.mubr.msk.f32.gmra.mrb[18].mxu0 %vm272_vm0, %v14695_v10  ;;  %10865 = vmatpush3.bf16.msra.mxu1 %v10862_v9  ;;  %v4265_v10 = vld [vmem:[#allocation3 + $0x1] sm:$0xff] }
 0x2cd   : > { %10112 = vmatprep.mubr.msk.f32.mxu0 %vm272_vm0, %v14696_v11  ;;  %10146 = vmatprep.mubr.msk.f32.mxu1 %vm272_vm0, %v4265_v10  ;;  %v4266_v11 = vld [vmem:[#allocation3 + $0x9] sm:$0xff] }
 0x2cf   : > { %10147 = vmatmul.mubr.msk.f32.vlgmr.msra.gmra.mrb[0].mxu1 %vm272_vm0, %v4266_v11 }
 0x2d0   : > { %10113 = vmatmul.mubr.msk.f32.gmra.mrb[20].mxu0 %vm272_vm0, %v14697_v12  ;;  %v4257_v12 = vld [vmem:[#allocation9] sm:$0xff] }
 0x2d1   : > { %10115 = vmatprep.mubr.msk.f32.mxu0 %vm272_vm0, %v14704_v25 }
 0x2d4   : > { %10116 = vmatmul.mubr.msk.f32.gmra.mrb[22].mxu0 %vm272_vm0, %v14705_v47 }
 0x2d5   : > { %10118 = vmatprep.mubr.msk.f32.mxu0 %vm272_vm0, %v14706_v6 }
 0x2d8   : > { %10119 = vmatmul.mubr.msk.f32.gmra.mrb[24].mxu0 %vm272_vm0, %v14707_v8 }
 0x2d9   : > { %10121 = vmatprep.mubr.msk.f32.mxu0 %vm272_vm0, %v14708_v15 }
 0x2dc   : > { %10122 = vmatmul.mubr.msk.f32.gmra.mrb[26].mxu0 %vm272_vm0, %v14709_v20 }
 0x2dd   : > { %10124 = vmatprep.mubr.msk.f32.mxu0 %vm272_vm0, %v14710_v17 }
 0x2e0   : > { %10125 = vmatmul.mubr.msk.f32.gmra.mrb[28].mxu0 %vm272_vm0, %v13078_v37  ;;  %v4258_v37 = vld [vmem:[#allocation9 + $0x8] sm:$0xff] }
 0x2e1   : > { %10127 = vmatprep.mubr.msk.f32.mxu0 %vm272_vm0, %v3511_v42  ;;  %v10866_v46 = vpack.c.bf16 %v4258_v37, %v4257_v12 }
 0x2e3   : > { %10867 = vmatprep.subr.bf16.mxu1 %v10866_v46 }
 0x2e4   : > { %10128 = vmatmul.mubr.msk.f32.gmra.mrb[30].mxu0 %vm272_vm0, %v3512_v22  ;;  %10869 = vmatpush3.bf16.msra.mxu1 %v10866_v46 }
 0x2e5   : > { %10871 = vmatprep.subr.bf16.mxu1 %v10870_v52 }
 0x2e8   : > { %10873 = vmatpush3.bf16.msra.mxu1 %v10870_v52 }
 0x2e9   : > { %10875 = vmatprep.subr.bf16.mxu1 %v10874_v55 }
 0x2ec   : > { %10877 = vmatpush3.bf16.msra.mxu1 %v10874_v55 }
 0x2ed   : > { %10879 = vmatprep.subr.bf16.mxu1 %v10878_v58 }
 0x2f0   : > { %10881 = vmatpush3.bf16.msra.mxu1 %v10878_v58 }
 0x2f1   : > { %10883 = vmatprep.subr.bf16.mxu1 %v13242_v63 }
 0x37b   : > { %v10084_v26 = vpop.f32.mrb[0].mxu0 }
 0x37c   : > { %v13251_v27 = vadd.f32 %v10084_v26, %v13248_v2  ;;  %v3684_v28 = vpop.f32.mrb[1].mxu0 }
 0x37d   : > { %v13254_v29 = vadd.f32 %v13248_v2, %v3684_v28 }
 0x37e   : > { %v8475_v31 = vmul.f32 -1.442695, %v13251_v27 }
 0x37f   : > { %v8474_v32 = vmul.f32 -1.442695, %v13254_v29  ;;  %v10087_v33 = vpop.f32.mrb[2].mxu0 }
 0x380   : > { %11578 = vpow2.f32 %v8475_v31  ;;  %v13259_v38 = vadd.f32 %v10087_v33, %v13248_v2  ;;  %v3694_v41 = vpop.f32.mrb[3].mxu0 }
 0x381   : > { %11580 = vpow2.f32 %v8474_v32  ;;  %v13262_v43 = vadd.f32 %v13248_v2, %v3694_v41 }
 0x382   : > { %v8477_v36 = vmul.f32 -1.442695, %v13259_v38 }
 0x383   : > { %v8476_v34 = vmul.f32 -1.442695, %v13262_v43  ;;  %v10090_v21 = vpop.f32.mrb[4].mxu0 }
 0x384   : > { %11582 = vpow2.f32 %v8477_v36  ;;  %v13267_v44 = vadd.f32 %v10090_v21, %v13248_v2  ;;  %v3704_v13 = vpop.f32.mrb[5].mxu0 }
 0x385   : > { %11584 = vpow2.f32 %v8476_v34  ;;  %v13270_v16 = vadd.f32 %v13248_v2, %v3704_v13 }
 0x386   : > { %v8479_v19 = vmul.f32 -1.442695, %v13267_v44 }
 0x387   : > { %v8478_v18 = vmul.f32 -1.442695, %v13270_v16  ;;  %v10093_v24 = vpop.f32.mrb[6].mxu0 }
 0x388   : > { %11586 = vpow2.f32 %v8479_v19  ;;  %v13275_v35 = vadd.f32 %v10093_v24, %v13248_v2  ;;  %v3714_v14 = vpop.f32.mrb[7].mxu0 }
 0x389   : > { %11588 = vpow2.f32 %v8478_v18  ;;  %v13278_v30 = vadd.f32 %v13248_v2, %v3714_v14 }
 0x38a   : > { %v11579_v39 = vpop.eup %11578  ;;  %v8481_v40 = vmul.f32 -1.442695, %v13275_v35 }
 0x38b   : > { %v11581_v45 = vpop.eup %11580  ;;  %v4011_v25 = vadd.f32 1.0, %v11579_v39  ;;  %v8480_v47 = vmul.f32 -1.442695, %v13278_v30  ;;  %v10096_v6 = vpop.f32.mrb[8].mxu0 }
 0x38c   : > { %v4010_v8 = vadd.f32 1.0, %v11581_v45  ;;  %11590 = vpow2.f32 %v8481_v40  ;;  %v13283_v15 = vadd.f32 %v10096_v6, %v13248_v2  ;;  %v3724_v20 = vpop.f32.mrb[9].mxu0 }
 0x38d   : > { %11592 = vrcp.f32 %v4011_v25  ;;  %v13286_v17 = vadd.f32 %v13248_v2, %v3724_v20 }
 0x38e   : > { %v11583_v42 = vpop.eup %11582  ;;  %11594 = vrcp.f32 %v4010_v8  ;;  %v8483_v22 = vmul.f32 -1.442695, %v13283_v15 }
 0x38f   : > { %v11585_v23 = vpop.eup %11584  ;;  %v4013_v48 = vadd.f32 1.0, %v11583_v42  ;;  %11596 = vpow2.f32 %v8480_v47  ;;  %v8482_v49 = vmul.f32 -1.442695, %v13286_v17  ;;  %v10099_v59 = vpop.f32.mrb[10].mxu0 }
 0x390   : > { %v4012_v60 = vadd.f32 1.0, %v11585_v23  ;;  %11598 = vpow2.f32 %v8483_v22  ;;  %v13291_v0 = vadd.f32 %v10099_v59, %v13248_v2  ;;  %v3734_v1 = vpop.f32.mrb[11].mxu0 }
 0x391   : > { %11600 = vrcp.f32 %v4013_v48  ;;  %v13294_v3 = vadd.f32 %v13248_v2, %v3734_v1 }
 0x392   : > { %v11587_v4 = vpop.eup %11586  ;;  %11602 = vrcp.f32 %v4012_v60  ;;  %v8485_v5 = vmul.f32 -1.442695, %v13291_v0 }
 0x393   : > { %v11589_v7 = vpop.eup %11588  ;;  %v4015_v9 = vadd.f32 1.0, %v11587_v4  ;;  %11604 = vpow2.f32 %v8482_v49  ;;  %v8484_v10 = vmul.f32 -1.442695, %v13294_v3  ;;  %v10102_v11 = vpop.f32.mrb[12].mxu0 }
 0x394   : > { %v4014_v12 = vadd.f32 1.0, %v11589_v7  ;;  %11606 = vpow2.f32 %v8485_v5  ;;  %v13299_v37 = vadd.f32 %v10102_v11, %v13248_v2  ;;  %v3744_v46 = vpop.f32.mrb[13].mxu0 }
 0x395   : > { %11608 = vrcp.f32 %v4015_v9  ;;  %v13302_v50 = vadd.f32 %v13248_v2, %v3744_v46 }
 0x396   : > { %v11591_v51 = vpop.eup %11590  ;;  %11610 = vrcp.f32 %v4014_v12  ;;  %v8487_v52 = vmul.f32 -1.442695, %v13299_v37 }
 0x397   : > { %v11593_v53 = vpop.eup %11592  ;;  %v4017_v54 = vadd.f32 1.0, %v11591_v51  ;;  %11612 = vpow2.f32 %v8484_v10  ;;  %v8486_v55 = vmul.f32 -1.442695, %v13302_v50  ;;  %v10105_v56 = vpop.f32.mrb[14].mxu0 }
 0x398   : > { %v11595_v57 = vpop.eup %11594  ;;  %v4107_v58 = vmul.f32 %v11593_v53, %v13251_v27  ;;  %11614 = vpow2.f32 %v8487_v52  ;;  %v13308_v61 = vadd.f32 %v10105_v56, %v13248_v2  ;;  %v3754_v62 = vpop.f32.mrb[15].mxu0 }
 0x399   : > { %v11597_v26 = vpop.eup %11596  ;;  %v4106_v28 = vmul.f32 %v11595_v57, %v13254_v29  ;;  %11616 = vrcp.f32 %v4017_v54  ;;  %v13312_v31 = vadd.f32 %v13248_v2, %v3754_v62 }
 0x39a   : > { %v11599_v32 = vpop.eup %11598  ;;  %4194 = vst.msk [vmem:[#allocation3 + $0x21] sm:$0xff] %vm272_vm0, %v4107_v58  ;;  %v4016_v33 = vadd.f32 1.0, %v11597_v26  ;;  %11618 = vpow2.f32 %v8486_v55  ;;  %v8489_v41 = vmul.f32 -1.442695, %v13308_v61 }
 0x39b   : > { %v11601_v27 = vpop.eup %11600  ;;  %4193 = vst.msk [vmem:[#allocation3 + $0x19] sm:$0xff] %vm272_vm0, %v4106_v28  ;;  %v4019_v36 = vadd.f32 1.0, %v11599_v32  ;;  %v8488_v34 = vmul.f32 -1.442695, %v13312_v31  ;;  %v10108_v21 = vpop.f32.mrb[16].mxu0 }
 0x39c   : > { %v11603_v13 = vpop.eup %11602  ;;  %v4109_v29 = vmul.f32 %v11601_v27, %v13259_v38  ;;  %11620 = vrcp.f32 %v4016_v33  ;;  %v13320_v19 = vadd.f32 %v10108_v21, %v13248_v2  ;;  %v3764_v18 = vpop.f32.mrb[17].mxu0 }
 0x39d   : > { %v11605_v24 = vpop.eup %11604  ;;  %v4108_v14 = vmul.f32 %v11603_v13, %v13262_v43  ;;  %11622 = vrcp.f32 %v4019_v36  ;;  %v13324_v39 = vadd.f32 %v13248_v2, %v3764_v18 }
 0x39e   : > { %v11607_v40 = vpop.eup %11606  ;;  %4196 = vst.msk [vmem:[#allocation3 + $0x39] sm:$0xff] %vm272_vm0, %v4109_v29  ;;  %v4018_v45 = vadd.f32 1.0, %v11605_v24  ;;  %11624 = vpow2.f32 %v8489_v41  ;;  %v8491_v25 = vmul.f32 -1.442695, %v13320_v19 }
 0x39f   : > { %v11609_v38 = vpop.eup %11608  ;;  %4195 = vst.msk [vmem:[#allocation3 + $0x31] sm:$0xff] %vm272_vm0, %v4108_v14  ;;  %v4021_v47 = vadd.f32 1.0, %v11607_v40  ;;  %11626 = vpow2.f32 %v8488_v34  ;;  %v8490_v6 = vmul.f32 -1.442695, %v13324_v39  ;;  %v10111_v8 = vpop.f32.mrb[18].mxu0 }
 0x3a0   : > { %v11611_v43 = vpop.eup %11610  ;;  %v4111_v20 = vmul.f32 %v11609_v38, %v13267_v44  ;;  %11628 = vrcp.f32 %v4018_v45  ;;  %v13332_v42 = vadd.f32 %v10111_v8, %v13248_v2  ;;  %v3774_v22 = vpop.f32.mrb[19].mxu0 }
 0x3a1   : > { %v11613_v23 = vpop.eup %11612  ;;  %v4110_v48 = vmul.f32 %v11611_v43, %v13270_v16  ;;  %11630 = vrcp.f32 %v4021_v47  ;;  %v13336_v49 = vadd.f32 %v13248_v2, %v3774_v22  ;;  %v13345_v16 = vld [vmem:[#allocation3 + $0x21] sm:$0xff] }
 0x3a2   : > { %v11615_v59 = vpop.eup %11614  ;;  %4198 = vst.msk [vmem:[#allocation3 + $0x51] sm:$0xff] %vm272_vm0, %v4111_v20  ;;  %v4020_v60 = vadd.f32 1.0, %v11613_v23  ;;  %11632 = vpow2.f32 %v8491_v25  ;;  %v8493_v1 = vmul.f32 -1.442695, %v13332_v42  ;;  %v13340_v44 = vld [vmem:[#allocation3 + $0x19] sm:$0xff] }
 0x3a3   : > { %v11617_v4 = vpop.eup %11616  ;;  %4197 = vst.msk [vmem:[#allocation3 + $0x49] sm:$0xff] %vm272_vm0, %v4110_v48  ;;  %v4023_v5 = vadd.f32 1.0, %v11615_v59  ;;  %11634 = vpow2.f32 %v8490_v6  ;;  %v10114_v7 = vpop.f32.mrb[20].mxu0  ;;  %10149 = vmatprep.mubr.msk.f32.mxu1 %vm272_vm0, %v13340_v44  ;;  %v8492_v11 = vmul.f32 -1.442695, %v13336_v49 }
 0x3a4   : > { %v11619_v9 = vpop.eup %11618  ;;  %v4113_v10 = vmul.f32 %v11617_v4, %v13275_v35  ;;  %11636 = vrcp.f32 %v4020_v60  ;;  %v13350_v12 = vadd.f32 %v10114_v7, %v13248_v2  ;;  %v3784_v46 = vpop.f32.mrb[21].mxu0  ;;  %10150 = vmatmul.mubr.msk.f32.gmra.mrb[2].mxu1 %vm272_vm0, %v13345_v16 }
 0x3a5   : > { %11638 = vrcp.f32 %v4023_v5  ;;  %v4022_v51 = vadd.f32 1.0, %v11619_v9  ;;  %v13355_v52 = vadd.f32 %v13248_v2, %v3784_v46  ;;  %v13365_v62 = vld [vmem:[#allocation3 + $0x39] sm:$0xff] }
 0x3a6   : > { %v11621_v53 = vpop.eup %11620  ;;  %4200 = vst.msk [vmem:[#allocation3 + $0x69] sm:$0xff] %vm272_vm0, %v4113_v10  ;;  %11640 = vpow2.f32 %v8493_v1  ;;  %v8495_v35 = vmul.f32 -1.442695, %v13350_v12  ;;  %v13359_v54 = vld [vmem:[#allocation3 + $0x31] sm:$0xff] }
 0x3a7   : > { %v11623_v55 = vpop.eup %11622  ;;  %v4112_v56 = vmul.f32 %v11621_v53, %v13278_v30  ;;  %11642 = vrcp.f32 %v4022_v51  ;;  %v8494_v57 = vmul.f32 -1.442695, %v13355_v52  ;;  %v10117_v58 = vpop.f32.mrb[22].mxu0  ;;  %10152 = vmatprep.mubr.msk.f32.mxu1 %vm272_vm0, %v13359_v54 }
 0x3a8   : > { %v11625_v26 = vpop.eup %11624  ;;  %v4115_v28 = vmul.f32 %v11623_v55, %v13283_v15  ;;  %11644 = vpow2.f32 %v8492_v11  ;;  %v13369_v32 = vadd.f32 %v10117_v58, %v13248_v2  ;;  %v3794_v33 = vpop.f32.mrb[23].mxu0  ;;  %10153 = vmatmul.mubr.msk.f32.gmra.mrb[4].mxu1 %vm272_vm0, %v13365_v62 }
 0x3a9   : > { %v11627_v30 = vpop.eup %11626  ;;  %4199 = vst.msk [vmem:[#allocation3 + $0x61] sm:$0xff] %vm272_vm0, %v4112_v56  ;;  %v4025_v41 = vadd.f32 1.0, %v11625_v26  ;;  %11646 = vpow2.f32 %v8495_v35  ;;  %v13375_v27 = vadd.f32 %v13248_v2, %v3794_v33  ;;  %v13385_v14 = vld [vmem:[#allocation3 + $0x51] sm:$0xff] }
 0x3aa   : > { %v11629_v36 = vpop.eup %11628  ;;  %4202 = vst.msk [vmem:[#allocation3 + $0x81] sm:$0xff] %vm272_vm0, %v4115_v28  ;;  %v4024_v15 = vadd.f32 1.0, %v11627_v30  ;;  %11648 = vpow2.f32 %v8494_v57  ;;  %v8497_v34 = vmul.f32 -1.442695, %v13369_v32  ;;  %v13379_v21 = vld [vmem:[#allocation3 + $0x49] sm:$0xff] }
 0x3ab   : > { %v11631_v13 = vpop.eup %11630  ;;  %v4114_v29 = vmul.f32 %v11629_v36, %v13286_v17  ;;  %11650 = vrcp.f32 %v4025_v41  ;;  %v8496_v18 = vmul.f32 -1.442695, %v13375_v27  ;;  %v10120_v24 = vpop.f32.mrb[24].mxu0  ;;  %10155 = vmatprep.mubr.msk.f32.mxu1 %vm272_vm0, %v13379_v21 }
 0x3ac   : > { %v11633_v40 = vpop.eup %11632  ;;  %v4117_v45 = vmul.f32 %v11631_v13, %v13291_v0  ;;  %11652 = vrcp.f32 %v4024_v15  ;;  %v13389_v25 = vadd.f32 %v10120_v24, %v13248_v2  ;;  %v3804_v38 = vpop.f32.mrb[25].mxu0  ;;  %10156 = vmatmul.mubr.msk.f32.gmra.mrb[6].mxu1 %vm272_vm0, %v13385_v14 }
 0x3ad   : > { %v11635_v17 = vpop.eup %11634  ;;  %4201 = vst.msk [vmem:[#allocation3 + $0x79] sm:$0xff] %vm272_vm0, %v4114_v29  ;;  %v4027_v47 = vadd.f32 1.0, %v11633_v40  ;;  %11654 = vpow2.f32 %v8497_v34  ;;  %v13395_v6 = vadd.f32 %v13248_v2, %v3804_v38  ;;  %v13413_v10 = vld [vmem:[#allocation3 + $0x69] sm:$0xff] }
 0x3ae   : > { %v11637_v8 = vpop.eup %11636  ;;  %4204 = vst.msk [vmem:[#allocation3 + $0x99] sm:$0xff] %vm272_vm0, %v4117_v45  ;;  %v4026_v0 = vadd.f32 1.0, %v11635_v17  ;;  %11656 = vpow2.f32 %v8496_v18  ;;  %v8499_v43 = vmul.f32 -1.442695, %v13389_v25 }
 0x3af   : > { %v11639_v20 = vpop.eup %11638  ;;  %v4116_v22 = vmul.f32 %v11637_v8, %v13294_v3  ;;  %11658 = vrcp.f32 %v4027_v47  ;;  %v8498_v23 = vmul.f32 -1.442695, %v13395_v6  ;;  %v10123_v48 = vpop.f32.mrb[26].mxu0 }
 0x3b0   : > { %v11641_v59 = vpop.eup %11640  ;;  %v4119_v60 = vmul.f32 %v11639_v20, %v13299_v37  ;;  %11660 = vrcp.f32 %v4026_v0  ;;  %v13403_v1 = vadd.f32 %v10123_v48, %v13248_v2  ;;  %v13405_v4 = vld [vmem:[#allocation3 + $0x61] sm:$0xff]  ;;  %v3814_v5 = vpop.f32.mrb[27].mxu0 }
 0x3b1   : > { %v11643_v7 = vpop.eup %11642  ;;  %4203 = vst.msk [vmem:[#allocation3 + $0x91] sm:$0xff] %vm272_vm0, %v4116_v22  ;;  %v4029_v9 = vadd.f32 1.0, %v11641_v59  ;;  %11662 = vpow2.f32 %v8499_v43  ;;  %10158 = vmatprep.mubr.msk.f32.mxu1 %vm272_vm0, %v13405_v4  ;;  %v13411_v3 = vadd.f32 %v13248_v2, %v3814_v5  ;;  %v13432_v41 = vld [vmem:[#allocation3 + $0x81] sm:$0xff] }
 0x3b2   : > { %v11645_v37 = vpop.eup %11644  ;;  %4206 = vst.msk [vmem:[#allocation3 + $0xb1] sm:$0xff] %vm272_vm0, %v4119_v60  ;;  %v4118_v11 = vmul.f32 %v11643_v7, %v13302_v50  ;;  %11664 = vpow2.f32 %v8498_v23  ;;  %v8501_v46 = vmul.f32 -1.442695, %v13403_v1  ;;  %10159 = vmatmul.mubr.msk.f32.gmra.mrb[8].mxu1 %vm272_vm0, %v13413_v10 }
 0x3b3   : > { %v11647_v51 = vpop.eup %11646  ;;  %11666 = vrcp.f32 %v4029_v9  ;;  %v4028_v53 = vadd.f32 1.0, %v11645_v37  ;;  %v10126_v35 = vpop.f32.mrb[28].mxu0  ;;  %v8500_v57 = vmul.f32 -1.442695, %v13411_v3 }
 0x3b4   : > { %v11649_v55 = vpop.eup %11648  ;;  %4205 = vst.msk [vmem:[#allocation3 + $0xa9] sm:$0xff] %vm272_vm0, %v4118_v11  ;;  %v4031_v56 = vadd.f32 1.0, %v11647_v51  ;;  %11668 = vpow2.f32 %v8501_v46  ;;  %v13423_v58 = vadd.f32 %v10126_v35, %v13248_v2  ;;  %v13425_v50 = vld [vmem:[#allocation3 + $0x79] sm:$0xff]  ;;  %v3824_v26 = vpop.f32.mrb[29].mxu0 }
 0x3b5   : > { %v11651_v28 = vpop.eup %11650  ;;  %11670 = vrcp.f32 %v4028_v53  ;;  %v4030_v33 = vadd.f32 1.0, %v11649_v55  ;;  %10161 = vmatprep.mubr.msk.f32.mxu1 %vm272_vm0, %v13425_v50  ;;  %v13430_v30 = vadd.f32 %v13248_v2, %v3824_v26  ;;  %v13452_v0 = vld [vmem:[#allocation3 + $0x99] sm:$0xff] }
 0x3b6   : > { %v11653_v36 = vpop.eup %11652  ;;  %v4121_v15 = vmul.f32 %v11651_v28, %v13308_v61  ;;  %11672 = vrcp.f32 %v4031_v56  ;;  %v8503_v34 = vmul.f32 -1.442695, %v13423_v58  ;;  %10162 = vmatmul.mubr.msk.f32.gmra.mrb[10].mxu1 %vm272_vm0, %v13432_v41 }
 0x3b7   : > { %v11655_v13 = vpop.eup %11654  ;;  %v4120_v29 = vmul.f32 %v11653_v36, %v13312_v31  ;;  %11674 = vrcp.f32 %v4030_v33  ;;  %v10129_v18 = vpop.f32.mrb[30].mxu0  ;;  %v8502_v45 = vmul.f32 -1.442695, %v13430_v30 }
 0x3b8   : > { %v11657_v24 = vpop.eup %11656  ;;  %4208 = vst.msk [vmem:[#allocation3 + $0xc9] sm:$0xff] %vm272_vm0, %v4121_v15  ;;  %v4033_v40 = vadd.f32 1.0, %v11655_v13  ;;  %11676 = vpow2.f32 %v8500_v57  ;;  %v13442_v61 = vadd.f32 %v10129_v18, %v13248_v2  ;;  %v13444_v38 = vld [vmem:[#allocation3 + $0x91] sm:$0xff]  ;;  %v3834_v17 = vpop.f32.mrb[31].mxu0 }
 0x3b9   : > { %v11659_v47 = vpop.eup %11658  ;;  %4207 = vst.msk [vmem:[#allocation3 + $0xc1] sm:$0xff] %vm272_vm0, %v4120_v29  ;;  %v4032_v8 = vadd.f32 1.0, %v11657_v24  ;;  %11678 = vpow2.f32 %v8503_v34  ;;  %10164 = vmatprep.mubr.msk.f32.mxu1 %vm272_vm0, %v13444_v38  ;;  %v13450_v31 = vadd.f32 %v13248_v2, %v3834_v17  ;;  %v13466_v9 = vld [vmem:[#allocation3 + $0xb1] sm:$0xff] }
 0x3ba   : > { %v11661_v43 = vpop.eup %11660  ;;  %v4123_v20 = vmul.f32 %v11659_v47, %v13320_v19  ;;  %11680 = vrcp.f32 %v4033_v40  ;;  %v8505_v22 = vmul.f32 -1.442695, %v13442_v61  ;;  %10165 = vmatmul.mubr.msk.f32.gmra.mrb[12].mxu1 %vm272_vm0, %v13452_v0 }
 0x3bb   : > { %v11663_v23 = vpop.eup %11662  ;;  %v4122_v48 = vmul.f32 %v11661_v43, %v13324_v39  ;;  %11682 = vrcp.f32 %v4032_v8  ;;  %v13459_v59 = vld [vmem:[#allocation3 + $0xa9] sm:$0xff]  ;;  %v8504_v5 = vmul.f32 -1.442695, %v13450_v31 }
 0x3bc   : > { %v11665_v60 = vpop.eup %11664  ;;  %4210 = vst.msk [vmem:[#allocation3 + $0xe1] sm:$0xff] %vm272_vm0, %v4123_v20  ;;  %v4035_v2 = vadd.f32 1.0, %v11663_v23  ;;  %11684 = vpow2.f32 %v8502_v45  ;;  %10167 = vmatprep.mubr.msk.f32.mxu1 %vm272_vm0, %v13459_v59 }
 0x3bd   : > { %v11667_v19 = vpop.eup %11666  ;;  %4209 = vst.msk [vmem:[#allocation3 + $0xd9] sm:$0xff] %vm272_vm0, %v4122_v48  ;;  %v4034_v7 = vadd.f32 1.0, %v11665_v60  ;;  %11686 = vpow2.f32 %v8505_v22 }
 0x3be   : > { %v11669_v39 = vpop.eup %11668  ;;  %v4125_v37 = vmul.f32 %v11667_v19, %v13332_v42  ;;  %11688 = vrcp.f32 %v4035_v2  ;;  %10168 = vmatmul.mubr.msk.f32.gmra.mrb[14].mxu1 %vm272_vm0, %v13466_v9 }
 0x3bf   : > { %v11671_v11 = vpop.eup %11670  ;;  %11690 = vrcp.f32 %v4034_v7  ;;  %v4037_v46 = vadd.f32 1.0, %v11669_v39  ;;  %v13478_v42 = vld [vmem:[#allocation3 + $0xc9] sm:$0xff] }
 0x3c0   : > { %v11673_v51 = vpop.eup %11672  ;;  %4212 = vst.msk [vmem:[#allocation3 + $0xf9] sm:$0xff] %vm272_vm0, %v4125_v37  ;;  %v4124_v53 = vmul.f32 %v11671_v11, %v13336_v49  ;;  %11692 = vpow2.f32 %v8504_v5  ;;  %v13473_v35 = vld [vmem:[#allocation3 + $0xc1] sm:$0xff] }
 0x3c1   : > { %v11675_v55 = vpop.eup %11674  ;;  %v4127_v56 = vmul.f32 %v11673_v51, %v13350_v12  ;;  %11694 = vrcp.f32 %v4037_v46  ;;  %10170 = vmatprep.mubr.msk.f32.mxu1 %vm272_vm0, %v13473_v35 }
 0x3c2   : > { %v11677_v57 = vpop.eup %11676  ;;  %4211 = vst.msk [vmem:[#allocation3 + $0xf1] sm:$0xff] %vm272_vm0, %v4124_v53  ;;  %v4126_v26 = vmul.f32 %v11675_v55, %v13355_v52  ;;  %10171 = vmatmul.mubr.msk.f32.gmra.mrb[16].mxu1 %vm272_vm0, %v13478_v42  ;;  %v4225_v55 = vld [vmem:[#allocation3] sm:$0xff] }
 0x3c3   : > { %v11679_v49 = vpop.eup %11678  ;;  %4214 = vst.msk [vmem:[#allocation3 + $0x111] sm:$0xff] %vm272_vm0, %v4127_v56  ;;  %v4036_v28 = vadd.f32 1.0, %v11677_v57  ;;  %v13491_v52 = vld [vmem:[#allocation3 + $0xe1] sm:$0xff] }
 0x3c4   : > { %v11681_v33 = vpop.eup %11680  ;;  %4213 = vst.msk [vmem:[#allocation3 + $0x109] sm:$0xff] %vm272_vm0, %v4126_v26  ;;  %v4039_v12 = vadd.f32 1.0, %v11679_v49  ;;  %v13486_v36 = vld [vmem:[#allocation3 + $0xd9] sm:$0xff]  ;;  %v4984_v57 = vld [vmem:[#allocation9 + $0x98] sm:$0xff] }
 0x3c5   : > { %v11683_v15 = vpop.eup %11682  ;;  %v4129_v34 = vmul.f32 %v11681_v33, %v13369_v32  ;;  %11696 = vrcp.f32 %v4036_v28  ;;  %10173 = vmatprep.mubr.msk.f32.mxu1 %vm272_vm0, %v13486_v36  ;;  %v4226_v26 = vld [vmem:[#allocation3 + $0x8] sm:$0xff]  ;;  %v4985_v28 = vld [vmem:[#allocation9 + $0xa0] sm:$0xff]  ;;  %v4986_v33 = vld [vmem:[#allocation9 + $0xa8] sm:$0xff] }
 0x3c6   : > { %v11685_v13 = vpop.eup %11684  ;;  %v4128_v29 = vmul.f32 %v11683_v15, %v13375_v27  ;;  %11698 = vrcp.f32 %v4039_v12  ;;  %10174 = vmatmul.mubr.msk.f32.gmra.mrb[18].mxu1 %vm272_vm0, %v13491_v52  ;;  %v13564_v12 = vld [vmem:[#allocation3 + $0x18] sm:$0xff]  ;;  %v10890_v15 = vpack.c.bf16 %v4986_v33, %v4985_v28 }
 0x3c7   : > { %v11687_v18 = vpop.eup %11686  ;;  %4216 = vst.msk [vmem:[#allocation3 + $0x129] sm:$0xff] %vm272_vm0, %v4129_v34  ;;  %v4038_v24 = vadd.f32 1.0, %v11685_v13  ;;  %v13504_v43 = vld [vmem:[#allocation3 + $0xf9] sm:$0xff] }
 0x3c8   : > { %v11689_v40 = vpop.eup %11688  ;;  %4215 = vst.msk [vmem:[#allocation3 + $0x121] sm:$0xff] %vm272_vm0, %v4128_v29  ;;  %v4041_v32 = vadd.f32 1.0, %v11687_v18  ;;  %v13569_v34 = vld [vmem:[#allocation3 + $0x20] sm:$0xff]  ;;  %v4988_v29 = vld [vmem:[#allocation9 + $0xb8] sm:$0xff]  ;;  %v13573_v18 = vld [vmem:[#allocation3 + $0x30] sm:$0xff] }
 0x3c9   : > { %v11691_v45 = vpop.eup %11690  ;;  %v4131_v17 = vmul.f32 %v11689_v40, %v13389_v25  ;;  %11700 = vrcp.f32 %v4038_v24  ;;  %v13499_v47 = vld [vmem:[#allocation3 + $0xf1] sm:$0xff]  ;;  %v4987_v13 = vld [vmem:[#allocation9 + $0xb0] sm:$0xff] }
 0x3ca   : > { %v11693_v8 = vpop.eup %11692  ;;  %v4130_v27 = vmul.f32 %v11691_v45, %v13395_v6  ;;  %11702 = vrcp.f32 %v4041_v32  ;;  %10176 = vmatprep.mubr.msk.f32.mxu1 %vm272_vm0, %v13499_v47  ;;  %v13516_v6 = vld [vmem:[#allocation3 + $0x111] sm:$0xff]  ;;  %v10894_v24 = vpack.c.bf16 %v4988_v29, %v4987_v13  ;;  %v13581_v45 = vld [vmem:[#allocation3 + $0x48] sm:$0xff] }
 0x3cb   : > { %v11695_v20 = vpop.eup %11694  ;;  %4218 = vst.msk [vmem:[#allocation3 + $0x141] sm:$0xff] %vm272_vm0, %v4131_v17  ;;  %v4040_v22 = vadd.f32 1.0, %v11693_v8  ;;  %10177 = vmatmul.mubr.msk.f32.gmra.mrb[20].mxu1 %vm272_vm0, %v13504_v43  ;;  %v13509_v25 = vld [vmem:[#allocation3 + $0x109] sm:$0xff]  ;;  %14711 = vst [vmem:[#allocation15_spill] sm:$0xff] %v13516_v6  ;;  %v13577_v40 = vld [vmem:[#allocation3 + $0x38] sm:$0xff] }
 0x3cc   : > { %4217 = vst.msk [vmem:[#allocation3 + $0x139] sm:$0xff] %vm272_vm0, %v4130_v27  ;;  %v4133_v23 = vmul.f32 %v11695_v20, %v13403_v1  ;;  %10179 = vmatprep.mubr.msk.f32.mxu1 %vm272_vm0, %v13509_v25  ;;  %v5376_v32 = vld [vmem:[#allocation9 + $0xc8] sm:$0xff]  ;;  %v13587_v8 = vld [vmem:[#allocation3 + $0x50] sm:$0xff]  ;;  %v13591_v27 = vld [vmem:[#allocation3 + $0x60] sm:$0xff] }
 0x3cd   : > { %11704 = vrcp.f32 %v4040_v22  ;;  %v13596_v20 = vld [vmem:[#allocation3 + $0x68] sm:$0xff]  ;;  %v13600_v22 = vld [vmem:[#allocation3 + $0x78] sm:$0xff] }
 0x3ce   : > { %4220 = vst.msk [vmem:[#allocation3 + $0x159] sm:$0xff] %vm272_vm0, %v4133_v23  ;;  %v13527_v19 = vld [vmem:[#allocation3 + $0x129] sm:$0xff]  ;;  %v13604_v23 = vld [vmem:[#allocation3 + $0x80] sm:$0xff] }
 0x3cf   : > { %v11697_v48 = vpop.eup %11696  ;;  %10180 = vmatmul.mubr.msk.f32.gmra.mrb[22].mxu1 %vm272_vm0, %v13516_v6  ;;  %v13520_v60 = vld [vmem:[#allocation3 + $0x121] sm:$0xff]  ;;  %14713 = vst [vmem:[#allocation17_spill] sm:$0xff] %v13527_v19 }
 0x3d0   : > { %14712 = vst [vmem:[#allocation16_spill] sm:$0xff] %v13520_v60  ;;  %v11699_v2 = vpop.eup %11698  ;;  %v4132_v5 = vmul.f32 %v11697_v48, %v13411_v3  ;;  %10182 = vmatprep.mubr.msk.f32.mxu1 %vm272_vm0, %v13520_v60  ;;  %v13608_v48 = vld [vmem:[#allocation3 + $0x90] sm:$0xff]  ;;  %v4948_v29 = vld [vmem:[#allocation3 + $0x2] sm:$0xff] }
 0x3d1   : > { %v4135_v1 = vmul.f32 %v11699_v2, %v13423_v58  ;;  %v13612_v2 = vld [vmem:[#allocation3 + $0x98] sm:$0xff]  ;;  %v5381_v60 = vld [vmem:[#allocation9 + $0xf0] sm:$0xff]  ;;  %v5382_v6 = vld [vmem:[#allocation9 + $0xf8] sm:$0xff] }
 0x3d2   : > { %4219 = vst.msk [vmem:[#allocation3 + $0x151] sm:$0xff] %vm272_vm0, %v4132_v5  ;;  %v13539_v11 = vld [vmem:[#allocation3 + $0x141] sm:$0xff] }
 0x3d3   : > { %v11701_v7 = vpop.eup %11700  ;;  %4222 = vst.msk [vmem:[#allocation3 + $0x171] sm:$0xff] %vm272_vm0, %v4135_v1  ;;  %10183 = vmatmul.mubr.msk.f32.gmra.mrb[24].mxu1 %vm272_vm0, %v13527_v19  ;;  %v13532_v39 = vld [vmem:[#allocation3 + $0x139] sm:$0xff]  ;;  %14715 = vst [vmem:[#allocation19_spill] sm:$0xff] %v13539_v11  ;;  %v13616_v5 = vld [vmem:[#allocation3 + $0xa8] sm:$0xff] }
 0x3d4   : > { %14714 = vst [vmem:[#allocation18_spill] sm:$0xff] %v13532_v39  ;;  %v11703_v37 = vpop.eup %11702  ;;  %v4134_v3 = vmul.f32 %v11701_v7, %v13430_v30  ;;  %10185 = vmatprep.mubr.msk.f32.mxu1 %vm272_vm0, %v13532_v39  ;;  %v13620_v1 = vld [vmem:[#allocation3 + $0xb0] sm:$0xff]  ;;  %v13624_v7 = vld [vmem:[#allocation3 + $0xc0] sm:$0xff] }
 0x3d5   : > { %v4137_v58 = vmul.f32 %v11703_v37, %v13442_v61  ;;  %v13550_v30 = vld [vmem:[#allocation3 + $0x159] sm:$0xff]  ;;  %v13628_v37 = vld [vmem:[#allocation3 + $0xc8] sm:$0xff] }
 0x3d6   : > { %4221 = vst.msk [vmem:[#allocation3 + $0x169] sm:$0xff] %vm272_vm0, %v4134_v3  ;;  %14717 = vst [vmem:[#allocation21_spill] sm:$0xff] %v13550_v30  ;;  %v13632_v3 = vld [vmem:[#allocation3 + $0xd8] sm:$0xff]  ;;  %v13668_v28 = vld [vmem:[#allocation3 + $0x140] sm:$0xff] }
 0x3d7   : > { %v11705_v46 = vpop.eup %11704  ;;  %4224 = vst.msk [vmem:[#allocation3 + $0x189] sm:$0xff] %vm272_vm0, %v4137_v58  ;;  %10186 = vmatmul.mubr.msk.f32.gmra.mrb[26].mxu1 %vm272_vm0, %v13539_v11  ;;  %v13636_v58 = vld [vmem:[#allocation3 + $0xe0] sm:$0xff] }
 0x3d8   : > { %v4136_v51 = vmul.f32 %v11705_v46, %v13450_v31  ;;  %v4983_v31 = vld [vmem:[#allocation9 + $0x90] sm:$0xff]  ;;  %v13640_v46 = vld [vmem:[#allocation3 + $0xf0] sm:$0xff] }
 0x3d9   : > { %v13545_v53 = vld [vmem:[#allocation3 + $0x151] sm:$0xff]  ;;  %v10886_v49 = vpack.c.bf16 %v4984_v57, %v4983_v31  ;;  %v13656_v57 = vld [vmem:[#allocation3 + $0x120] sm:$0xff] }
 0x3da   : > { %14716 = vst [vmem:[#allocation20_spill] sm:$0xff] %v13545_v53  ;;  %4223 = vst.msk [vmem:[#allocation3 + $0x181] sm:$0xff] %vm272_vm0, %v4136_v51  ;;  %10188 = vmatprep.mubr.msk.f32.mxu1 %vm272_vm0, %v13545_v53  ;;  %v13558_v56 = vld [vmem:[#allocation3 + $0x171] sm:$0xff]  ;;  %v13690_v11 = vld [vmem:[#allocation3 + $0x1a] sm:$0xff] }
 0x3db   : > { %10189 = vmatmul.mubr.msk.f32.gmra.mrb[28].mxu1 %vm272_vm0, %v13550_v30  ;;  %14719 = vst [vmem:[#allocation23_spill] sm:$0xff] %v13558_v56  ;;  %v13644_v51 = vld [vmem:[#allocation3 + $0xf8] sm:$0xff]  ;;  %v13652_v31 = vld [vmem:[#allocation3 + $0x110] sm:$0xff]  ;;  %v13695_v19 = vld [vmem:[#allocation3 + $0x22] sm:$0xff] }
 0x3dc   : > { %v13672_v33 = vld [vmem:[#allocation3 + $0x150] sm:$0xff]  ;;  %v5380_v53 = vld [vmem:[#allocation9 + $0xe8] sm:$0xff]  ;;  %14720 = vst [vmem:[#allocation24_spill] sm:$0xff] %v13695_v19 }
 0x3dd   : > { %v13554_v61 = vld [vmem:[#allocation3 + $0x169] sm:$0xff] }
 0x3de   : > { %14718 = vst [vmem:[#allocation22_spill] sm:$0xff] %v13554_v61  ;;  %10191 = vmatprep.mubr.msk.f32.mxu1 %vm272_vm0, %v13554_v61  ;;  %v13680_v13 = vld [vmem:[#allocation3 + $0x168] sm:$0xff]  ;;  %v5379_v30 = vld [vmem:[#allocation9 + $0xe0] sm:$0xff] }
 0x3df   : > { %10192 = vmatmul.mubr.msk.f32.gmra.mrb[30].mxu1 %vm272_vm0, %v13558_v56  ;;  %v4949_v56 = vld [vmem:[#allocation3 + $0xa] sm:$0xff]  ;;  %v10906_v39 = vpack.c.bf16 %v5380_v53, %v5379_v30 }
 0x3e0   : > { %10210 = vmatprep.mubr.msk.f32.mxu1 %vm272_vm0, %v4225_v55  ;;  %v13648_v55 = vld [vmem:[#allocation3 + $0x108] sm:$0xff] }
 0x3e1   : > { %v13707_v53 = vld [vmem:[#allocation3 + $0x4a] sm:$0xff] }
 0x3e2   : > { %14721 = vst [vmem:[#allocation25_spill] sm:$0xff] %v13707_v53 }
 0x3e3   : > { %10211 = vmatmul.mubr.msk.f32.vlgmr.msra.gmra.mrb[0].mxu1 %vm272_vm0, %v4226_v26  ;;  %v13660_v26 = vld [vmem:[#allocation3 + $0x128] sm:$0xff] }
 0x3e4   : > { %10213 = vmatprep.mubr.msk.f32.mxu1 %vm272_vm0, %v13564_v12  ;;  %10885 = vmatpush3.bf16.msra.mxu1 %v13242_v63  ;;  %v5375_v63 = vld [vmem:[#allocation9 + $0xc0] sm:$0xff] }
 0x3e5   : > { %10887 = vmatprep.subr.bf16.mxu1 %v10886_v49  ;;  %v13585_v17 = vpack.c.bf16 %v5376_v32, %v5375_v63  ;;  %v5377_v63 = vld [vmem:[#allocation9 + $0xd0] sm:$0xff]  ;;  %v5378_v32 = vld [vmem:[#allocation9 + $0xd8] sm:$0xff] }
 0x3e6   : > { %v10902_v61 = vpack.c.bf16 %v5378_v32, %v5377_v63  ;;  %v13703_v63 = vld [vmem:[#allocation3 + $0x3a] sm:$0xff] }
 0x3e7   : > { %10214 = vmatmul.mubr.msk.f32.gmra.mrb[2].mxu1 %vm272_vm0, %v13569_v34  ;;  %v5770_v32 = vld [vmem:[#allocation9 + $0x108] sm:$0xff] }
 0x3e8   : > { %10216 = vmatprep.mubr.msk.f32.mxu1 %vm272_vm0, %v13573_v18  ;;  %10889 = vmatpush3.bf16.msra.mxu1 %v10886_v49  ;;  %v13664_v49 = vld [vmem:[#allocation3 + $0x138] sm:$0xff] }
 0x3e9   : > { %10891 = vmatprep.subr.bf16.mxu1 %v10890_v15 }
 0x3eb   : > { %10217 = vmatmul.mubr.msk.f32.gmra.mrb[4].mxu1 %vm272_vm0, %v13577_v40 }
 0x3ec   : > { %10219 = vmatprep.mubr.msk.f32.mxu1 %vm272_vm0, %v13581_v45  ;;  %10893 = vmatpush3.bf16.msra.mxu1 %v10890_v15  ;;  %v13676_v15 = vld [vmem:[#allocation3 + $0x158] sm:$0xff] }
 0x3ed   : > { %10895 = vmatprep.subr.bf16.mxu1 %v10894_v24 }
 0x3ef   : > { %10220 = vmatmul.mubr.msk.f32.gmra.mrb[6].mxu1 %vm272_vm0, %v13587_v8 }
 0x3f0   : > { %10222 = vmatprep.mubr.msk.f32.mxu1 %vm272_vm0, %v13591_v27  ;;  %10897 = vmatpush3.bf16.msra.mxu1 %v10894_v24  ;;  %v13684_v24 = vld [vmem:[#allocation3 + $0x170] sm:$0xff] }
 0x3f1   : > { %10899 = vmatprep.subr.bf16.mxu1 %v13585_v17 }
 0x3f3   : > { %10223 = vmatmul.mubr.msk.f32.gmra.mrb[8].mxu1 %vm272_vm0, %v13596_v20 }
 0x3f4   : > { %10225 = vmatprep.mubr.msk.f32.mxu1 %vm272_vm0, %v13600_v22 }
 0x3f7   : > { %10226 = vmatmul.mubr.msk.f32.gmra.mrb[10].mxu1 %vm272_vm0, %v13604_v23 }
 0x3f8   : > { %10228 = vmatprep.mubr.msk.f32.mxu1 %vm272_vm0, %v13608_v48 }
 0x3fb   : > { %10229 = vmatmul.mubr.msk.f32.gmra.mrb[12].mxu1 %vm272_vm0, %v13612_v2 }
 0x3fc   : > { %10231 = vmatprep.mubr.msk.f32.mxu1 %vm272_vm0, %v13616_v5 }
 0x3ff   : > { %10232 = vmatmul.mubr.msk.f32.gmra.mrb[14].mxu1 %vm272_vm0, %v13620_v1 }
 0x400   : > { %10234 = vmatprep.mubr.msk.f32.mxu1 %vm272_vm0, %v13624_v7 }
 0x403   : > { %10235 = vmatmul.mubr.msk.f32.gmra.mrb[16].mxu1 %vm272_vm0, %v13628_v37 }
 0x404   : > { %10237 = vmatprep.mubr.msk.f32.mxu1 %vm272_vm0, %v13632_v3 }
 0x407   : > { %10238 = vmatmul.mubr.msk.f32.gmra.mrb[18].mxu1 %vm272_vm0, %v13636_v58 }
 0x408   : > { %10240 = vmatprep.mubr.msk.f32.mxu1 %vm272_vm0, %v13640_v46 }
 0x40b   : > { %10241 = vmatmul.mubr.msk.f32.gmra.mrb[20].mxu1 %vm272_vm0, %v13644_v51 }
 0x40c   : > { %10243 = vmatprep.mubr.msk.f32.mxu1 %vm272_vm0, %v13648_v55 }
 0x40f   : > { %10244 = vmatmul.mubr.msk.f32.gmra.mrb[22].mxu1 %vm272_vm0, %v13652_v31 }
 0x410   : > { %10246 = vmatprep.mubr.msk.f32.mxu1 %vm272_vm0, %v13656_v57 }
 0x413   : > { %10247 = vmatmul.mubr.msk.f32.gmra.mrb[24].mxu1 %vm272_vm0, %v13660_v26 }
 0x414   : > { %10249 = vmatprep.mubr.msk.f32.mxu1 %vm272_vm0, %v13664_v49 }
 0x417   : > { %10250 = vmatmul.mubr.msk.f32.gmra.mrb[26].mxu1 %vm272_vm0, %v13668_v28 }
 0x418   : > { %10252 = vmatprep.mubr.msk.f32.mxu1 %vm272_vm0, %v13672_v33 }
 0x41b   : > { %10253 = vmatmul.mubr.msk.f32.gmra.mrb[28].mxu1 %vm272_vm0, %v13676_v15 }
 0x41c   : > { %10255 = vmatprep.mubr.msk.f32.mxu1 %vm272_vm0, %v13680_v13 }
 0x41f   : > { %10256 = vmatmul.mubr.msk.f32.gmra.mrb[30].mxu1 %vm272_vm0, %v13684_v24 }
 0x420   : > { %10274 = vmatprep.mubr.msk.f32.mxu1 %vm272_vm0, %v4948_v29  ;;  %v13699_v29 = vld [vmem:[#allocation3 + $0x32] sm:$0xff] }
 0x423   : > { %10275 = vmatmul.mubr.msk.f32.vlgmr.msra.gmra.mrb[0].mxu1 %vm272_vm0, %v4949_v56  ;;  %v10910_v56 = vpack.c.bf16 %v5382_v6, %v5381_v60  ;;  %v13715_v6 = vld [vmem:[#allocation3 + $0x62] sm:$0xff]  ;;  %v13719_v60 = vld [vmem:[#allocation3 + $0x6a] sm:$0xff] }
 0x424   : > { %10277 = vmatprep.mubr.msk.f32.mxu1 %vm272_vm0, %v13690_v11  ;;  %10901 = vmatpush3.bf16.msra.mxu1 %v13585_v17  ;;  %v5769_v17 = vld [vmem:[#allocation9 + $0x100] sm:$0xff]  ;;  %14723 = vst [vmem:[#allocation27_spill] sm:$0xff] %v13715_v6  ;;  %14724 = vst [vmem:[#allocation28_spill] sm:$0xff] %v13719_v60 }
 0x425   : > { %10903 = vmatprep.subr.bf16.mxu1 %v10902_v61  ;;  %v10914_v30 = vpack.c.bf16 %v5770_v32, %v5769_v17  ;;  %v13731_v17 = vld [vmem:[#allocation3 + $0x92] sm:$0xff]  ;;  %v13739_v32 = vld [vmem:[#allocation3 + $0xaa] sm:$0xff] }
 0x426   : > { %14727 = vst [vmem:[#allocation31_spill] sm:$0xff] %v13731_v17  ;;  %14729 = vst [vmem:[#allocation33_spill] sm:$0xff] %v13739_v32 }
 0x427   : > { %10278 = vmatmul.mubr.msk.f32.gmra.mrb[2].mxu1 %vm272_vm0, %v13695_v19  ;;  %v13711_v19 = vld [vmem:[#allocation3 + $0x52] sm:$0xff] }
 0x428   : > { %10280 = vmatprep.mubr.msk.f32.mxu1 %vm272_vm0, %v13699_v29  ;;  %10905 = vmatpush3.bf16.msra.mxu1 %v10902_v61  ;;  %14722 = vst [vmem:[#allocation26_spill] sm:$0xff] %v13711_v19  ;;  %v13727_v61 = vld [vmem:[#allocation3 + $0x82] sm:$0xff] }
 0x429   : > { %10907 = vmatprep.subr.bf16.mxu1 %v10906_v39  ;;  %14726 = vst [vmem:[#allocation30_spill] sm:$0xff] %v13727_v61 }
 0x42b   : > { %10281 = vmatmul.mubr.msk.f32.gmra.mrb[4].mxu1 %vm272_vm0, %v13703_v63 }
 0x42c   : > { %10283 = vmatprep.mubr.msk.f32.mxu1 %vm272_vm0, %v13707_v53  ;;  %10909 = vmatpush3.bf16.msra.mxu1 %v10906_v39  ;;  %v13723_v39 = vld [vmem:[#allocation3 + $0x7a] sm:$0xff]  ;;  %v5776_v53 = vld [vmem:[#allocation9 + $0x138] sm:$0xff] }
 0x42d   : > { %10911 = vmatprep.subr.bf16.mxu1 %v10910_v56  ;;  %14725 = vst [vmem:[#allocation29_spill] sm:$0xff] %v13723_v39 }
 0x42f   : > { %10284 = vmatmul.mubr.msk.f32.gmra.mrb[6].mxu1 %vm272_vm0, %v13711_v19  ;;  %v5774_v19 = vld [vmem:[#allocation9 + $0x128] sm:$0xff] }
 0x430   : > { %10286 = vmatprep.mubr.msk.f32.mxu1 %vm272_vm0, %v13715_v6  ;;  %10913 = vmatpush3.bf16.msra.mxu1 %v10910_v56  ;;  %v13735_v56 = vld [vmem:[#allocation3 + $0x9a] sm:$0xff]  ;;  %v5772_v6 = vld [vmem:[#allocation9 + $0x118] sm:$0xff] }
 0x431   : > { %10915 = vmatprep.subr.bf16.mxu1 %v10914_v30  ;;  %14728 = vst [vmem:[#allocation32_spill] sm:$0xff] %v13735_v56 }
 0x433   : > { %10287 = vmatmul.mubr.msk.f32.gmra.mrb[8].mxu1 %vm272_vm0, %v13719_v60  ;;  %v5771_v60 = vld [vmem:[#allocation9 + $0x110] sm:$0xff] }
 0x434   : > { %10289 = vmatprep.mubr.msk.f32.mxu1 %vm272_vm0, %v13723_v39  ;;  %v13743_v39 = vld [vmem:[#allocation3 + $0xb2] sm:$0xff] }
 0x435   : > { %14730 = vst [vmem:[#allocation34_spill] sm:$0xff] %v13743_v39 }
 0x437   : > { %10290 = vmatmul.mubr.msk.f32.gmra.mrb[10].mxu1 %vm272_vm0, %v13727_v61  ;;  %v13747_v61 = vld [vmem:[#allocation3 + $0xc2] sm:$0xff] }
 0x438   : > { %10292 = vmatprep.mubr.msk.f32.mxu1 %vm272_vm0, %v13731_v17  ;;  %14731 = vst [vmem:[#allocation35_spill] sm:$0xff] %v13747_v61  ;;  %v13751_v17 = vld [vmem:[#allocation3 + $0xca] sm:$0xff] }
 0x439   : > { %14732 = vst [vmem:[#allocation36_spill] sm:$0xff] %v13751_v17 }
 0x43b   : > { %10293 = vmatmul.mubr.msk.f32.gmra.mrb[12].mxu1 %vm272_vm0, %v13735_v56  ;;  %v13755_v56 = vld [vmem:[#allocation3 + $0xda] sm:$0xff] }
 0x43c   : > { %10295 = vmatprep.mubr.msk.f32.mxu1 %vm272_vm0, %v13739_v32  ;;  %14733 = vst [vmem:[#allocation37_spill] sm:$0xff] %v13755_v56  ;;  %v13759_v32 = vld [vmem:[#allocation3 + $0xe2] sm:$0xff] }
 0x43d   : > { %14734 = vst [vmem:[#allocation38_spill] sm:$0xff] %v13759_v32 }
 0x43f   : > { %10296 = vmatmul.mubr.msk.f32.gmra.mrb[14].mxu1 %vm272_vm0, %v13743_v39  ;;  %v13763_v39 = vld [vmem:[#allocation3 + $0xf2] sm:$0xff] }
 0x440   : > { %10298 = vmatprep.mubr.msk.f32.mxu1 %vm272_vm0, %v13747_v61  ;;  %14735 = vst [vmem:[#allocation39_spill] sm:$0xff] %v13763_v39  ;;  %v13767_v61 = vld [vmem:[#allocation3 + $0xfa] sm:$0xff] }
 0x441   : > { %14736 = vst [vmem:[#allocation40_spill] sm:$0xff] %v13767_v61 }
 0x443   : > { %10299 = vmatmul.mubr.msk.f32.gmra.mrb[16].mxu1 %vm272_vm0, %v13751_v17  ;;  %v13771_v17 = vld [vmem:[#allocation3 + $0x10a] sm:$0xff] }
 0x444   : > { %10301 = vmatprep.mubr.msk.f32.mxu1 %vm272_vm0, %v13755_v56  ;;  %14737 = vst [vmem:[#allocation41_spill] sm:$0xff] %v13771_v17  ;;  %v13775_v56 = vld [vmem:[#allocation3 + $0x112] sm:$0xff] }
 0x445   : > { %14738 = vst [vmem:[#allocation42_spill] sm:$0xff] %v13775_v56 }
 0x447   : > { %10302 = vmatmul.mubr.msk.f32.gmra.mrb[18].mxu1 %vm272_vm0, %v13759_v32  ;;  %v13779_v32 = vld [vmem:[#allocation3 + $0x122] sm:$0xff] }
 0x448   : > { %10304 = vmatprep.mubr.msk.f32.mxu1 %vm272_vm0, %v13763_v39  ;;  %14739 = vst [vmem:[#allocation43_spill] sm:$0xff] %v13779_v32  ;;  %v13783_v39 = vld [vmem:[#allocation3 + $0x12a] sm:$0xff] }
 0x449   : > { %14740 = vst [vmem:[#allocation44_spill] sm:$0xff] %v13783_v39 }
 0x44b   : > { %10305 = vmatmul.mubr.msk.f32.gmra.mrb[20].mxu1 %vm272_vm0, %v13767_v61  ;;  %v13787_v61 = vld [vmem:[#allocation3 + $0x13a] sm:$0xff] }
 0x44c   : > { %10307 = vmatprep.mubr.msk.f32.mxu1 %vm272_vm0, %v13771_v17  ;;  %14741 = vst [vmem:[#allocation45_spill] sm:$0xff] %v13787_v61  ;;  %v13791_v17 = vld [vmem:[#allocation3 + $0x142] sm:$0xff] }
 0x44d   : > { %14742 = vst [vmem:[#allocation46_spill] sm:$0xff] %v13791_v17 }
 0x44f   : > { %10308 = vmatmul.mubr.msk.f32.gmra.mrb[22].mxu1 %vm272_vm0, %v13775_v56  ;;  %v13795_v56 = vld [vmem:[#allocation3 + $0x152] sm:$0xff] }
 0x450   : > { %10310 = vmatprep.mubr.msk.f32.mxu1 %vm272_vm0, %v13779_v32  ;;  %14743 = vst [vmem:[#allocation47_spill] sm:$0xff] %v13795_v56  ;;  %v13799_v32 = vld [vmem:[#allocation3 + $0x15a] sm:$0xff] }
 0x451   : > { %14744 = vst [vmem:[#allocation48_spill] sm:$0xff] %v13799_v32 }
 0x453   : > { %10311 = vmatmul.mubr.msk.f32.gmra.mrb[24].mxu1 %vm272_vm0, %v13783_v39  ;;  %v13803_v39 = vld [vmem:[#allocation3 + $0x16a] sm:$0xff] }
 0x454   : > { %10313 = vmatprep.mubr.msk.f32.mxu1 %vm272_vm0, %v13787_v61  ;;  %14745 = vst [vmem:[#allocation49_spill] sm:$0xff] %v13803_v39  ;;  %v13807_v61 = vld [vmem:[#allocation3 + $0x172] sm:$0xff] }
 0x455   : > { %14746 = vst [vmem:[#allocation14_spill] sm:$0xff] %v13807_v61 }
 0x457   : > { %10314 = vmatmul.mubr.msk.f32.gmra.mrb[26].mxu1 %vm272_vm0, %v13791_v17  ;;  %v5773_v17 = vld [vmem:[#allocation9 + $0x120] sm:$0xff] }
 0x458   : > { %10316 = vmatprep.mubr.msk.f32.mxu1 %vm272_vm0, %v13795_v56  ;;  %v10918_v56 = vpack.c.bf16 %v5772_v6, %v5771_v60  ;;  %v6163_v6 = vld [vmem:[#allocation9 + $0x140] sm:$0xff]  ;;  %v6164_v60 = vld [vmem:[#allocation9 + $0x148] sm:$0xff] }
 0x45b   : > { %10317 = vmatmul.mubr.msk.f32.gmra.mrb[28].mxu1 %vm272_vm0, %v13799_v32  ;;  %v5775_v32 = vld [vmem:[#allocation9 + $0x130] sm:$0xff] }
 0x45c   : > { %10319 = vmatprep.mubr.msk.f32.mxu1 %vm272_vm0, %v13803_v39  ;;  %v10922_v39 = vpack.c.bf16 %v5774_v19, %v5773_v17  ;;  %v10930_v19 = vpack.c.bf16 %v6164_v60, %v6163_v6  ;;  %v6169_v6 = vld [vmem:[#allocation9 + $0x170] sm:$0xff]  ;;  %v6170_v60 = vld [vmem:[#allocation9 + $0x178] sm:$0xff] }
 0x45f   : > { %10320 = vmatmul.mubr.msk.f32.gmra.mrb[30].mxu1 %vm272_vm0, %v13807_v61 }
 0x460   : > { %10338 = vmatprep.mubr.msk.f32.mxu1 %vm272_vm0, %v13564_v12  ;;  %v10926_v12 = vpack.c.bf16 %v5776_v53, %v5775_v32  ;;  %v13875_v53 = vld [vmem:[#allocation3 + $0x188] sm:$0xff]  ;;  %v6168_v32 = vld [vmem:[#allocation9 + $0x168] sm:$0xff] }
 0x463   : > { %10339 = vmatmul.mubr.msk.f32.vlgmr.msra.gmra.mrb[0].mxu1 %vm272_vm0, %v13569_v34  ;;  %v13871_v34 = vld [vmem:[#allocation3 + $0x180] sm:$0xff] }
 0x464   : > { %10341 = vmatprep.mubr.msk.f32.mxu1 %vm272_vm0, %v13573_v18  ;;  %10917 = vmatpush3.bf16.msra.mxu1 %v10914_v30  ;;  %v6165_v30 = vld [vmem:[#allocation9 + $0x150] sm:$0xff] }
 0x465   : > { %10919 = vmatprep.subr.bf16.mxu1 %v10918_v56 }
 0x467   : > { %10342 = vmatmul.mubr.msk.f32.gmra.mrb[2].mxu1 %vm272_vm0, %v13577_v40 }
 0x468   : > { %10344 = vmatprep.mubr.msk.f32.mxu1 %vm272_vm0, %v13581_v45  ;;  %10921 = vmatpush3.bf16.msra.mxu1 %v10918_v56  ;;  %v6167_v56 = vld [vmem:[#allocation9 + $0x160] sm:$0xff] }
 0x469   : > { %10923 = vmatprep.subr.bf16.mxu1 %v10922_v39 }
 0x46b   : > { %10345 = vmatmul.mubr.msk.f32.gmra.mrb[4].mxu1 %vm272_vm0, %v13587_v8 }
 0x46c   : > { %10347 = vmatprep.mubr.msk.f32.mxu1 %vm272_vm0, %v13591_v27  ;;  %10925 = vmatpush3.bf16.msra.mxu1 %v10922_v39  ;;  %v6166_v39 = vld [vmem:[#allocation9 + $0x158] sm:$0xff] }
 0x46d   : > { %10927 = vmatprep.subr.bf16.mxu1 %v10926_v12  ;;  %v10934_v17 = vpack.c.bf16 %v6166_v39, %v6165_v30  ;;  %v6558_v30 = vld [vmem:[#allocation9 + $0x180] sm:$0xff]  ;;  %v6559_v39 = vld [vmem:[#allocation9 + $0x188] sm:$0xff] }
 0x46f   : > { %10348 = vmatmul.mubr.msk.f32.gmra.mrb[6].mxu1 %vm272_vm0, %v13596_v20 }
 0x470   : > { %10350 = vmatprep.mubr.msk.f32.mxu1 %vm272_vm0, %v13600_v22  ;;  %10929 = vmatpush3.bf16.msra.mxu1 %v10926_v12  ;;  %v10938_v12 = vpack.c.bf16 %v6168_v32, %v6167_v56  ;;  %v6952_v56 = vld [vmem:[#allocation9 + $0x1c0] sm:$0xff]  ;;  %v6953_v32 = vld [vmem:[#allocation9 + $0x1c8] sm:$0xff] }
 0x471   : > { %10931 = vmatprep.subr.bf16.mxu1 %v10930_v19 }
 0x473   : > { %10351 = vmatmul.mubr.msk.f32.gmra.mrb[8].mxu1 %vm272_vm0, %v13604_v23 }
 0x474   : > { %10353 = vmatprep.mubr.msk.f32.mxu1 %vm272_vm0, %v13608_v48 }
 0x477   : > { %10354 = vmatmul.mubr.msk.f32.gmra.mrb[10].mxu1 %vm272_vm0, %v13612_v2 }
 0x478   : > { %10356 = vmatprep.mubr.msk.f32.mxu1 %vm272_vm0, %v13616_v5 }
 0x47b   : > { %10357 = vmatmul.mubr.msk.f32.gmra.mrb[12].mxu1 %vm272_vm0, %v13620_v1 }
 0x47c   : > { %10359 = vmatprep.mubr.msk.f32.mxu1 %vm272_vm0, %v13624_v7 }
 0x47f   : > { %10360 = vmatmul.mubr.msk.f32.gmra.mrb[14].mxu1 %vm272_vm0, %v13628_v37 }
 0x480   : > { %10362 = vmatprep.mubr.msk.f32.mxu1 %vm272_vm0, %v13632_v3 }
 0x483   : > { %10363 = vmatmul.mubr.msk.f32.gmra.mrb[16].mxu1 %vm272_vm0, %v13636_v58 }
 0x484   : > { %10365 = vmatprep.mubr.msk.f32.mxu1 %vm272_vm0, %v13640_v46 }
 0x487   : > { %10366 = vmatmul.mubr.msk.f32.gmra.mrb[18].mxu1 %vm272_vm0, %v13644_v51 }
 0x488   : > { %10368 = vmatprep.mubr.msk.f32.mxu1 %vm272_vm0, %v13648_v55 }
 0x48b   : > { %10369 = vmatmul.mubr.msk.f32.gmra.mrb[20].mxu1 %vm272_vm0, %v13652_v31 }
 0x48c   : > { %10371 = vmatprep.mubr.msk.f32.mxu1 %vm272_vm0, %v13656_v57 }
 0x48f   : > { %10372 = vmatmul.mubr.msk.f32.gmra.mrb[22].mxu1 %vm272_vm0, %v13660_v26 }
 0x490   : > { %10374 = vmatprep.mubr.msk.f32.mxu1 %vm272_vm0, %v13664_v49 }
 0x493   : > { %10375 = vmatmul.mubr.msk.f32.gmra.mrb[24].mxu1 %vm272_vm0, %v13668_v28 }
 0x494   : > { %10377 = vmatprep.mubr.msk.f32.mxu1 %vm272_vm0, %v13672_v33 }
 0x497   : > { %10378 = vmatmul.mubr.msk.f32.gmra.mrb[26].mxu1 %vm272_vm0, %v13676_v15 }
 0x498   : > { %10380 = vmatprep.mubr.msk.f32.mxu1 %vm272_vm0, %v13680_v13 }
 0x49b   : > { %10381 = vmatmul.mubr.msk.f32.gmra.mrb[28].mxu1 %vm272_vm0, %v13684_v24 }
 0x49c   : > { %10383 = vmatprep.mubr.msk.f32.mxu1 %vm272_vm0, %v13871_v34 }
 0x49f   : > { %10384 = vmatmul.mubr.msk.f32.gmra.mrb[30].mxu1 %vm272_vm0, %v13875_v53 }
 0x4a0   : > { %10402 = vmatprep.mubr.msk.f32.mxu1 %vm272_vm0, %v13340_v44  ;;  %v10942_v44 = vpack.c.bf16 %v6170_v60, %v6169_v6  ;;  %v14759_v6 = vld [vmem:[#allocation27_spill] sm:$0xff]  ;;  %v10962_v60 = vpack.c.bf16 %v6953_v32, %v6952_v56  ;;  %v14011_v56 = vld [vmem:[#allocation3 + $0x18a] sm:$0xff]  ;;  %v6954_v32 = vld [vmem:[#allocation9 + $0x1d0] sm:$0xff] }
 0x4a3   : > { %10403 = vmatmul.mubr.msk.f32.vlgmr.msra.gmra.mrb[0].mxu1 %vm272_vm0, %v13345_v16  ;;  %v10946_v16 = vpack.c.bf16 %v6559_v39, %v6558_v30  ;;  %v14761_v30 = vld [vmem:[#allocation29_spill] sm:$0xff]  ;;  %v14762_v39 = vld [vmem:[#allocation30_spill] sm:$0xff] }
 0x4a4   : > { %10405 = vmatprep.mubr.msk.f32.mxu1 %vm272_vm0, %v13359_v54  ;;  %10933 = vmatpush3.bf16.msra.mxu1 %v10930_v19  ;;  %v14747_v54 = vld [vmem:[#allocation15_spill] sm:$0xff]  ;;  %v6565_v19 = vld [vmem:[#allocation9 + $0x1b8] sm:$0xff] }
 0x4a5   : > { %10935 = vmatprep.subr.bf16.mxu1 %v10934_v17 }
 0x4a7   : > { %10406 = vmatmul.mubr.msk.f32.gmra.mrb[2].mxu1 %vm272_vm0, %v13365_v62  ;;  %v14748_v62 = vld [vmem:[#allocation16_spill] sm:$0xff] }
 0x4a8   : > { %10408 = vmatprep.mubr.msk.f32.mxu1 %vm272_vm0, %v13379_v21  ;;  %10937 = vmatpush3.bf16.msra.mxu1 %v10934_v17  ;;  %v14749_v21 = vld [vmem:[#allocation17_spill] sm:$0xff] }
 0x4a9   : > { %10939 = vmatprep.subr.bf16.mxu1 %v10938_v12  ;;  %v14757_v17 = vld [vmem:[#allocation25_spill] sm:$0xff] }
 0x4ab   : > { %10409 = vmatmul.mubr.msk.f32.gmra.mrb[4].mxu1 %vm272_vm0, %v13385_v14  ;;  %v14750_v14 = vld [vmem:[#allocation18_spill] sm:$0xff] }
 0x4ac   : > { %10411 = vmatprep.mubr.msk.f32.mxu1 %vm272_vm0, %v13405_v4  ;;  %10941 = vmatpush3.bf16.msra.mxu1 %v10938_v12  ;;  %v14751_v4 = vld [vmem:[#allocation19_spill] sm:$0xff]  ;;  %v14758_v12 = vld [vmem:[#allocation26_spill] sm:$0xff] }
 0x4ad   : > { %10943 = vmatprep.subr.bf16.mxu1 %v10942_v44 }
 0x4af   : > { %10412 = vmatmul.mubr.msk.f32.gmra.mrb[6].mxu1 %vm272_vm0, %v13413_v10  ;;  %v14752_v10 = vld [vmem:[#allocation20_spill] sm:$0xff] }
 0x4b0   : > { %10414 = vmatprep.mubr.msk.f32.mxu1 %vm272_vm0, %v13425_v50  ;;  %10945 = vmatpush3.bf16.msra.mxu1 %v10942_v44  ;;  %v14753_v50 = vld [vmem:[#allocation21_spill] sm:$0xff]  ;;  %v14760_v44 = vld [vmem:[#allocation28_spill] sm:$0xff] }
 0x4b1   : > { %10947 = vmatprep.subr.bf16.mxu1 %v10946_v16 }
 0x4b3   : > { %10415 = vmatmul.mubr.msk.f32.gmra.mrb[8].mxu1 %vm272_vm0, %v13432_v41  ;;  %v14754_v41 = vld [vmem:[#allocation22_spill] sm:$0xff] }
 0x4b4   : > { %10417 = vmatprep.mubr.msk.f32.mxu1 %vm272_vm0, %v13444_v38  ;;  %v14755_v38 = vld [vmem:[#allocation23_spill] sm:$0xff] }
 0x4b7   : > { %10418 = vmatmul.mubr.msk.f32.gmra.mrb[10].mxu1 %vm272_vm0, %v13452_v0  ;;  %v13939_v0 = vld [vmem:[#allocation3 + $0x181] sm:$0xff] }
 0x4b8   : > { %10420 = vmatprep.mubr.msk.f32.mxu1 %vm272_vm0, %v13459_v59  ;;  %v13943_v59 = vld [vmem:[#allocation3 + $0x189] sm:$0xff] }
 0x4bb   : > { %10421 = vmatmul.mubr.msk.f32.gmra.mrb[12].mxu1 %vm272_vm0, %v13466_v9  ;;  %v6560_v9 = vld [vmem:[#allocation9 + $0x190] sm:$0xff] }
 0x4bc   : > { %10423 = vmatprep.mubr.msk.f32.mxu1 %vm272_vm0, %v13473_v35  ;;  %v6561_v35 = vld [vmem:[#allocation9 + $0x198] sm:$0xff] }
 0x4bf   : > { %10424 = vmatmul.mubr.msk.f32.gmra.mrb[14].mxu1 %vm272_vm0, %v13478_v42  ;;  %v10950_v42 = vpack.c.bf16 %v6561_v35, %v6560_v9  ;;  %v14773_v9 = vld [vmem:[#allocation41_spill] sm:$0xff]  ;;  %v14774_v35 = vld [vmem:[#allocation42_spill] sm:$0xff] }
 0x4c0   : > { %10426 = vmatprep.mubr.msk.f32.mxu1 %vm272_vm0, %v13486_v36  ;;  %v6562_v36 = vld [vmem:[#allocation9 + $0x1a0] sm:$0xff] }
 0x4c3   : > { %10427 = vmatmul.mubr.msk.f32.gmra.mrb[16].mxu1 %vm272_vm0, %v13491_v52  ;;  %v6563_v52 = vld [vmem:[#allocation9 + $0x1a8] sm:$0xff] }
 0x4c4   : > { %10429 = vmatprep.mubr.msk.f32.mxu1 %vm272_vm0, %v13499_v47  ;;  %v14756_v47 = vld [vmem:[#allocation24_spill] sm:$0xff] }
 0x4c7   : > { %10430 = vmatmul.mubr.msk.f32.gmra.mrb[18].mxu1 %vm272_vm0, %v13504_v43  ;;  %v10954_v43 = vpack.c.bf16 %v6563_v52, %v6562_v36  ;;  %v14776_v36 = vld [vmem:[#allocation44_spill] sm:$0xff]  ;;  %v14777_v52 = vld [vmem:[#allocation45_spill] sm:$0xff] }
 0x4c8   : > { %10432 = vmatprep.mubr.msk.f32.mxu1 %vm272_vm0, %v13509_v25  ;;  %v6564_v25 = vld [vmem:[#allocation9 + $0x1b0] sm:$0xff] }
 0x4cb   : > { %10433 = vmatmul.mubr.msk.f32.gmra.mrb[20].mxu1 %vm272_vm0, %v14747_v54  ;;  %v14764_v54 = vld [vmem:[#allocation32_spill] sm:$0xff] }
 0x4cc   : > { %10435 = vmatprep.mubr.msk.f32.mxu1 %vm272_vm0, %v14748_v62  ;;  %v14765_v62 = vld [vmem:[#allocation33_spill] sm:$0xff] }
 0x4cf   : > { %10436 = vmatmul.mubr.msk.f32.gmra.mrb[22].mxu1 %vm272_vm0, %v14749_v21  ;;  %v14766_v21 = vld [vmem:[#allocation34_spill] sm:$0xff] }
 0x4d0   : > { %10438 = vmatprep.mubr.msk.f32.mxu1 %vm272_vm0, %v14750_v14  ;;  %v14767_v14 = vld [vmem:[#allocation35_spill] sm:$0xff] }
 0x4d3   : > { %10439 = vmatmul.mubr.msk.f32.gmra.mrb[24].mxu1 %vm272_vm0, %v14751_v4  ;;  %v14768_v4 = vld [vmem:[#allocation36_spill] sm:$0xff] }
 0x4d4   : > { %10441 = vmatprep.mubr.msk.f32.mxu1 %vm272_vm0, %v14752_v10  ;;  %v14769_v10 = vld [vmem:[#allocation37_spill] sm:$0xff] }
 0x4d7   : > { %10442 = vmatmul.mubr.msk.f32.gmra.mrb[26].mxu1 %vm272_vm0, %v14753_v50  ;;  %v14770_v50 = vld [vmem:[#allocation38_spill] sm:$0xff] }
 0x4d8   : > { %10444 = vmatprep.mubr.msk.f32.mxu1 %vm272_vm0, %v14754_v41  ;;  %v14771_v41 = vld [vmem:[#allocation39_spill] sm:$0xff] }
 0x4db   : > { %10445 = vmatmul.mubr.msk.f32.gmra.mrb[28].mxu1 %vm272_vm0, %v14755_v38  ;;  %v14772_v38 = vld [vmem:[#allocation40_spill] sm:$0xff] }
 0x4dc   : > { %10447 = vmatprep.mubr.msk.f32.mxu1 %vm272_vm0, %v13939_v0 }
 0x4df   : > { %10448 = vmatmul.mubr.msk.f32.gmra.mrb[30].mxu1 %vm272_vm0, %v13943_v59 }
 0x4e0   : > { %10466 = vmatprep.mubr.msk.f32.mxu1 %vm272_vm0, %v13690_v11  ;;  %v10958_v11 = vpack.c.bf16 %v6565_v19, %v6564_v25  ;;  %v14780_v25 = vld [vmem:[#allocation48_spill] sm:$0xff]  ;;  %v14781_v19 = vld [vmem:[#allocation49_spill] sm:$0xff] }
 0x4e3   : > { %10467 = vmatmul.mubr.msk.f32.vlgmr.msra.gmra.mrb[0].mxu1 %vm272_vm0, %v14756_v47  ;;  %v14778_v47 = vld [vmem:[#allocation46_spill] sm:$0xff] }
 0x4e4   : > { %10469 = vmatprep.mubr.msk.f32.mxu1 %vm272_vm0, %v13699_v29  ;;  %10949 = vmatpush3.bf16.msra.mxu1 %v10946_v16  ;;  %v14763_v16 = vld [vmem:[#allocation31_spill] sm:$0xff] }
 0x4e5   : > { %10951 = vmatprep.subr.bf16.mxu1 %v10950_v42 }
 0x4e7   : > { %10470 = vmatmul.mubr.msk.f32.gmra.mrb[2].mxu1 %vm272_vm0, %v13703_v63 }
 0x4e8   : > { %10472 = vmatprep.mubr.msk.f32.mxu1 %vm272_vm0, %v14757_v17  ;;  %10953 = vmatpush3.bf16.msra.mxu1 %v10950_v42  ;;  %v14775_v42 = vld [vmem:[#allocation43_spill] sm:$0xff] }
 0x4e9   : > { %10955 = vmatprep.subr.bf16.mxu1 %v10954_v43 }
 0x4eb   : > { %10473 = vmatmul.mubr.msk.f32.gmra.mrb[4].mxu1 %vm272_vm0, %v14758_v12 }
 0x4ec   : > { %10475 = vmatprep.mubr.msk.f32.mxu1 %vm272_vm0, %v14759_v6  ;;  %10957 = vmatpush3.bf16.msra.mxu1 %v10954_v43  ;;  %v14779_v43 = vld [vmem:[#allocation47_spill] sm:$0xff] }
 0x4ed   : > { %10959 = vmatprep.subr.bf16.mxu1 %v10958_v11 }
 0x4ef   : > { %10476 = vmatmul.mubr.msk.f32.gmra.mrb[6].mxu1 %vm272_vm0, %v14760_v44 }
 0x4f0   : > { %10478 = vmatprep.mubr.msk.f32.mxu1 %vm272_vm0, %v14761_v30  ;;  %10961 = vmatpush3.bf16.msra.mxu1 %v10958_v11  ;;  %v14007_v11 = vld [vmem:[#allocation3 + $0x182] sm:$0xff] }
 0x4f1   : > { %10963 = vmatprep.subr.bf16.mxu1 %v10962_v60  ;;  %14782 = vst [vmem:[#allocation15_spill] sm:$0xff] %v14007_v11 }
 0x4f3   : > { %10479 = vmatmul.mubr.msk.f32.gmra.mrb[8].mxu1 %vm272_vm0, %v14762_v39 }
 0x4f4   : > { %10481 = vmatprep.mubr.msk.f32.mxu1 %vm272_vm0, %v14763_v16 }
 0x4f7   : > { %10482 = vmatmul.mubr.msk.f32.gmra.mrb[10].mxu1 %vm272_vm0, %v14764_v54 }
 0x4f8   : > { %10484 = vmatprep.mubr.msk.f32.mxu1 %vm272_vm0, %v14765_v62 }
 0x4fb   : > { %10485 = vmatmul.mubr.msk.f32.gmra.mrb[12].mxu1 %vm272_vm0, %v14766_v21 }
 0x4fc   : > { %10487 = vmatprep.mubr.msk.f32.mxu1 %vm272_vm0, %v14767_v14 }
 0x4ff   : > { %10488 = vmatmul.mubr.msk.f32.gmra.mrb[14].mxu1 %vm272_vm0, %v14768_v4 }
 0x500   : > { %10490 = vmatprep.mubr.msk.f32.mxu1 %vm272_vm0, %v14769_v10 }
 0x503   : > { %10491 = vmatmul.mubr.msk.f32.gmra.mrb[16].mxu1 %vm272_vm0, %v14770_v50 }
 0x504   : > { %10493 = vmatprep.mubr.msk.f32.mxu1 %vm272_vm0, %v14771_v41 }
 0x507   : > { %10494 = vmatmul.mubr.msk.f32.gmra.mrb[18].mxu1 %vm272_vm0, %v14772_v38 }
 0x508   : > { %10496 = vmatprep.mubr.msk.f32.mxu1 %vm272_vm0, %v14773_v9 }
 0x50b   : > { %10497 = vmatmul.mubr.msk.f32.gmra.mrb[20].mxu1 %vm272_vm0, %v14774_v35 }
 0x50c   : > { %10499 = vmatprep.mubr.msk.f32.mxu1 %vm272_vm0, %v14775_v42 }
 0x50f   : > { %10500 = vmatmul.mubr.msk.f32.gmra.mrb[22].mxu1 %vm272_vm0, %v14776_v36 }
 0x510   : > { %10502 = vmatprep.mubr.msk.f32.mxu1 %vm272_vm0, %v14777_v52  ;;  %v6959_v52 = vld [vmem:[#allocation9 + $0x1f8] sm:$0xff] }
 0x513   : > { %10503 = vmatmul.mubr.msk.f32.gmra.mrb[24].mxu1 %vm272_vm0, %v14778_v47  ;;  %v6955_v47 = vld [vmem:[#allocation9 + $0x1d8] sm:$0xff] }
 0x514   : > { %10505 = vmatprep.mubr.msk.f32.mxu1 %vm272_vm0, %v14779_v43  ;;  %v6957_v43 = vld [vmem:[#allocation9 + $0x1e8] sm:$0xff] }
 0x517   : > { %10506 = vmatmul.mubr.msk.f32.gmra.mrb[26].mxu1 %vm272_vm0, %v14780_v25  ;;  %v10966_v25 = vpack.c.bf16 %v6955_v47, %v6954_v32  ;;  %v7346_v47 = vld [vmem:[#allocation9 + $0x200] sm:$0xff]  ;;  %v7347_v32 = vld [vmem:[#allocation9 + $0x208] sm:$0xff] }
 0x518   : > { %10508 = vmatprep.mubr.msk.f32.mxu1 %vm272_vm0, %v14781_v19  ;;  %v6956_v19 = vld [vmem:[#allocation9 + $0x1e0] sm:$0xff] }
 0x51b   : > { %10509 = vmatmul.mubr.msk.f32.gmra.mrb[28].mxu1 %vm272_vm0, %v13807_v61  ;;  %v6958_v61 = vld [vmem:[#allocation9 + $0x1f0] sm:$0xff] }
 0x51c   : > { %10511 = vmatprep.mubr.msk.f32.mxu1 %vm272_vm0, %v14007_v11  ;;  %v10970_v11 = vpack.c.bf16 %v6957_v43, %v6956_v19  ;;  %v6939_v43 = vld [vmem:[#allocation3 + $0x121] sm:$0xff]  ;;  %v6941_v19 = vld [vmem:[#allocation3 + $0x139] sm:$0xff] }
 0x51f   : > { %10512 = vmatmul.mubr.msk.f32.gmra.mrb[30].mxu1 %vm272_vm0, %v14011_v56 }
 0x520   : > { %10530 = vmatprep.mubr.msk.f32.mxu1 %vm272_vm0, %v13573_v18  ;;  %v10974_v18 = vpack.c.bf16 %v6959_v52, %v6958_v61  ;;  %v6934_v61 = vld [vmem:[#allocation3 + $0xe1] sm:$0xff]  ;;  %v6938_v52 = vld [vmem:[#allocation3 + $0x111] sm:$0xff] }
 0x523   : > { %10531 = vmatmul.mubr.msk.f32.vlgmr.msra.gmra.mrb[0].mxu1 %vm272_vm0, %v13577_v40  ;;  %v10978_v40 = vpack.c.bf16 %v7347_v32, %v7346_v47  ;;  %v6944_v47 = vld [vmem:[#allocation3 + $0x159] sm:$0xff]  ;;  %v6945_v32 = vld [vmem:[#allocation3 + $0x169] sm:$0xff] }
 0x524   : > { %10533 = vmatprep.mubr.msk.f32.mxu1 %vm272_vm0, %v13581_v45  ;;  %10965 = vmatpush3.bf16.msra.mxu1 %v10962_v60  ;;  %v6555_v45 = vld [vmem:[#allocation3 + $0x198] sm:$0xff]  ;;  %v6937_v60 = vld [vmem:[#allocation3 + $0x109] sm:$0xff] }
 0x525   : > { %10967 = vmatprep.subr.bf16.mxu1 %v10966_v25 }
 0x527   : > { %10534 = vmatmul.mubr.msk.f32.gmra.mrb[2].mxu1 %vm272_vm0, %v13587_v8  ;;  %v6556_v8 = vld [vmem:[#allocation3 + $0x1a0] sm:$0xff] }
 0x528   : > { %10536 = vmatprep.mubr.msk.f32.mxu1 %vm272_vm0, %v13591_v27  ;;  %10969 = vmatpush3.bf16.msra.mxu1 %v10966_v25  ;;  %v7348_v27 = vld [vmem:[#allocation9 + $0x210] sm:$0xff]  ;;  %v6940_v25 = vld [vmem:[#allocation3 + $0x129] sm:$0xff] }
 0x529   : > { %10971 = vmatprep.subr.bf16.mxu1 %v10970_v11 }
 0x52b   : > { %10537 = vmatmul.mubr.msk.f32.gmra.mrb[4].mxu1 %vm272_vm0, %v13596_v20  ;;  %v7349_v20 = vld [vmem:[#allocation9 + $0x218] sm:$0xff] }
 0x52c   : > { %10539 = vmatprep.mubr.msk.f32.mxu1 %vm272_vm0, %v13600_v22  ;;  %10973 = vmatpush3.bf16.msra.mxu1 %v10970_v11  ;;  %v6919_v22 = vld [vmem:[#allocation3 + $0x31] sm:$0xff]  ;;  %v6942_v11 = vld [vmem:[#allocation3 + $0x141] sm:$0xff] }
 0x52d   : > { %10975 = vmatprep.subr.bf16.mxu1 %v10974_v18 }
 0x52f   : > { %10540 = vmatmul.mubr.msk.f32.gmra.mrb[6].mxu1 %vm272_vm0, %v13604_v23  ;;  %v10982_v23 = vpack.c.bf16 %v7349_v20, %v7348_v27 }
 0x530   : > { %10542 = vmatprep.mubr.msk.f32.mxu1 %vm272_vm0, %v13608_v48  ;;  %10977 = vmatpush3.bf16.msra.mxu1 %v10974_v18  ;;  %v6920_v48 = vld [vmem:[#allocation3 + $0x39] sm:$0xff]  ;;  %v6943_v18 = vld [vmem:[#allocation3 + $0x151] sm:$0xff] }
 0x531   : > { %10979 = vmatprep.subr.bf16.mxu1 %v10978_v40 }
 0x533   : > { %10543 = vmatmul.mubr.msk.f32.gmra.mrb[8].mxu1 %vm272_vm0, %v13612_v2  ;;  %v7350_v2 = vld [vmem:[#allocation9 + $0x220] sm:$0xff] }
 0x534   : > { %10545 = vmatprep.mubr.msk.f32.mxu1 %vm272_vm0, %v13616_v5  ;;  %v7351_v5 = vld [vmem:[#allocation9 + $0x228] sm:$0xff] }
 0x537   : > { %10546 = vmatmul.mubr.msk.f32.gmra.mrb[10].mxu1 %vm272_vm0, %v13620_v1  ;;  %v6921_v1 = vld [vmem:[#allocation3 + $0x49] sm:$0xff] }
 0x538   : > { %10548 = vmatprep.mubr.msk.f32.mxu1 %vm272_vm0, %v13624_v7  ;;  %v10986_v7 = vpack.c.bf16 %v7351_v5, %v7350_v2 }
 0x53b   : > { %10549 = vmatmul.mubr.msk.f32.gmra.mrb[12].mxu1 %vm272_vm0, %v13628_v37  ;;  %v6922_v37 = vld [vmem:[#allocation3 + $0x51] sm:$0xff] }
 0x53c   : > { %10551 = vmatprep.mubr.msk.f32.mxu1 %vm272_vm0, %v13632_v3  ;;  %v7352_v3 = vld [vmem:[#allocation9 + $0x230] sm:$0xff] }
 0x53f   : > { %10552 = vmatmul.mubr.msk.f32.gmra.mrb[14].mxu1 %vm272_vm0, %v13636_v58  ;;  %v7353_v58 = vld [vmem:[#allocation9 + $0x238] sm:$0xff] }
 0x540   : > { %10554 = vmatprep.mubr.msk.f32.mxu1 %vm272_vm0, %v13640_v46  ;;  %v6923_v46 = vld [vmem:[#allocation3 + $0x61] sm:$0xff] }
 0x543   : > { %10555 = vmatmul.mubr.msk.f32.gmra.mrb[16].mxu1 %vm272_vm0, %v13644_v51  ;;  %v10990_v51 = vpack.c.bf16 %v7353_v58, %v7352_v3 }
 0x544   : > { %10557 = vmatprep.mubr.msk.f32.mxu1 %vm272_vm0, %v13648_v55  ;;  %v6924_v55 = vld [vmem:[#allocation3 + $0x69] sm:$0xff] }
 0x547   : > { %10558 = vmatmul.mubr.msk.f32.gmra.mrb[18].mxu1 %vm272_vm0, %v13652_v31  ;;  %v6925_v31 = vld [vmem:[#allocation3 + $0x79] sm:$0xff] }
 0x548   : > { %10560 = vmatprep.mubr.msk.f32.mxu1 %vm272_vm0, %v13656_v57  ;;  %v6926_v57 = vld [vmem:[#allocation3 + $0x81] sm:$0xff] }
 0x54b   : > { %10561 = vmatmul.mubr.msk.f32.gmra.mrb[20].mxu1 %vm272_vm0, %v13660_v26  ;;  %v6927_v26 = vld [vmem:[#allocation3 + $0x91] sm:$0xff] }
 0x54c   : > { %10563 = vmatprep.mubr.msk.f32.mxu1 %vm272_vm0, %v13664_v49  ;;  %v6928_v49 = vld [vmem:[#allocation3 + $0x99] sm:$0xff] }
 0x54f   : > { %10564 = vmatmul.mubr.msk.f32.gmra.mrb[22].mxu1 %vm272_vm0, %v13668_v28  ;;  %v6929_v28 = vld [vmem:[#allocation3 + $0xa9] sm:$0xff] }
 0x550   : > { %10566 = vmatprep.mubr.msk.f32.mxu1 %vm272_vm0, %v13672_v33  ;;  %v6930_v33 = vld [vmem:[#allocation3 + $0xb1] sm:$0xff] }
 0x553   : > { %10567 = vmatmul.mubr.msk.f32.gmra.mrb[24].mxu1 %vm272_vm0, %v13676_v15  ;;  %v6931_v15 = vld [vmem:[#allocation3 + $0xc1] sm:$0xff] }
 0x554   : > { %10569 = vmatprep.mubr.msk.f32.mxu1 %vm272_vm0, %v13680_v13  ;;  %v6932_v13 = vld [vmem:[#allocation3 + $0xc9] sm:$0xff] }
 0x557   : > { %10570 = vmatmul.mubr.msk.f32.gmra.mrb[26].mxu1 %vm272_vm0, %v13684_v24  ;;  %v6933_v24 = vld [vmem:[#allocation3 + $0xd9] sm:$0xff] }
 0x558   : > { %10572 = vmatprep.mubr.msk.f32.mxu1 %vm272_vm0, %v13871_v34  ;;  %v6935_v34 = vld [vmem:[#allocation3 + $0xf1] sm:$0xff] }
 0x55b   : > { %10573 = vmatmul.mubr.msk.f32.gmra.mrb[28].mxu1 %vm272_vm0, %v13875_v53  ;;  %v6936_v53 = vld [vmem:[#allocation3 + $0xf9] sm:$0xff] }
 0x55c   : > { %10575 = vmatprep.mubr.msk.f32.mxu1 %vm272_vm0, %v6555_v45  ;;  %v6949_v45 = vld [vmem:[#allocation3 + $0x199] sm:$0xff] }
 0x55f   : > { %10576 = vmatmul.mubr.msk.f32.gmra.mrb[30].mxu1 %vm272_vm0, %v6556_v8  ;;  %v6950_v8 = vld [vmem:[#allocation3 + $0x1a1] sm:$0xff] }
 0x560   : > { %10594 = vmatprep.mubr.msk.f32.mxu1 %vm272_vm0, %v6919_v22 }
 0x563   : > { %10595 = vmatmul.mubr.msk.f32.vlgmr.msra.gmra.mrb[0].mxu1 %vm272_vm0, %v6920_v48 }
 0x564   : > { %10597 = vmatprep.mubr.msk.f32.mxu1 %vm272_vm0, %v6921_v1  ;;  %10981 = vmatpush3.bf16.msra.mxu1 %v10978_v40  ;;  %v6946_v40 = vld [vmem:[#allocation3 + $0x171] sm:$0xff] }
 0x565   : > { %10983 = vmatprep.subr.bf16.mxu1 %v10982_v23 }
 0x567   : > { %10598 = vmatmul.mubr.msk.f32.gmra.mrb[2].mxu1 %vm272_vm0, %v6922_v37 }
 0x568   : > { %10600 = vmatprep.mubr.msk.f32.mxu1 %vm272_vm0, %v6923_v46  ;;  %10985 = vmatpush3.bf16.msra.mxu1 %v10982_v23 }
 0x569   : > { %10987 = vmatprep.subr.bf16.mxu1 %v10986_v7 }
 0x56b   : > { %10601 = vmatmul.mubr.msk.f32.gmra.mrb[4].mxu1 %vm272_vm0, %v6924_v55 }
 0x56c   : > { %10603 = vmatprep.mubr.msk.f32.mxu1 %vm272_vm0, %v6925_v31  ;;  %10989 = vmatpush3.bf16.msra.mxu1 %v10986_v7 }
 0x56d   : > { %10991 = vmatprep.subr.bf16.mxu1 %v10990_v51 }
 0x56f   : > { %10604 = vmatmul.mubr.msk.f32.gmra.mrb[6].mxu1 %vm272_vm0, %v6926_v57 }
 0x570   : > { %10606 = vmatprep.mubr.msk.f32.mxu1 %vm272_vm0, %v6927_v26  ;;  %10993 = vmatpush3.bf16.msra.mxu1 %v10990_v51 }
 0x573   : > { %10607 = vmatmul.mubr.msk.f32.gmra.mrb[8].mxu1 %vm272_vm0, %v6928_v49 }
 0x574   : > { %10609 = vmatprep.mubr.msk.f32.mxu1 %vm272_vm0, %v6929_v28 }
 0x577   : > { %10610 = vmatmul.mubr.msk.f32.gmra.mrb[10].mxu1 %vm272_vm0, %v6930_v33 }
 0x578   : > { %10612 = vmatprep.mubr.msk.f32.mxu1 %vm272_vm0, %v6931_v15 }
 0x57b   : > { %10613 = vmatmul.mubr.msk.f32.gmra.mrb[12].mxu1 %vm272_vm0, %v6932_v13 }
 0x57c   : > { %10615 = vmatprep.mubr.msk.f32.mxu1 %vm272_vm0, %v6933_v24 }
 0x57f   : > { %10616 = vmatmul.mubr.msk.f32.gmra.mrb[14].mxu1 %vm272_vm0, %v6934_v61 }
 0x580   : > { %10618 = vmatprep.mubr.msk.f32.mxu1 %vm272_vm0, %v6935_v34 }
 0x583   : > { %10619 = vmatmul.mubr.msk.f32.gmra.mrb[16].mxu1 %vm272_vm0, %v6936_v53 }
 0x584   : > { %10621 = vmatprep.mubr.msk.f32.mxu1 %vm272_vm0, %v6937_v60 }
 0x587   : > { %10622 = vmatmul.mubr.msk.f32.gmra.mrb[18].mxu1 %vm272_vm0, %v6938_v52 }
 0x588   : > { %10624 = vmatprep.mubr.msk.f32.mxu1 %vm272_vm0, %v6939_v43 }
 0x58b   : > { %10625 = vmatmul.mubr.msk.f32.gmra.mrb[20].mxu1 %vm272_vm0, %v6940_v25 }
 0x58c   : > { %10627 = vmatprep.mubr.msk.f32.mxu1 %vm272_vm0, %v6941_v19 }
 0x58f   : > { %10628 = vmatmul.mubr.msk.f32.gmra.mrb[22].mxu1 %vm272_vm0, %v6942_v11 }
 0x590   : > { %10630 = vmatprep.mubr.msk.f32.mxu1 %vm272_vm0, %v6943_v18 }
 0x593   : > { %10631 = vmatmul.mubr.msk.f32.gmra.mrb[24].mxu1 %vm272_vm0, %v6944_v47 }
 0x594   : > { %10633 = vmatprep.mubr.msk.f32.mxu1 %vm272_vm0, %v6945_v32 }
 0x597   : > { %10634 = vmatmul.mubr.msk.f32.gmra.mrb[26].mxu1 %vm272_vm0, %v6946_v40 }
 0x598   : > { %10636 = vmatprep.mubr.msk.f32.mxu1 %vm272_vm0, %v13939_v0  ;;  %v14785_v0 = vld [vmem:[#allocation47_spill] sm:$0xff] }
 0x59b   : > { %10637 = vmatmul.mubr.msk.f32.gmra.mrb[28].mxu1 %vm272_vm0, %v13943_v59  ;;  %v14786_v59 = vld [vmem:[#allocation48_spill] sm:$0xff] }
 0x59c   : > { %10639 = vmatprep.mubr.msk.f32.mxu1 %vm272_vm0, %v6949_v45 }
 0x59f   : > { %10640 = vmatmul.mubr.msk.f32.gmra.mrb[30].mxu1 %vm272_vm0, %v6950_v8 }
 0x5a0   : > { %10658 = vmatprep.mubr.msk.f32.mxu1 %vm272_vm0, %v13699_v29  ;;  %v14783_v29 = vld [vmem:[#allocation45_spill] sm:$0xff] }
 0x5a3   : > { %10659 = vmatmul.mubr.msk.f32.vlgmr.msra.gmra.mrb[0].mxu1 %vm272_vm0, %v13703_v63  ;;  %v14784_v63 = vld [vmem:[#allocation46_spill] sm:$0xff] }
 0x5a4   : > { %10661 = vmatprep.mubr.msk.f32.mxu1 %vm272_vm0, %v14757_v17  ;;  %v14787_v17 = vld [vmem:[#allocation49_spill] sm:$0xff] }
 0x5a7   : > { %10662 = vmatmul.mubr.msk.f32.gmra.mrb[2].mxu1 %vm272_vm0, %v14758_v12  ;;  %v14788_v12 = vld [vmem:[#allocation14_spill] sm:$0xff] }
 0x5a8   : > { %10664 = vmatprep.mubr.msk.f32.mxu1 %vm272_vm0, %v14759_v6  ;;  %v14789_v6 = vld [vmem:[#allocation15_spill] sm:$0xff] }
 0x5ab   : > { %10665 = vmatmul.mubr.msk.f32.gmra.mrb[4].mxu1 %vm272_vm0, %v14760_v44  ;;  %v7343_v44 = vld [vmem:[#allocation3 + $0x19a] sm:$0xff] }
 0x5ac   : > { %10667 = vmatprep.mubr.msk.f32.mxu1 %vm272_vm0, %v14761_v30  ;;  %v7344_v30 = vld [vmem:[#allocation3 + $0x1a2] sm:$0xff] }
 0x5af   : > { %10668 = vmatmul.mubr.msk.f32.gmra.mrb[6].mxu1 %vm272_vm0, %v14762_v39  ;;  %v14176_v39 = vld [vmem:[%s14493_s4] ss:$0 sm:$0xff] }
 0x5b0   : > { %10670 = vmatprep.mubr.msk.f32.mxu1 %vm272_vm0, %v14763_v16 }
 0x5b3   : > { %10671 = vmatmul.mubr.msk.f32.gmra.mrb[8].mxu1 %vm272_vm0, %v14764_v54 }
 0x5b4   : > { %10673 = vmatprep.mubr.msk.f32.mxu1 %vm272_vm0, %v14765_v62 }
 0x5b7   : > { %10674 = vmatmul.mubr.msk.f32.gmra.mrb[10].mxu1 %vm272_vm0, %v14766_v21 }
 0x5b8   : > { %10676 = vmatprep.mubr.msk.f32.mxu1 %vm272_vm0, %v14767_v14 }
 0x5bb   : > { %10677 = vmatmul.mubr.msk.f32.gmra.mrb[12].mxu1 %vm272_vm0, %v14768_v4 }
 0x5bc   : > { %10679 = vmatprep.mubr.msk.f32.mxu1 %vm272_vm0, %v14769_v10 }
 0x5bf   : > { %10680 = vmatmul.mubr.msk.f32.gmra.mrb[14].mxu1 %vm272_vm0, %v14770_v50 }
 0x5c0   : > { %10682 = vmatprep.mubr.msk.f32.mxu1 %vm272_vm0, %v14771_v41 }
 0x5c3   : > { %10683 = vmatmul.mubr.msk.f32.gmra.mrb[16].mxu1 %vm272_vm0, %v14772_v38 }
 0x5c4   : > { %10685 = vmatprep.mubr.msk.f32.mxu1 %vm272_vm0, %v14773_v9 }
 0x5c7   : > { %10686 = vmatmul.mubr.msk.f32.gmra.mrb[18].mxu1 %vm272_vm0, %v14774_v35 }
 0x5c8   : > { %10688 = vmatprep.mubr.msk.f32.mxu1 %vm272_vm0, %v14775_v42 }
 0x5cb   : > { %10689 = vmatmul.mubr.msk.f32.gmra.mrb[20].mxu1 %vm272_vm0, %v14776_v36 }
 0x5cc   : > { %10691 = vmatprep.mubr.msk.f32.mxu1 %vm272_vm0, %v14783_v29 }
 0x5cf   : > { %10692 = vmatmul.mubr.msk.f32.gmra.mrb[22].mxu1 %vm272_vm0, %v14784_v63  ;;  %v7971_v63 = vld [vmem:[%s12218_s12 + $0x8] sm:$0xff] }
 0x5d0   : > { %10694 = vmatprep.mubr.msk.f32.mxu1 %vm272_vm0, %v14785_v0 }
 0x5d3   : > { %10695 = vmatmul.mubr.msk.f32.gmra.mrb[24].mxu1 %vm272_vm0, %v14786_v59 }
 0x5d4   : > { %10697 = vmatprep.mubr.msk.f32.mxu1 %vm272_vm0, %v14787_v17 }
 0x5d7   : > { %10698 = vmatmul.mubr.msk.f32.gmra.mrb[26].mxu1 %vm272_vm0, %v14788_v12 }
 0x5d8   : > { %10700 = vmatprep.mubr.msk.f32.mxu1 %vm272_vm0, %v14789_v6 }
 0x5db   : > { %10701 = vmatmul.mubr.msk.f32.gmra.mrb[28].mxu1 %vm272_vm0, %v14011_v56 }
 0x5dc   : > { %10703 = vmatprep.mubr.msk.f32.mxu1 %vm272_vm0, %v7343_v44  ;;  %v7970_v44 = vld [vmem:[%s12218_s12] sm:$0xff] }
 0x5df   : > { %10704 = vmatmul.mubr.msk.f32.gmra.mrb[30].mxu1 %vm272_vm0, %v7344_v30 }
 0x676   : > { %v10660_v16 = vpop.f32.mrb[0].mxu1 }
 0x677   : > { %v14179_v54 = vadd.f32 %v10660_v16, %v14176_v39  ;;  %v7516_v62 = vpop.f32.mrb[1].mxu1 }
 0x678   : > { %v14182_v21 = vadd.f32 %v14176_v39, %v7516_v62 }
 0x679   : > { %v8796_v14 = vmul.f32 -1.442695, %v14179_v54 }
 0x67a   : > { %v8795_v4 = vmul.f32 -1.442695, %v14182_v21  ;;  %v10663_v10 = vpop.f32.mrb[2].mxu1 }
 0x67b   : > { %11706 = vpow2.f32 %v8796_v14  ;;  %v14187_v50 = vadd.f32 %v10663_v10, %v14176_v39  ;;  %v7526_v41 = vpop.f32.mrb[3].mxu1 }
 0x67c   : > { %11708 = vpow2.f32 %v8795_v4  ;;  %v14190_v38 = vadd.f32 %v14176_v39, %v7526_v41 }
 0x67d   : > { %v8798_v9 = vmul.f32 -1.442695, %v14187_v50 }
 0x67e   : > { %v8797_v35 = vmul.f32 -1.442695, %v14190_v38  ;;  %v10666_v42 = vpop.f32.mrb[4].mxu1 }
 0x67f   : > { %11710 = vpow2.f32 %v8798_v9  ;;  %v14195_v36 = vadd.f32 %v10666_v42, %v14176_v39  ;;  %v7536_v56 = vpop.f32.mrb[5].mxu1 }
 0x680   : > { %11712 = vpow2.f32 %v8797_v35  ;;  %v14198_v27 = vadd.f32 %v14176_v39, %v7536_v56  ;;  %v7973_v56 = vld [vmem:[%s12218_s12 + $0x18] sm:$0xff] }
 0x681   : > { %v8800_v20 = vmul.f32 -1.442695, %v14195_v36 }
 0x682   : > { %v8799_v22 = vmul.f32 -1.442695, %v14198_v27  ;;  %v10669_v23 = vpop.f32.mrb[6].mxu1 }
 0x683   : > { %11714 = vpow2.f32 %v8800_v20  ;;  %v14203_v48 = vadd.f32 %v10669_v23, %v14176_v39  ;;  %v7546_v2 = vpop.f32.mrb[7].mxu1 }
 0x684   : > { %11716 = vpow2.f32 %v8799_v22  ;;  %v14206_v5 = vadd.f32 %v14176_v39, %v7546_v2 }
 0x685   : > { %v11707_v1 = vpop.eup %11706  ;;  %v8802_v7 = vmul.f32 -1.442695, %v14203_v48 }
 0x686   : > { %v11709_v37 = vpop.eup %11708  ;;  %v7843_v3 = vadd.f32 1.0, %v11707_v1  ;;  %v8801_v58 = vmul.f32 -1.442695, %v14206_v5  ;;  %v10672_v46 = vpop.f32.mrb[8].mxu1  ;;  %v7972_v1 = vld [vmem:[%s12218_s12 + $0x10] sm:$0xff] }
 0x687   : > { %v7842_v51 = vadd.f32 1.0, %v11709_v37  ;;  %11718 = vpow2.f32 %v8802_v7  ;;  %v14211_v55 = vadd.f32 %v10672_v46, %v14176_v39  ;;  %v7556_v31 = vpop.f32.mrb[9].mxu1 }
 0x688   : > { %11720 = vrcp.f32 %v7843_v3  ;;  %v14214_v57 = vadd.f32 %v14176_v39, %v7556_v31 }
 0x689   : > { %v11711_v26 = vpop.eup %11710  ;;  %11722 = vrcp.f32 %v7842_v51  ;;  %v8804_v49 = vmul.f32 -1.442695, %v14211_v55 }
 0x68a   : > { %v11713_v28 = vpop.eup %11712  ;;  %v7845_v33 = vadd.f32 1.0, %v11711_v26  ;;  %11724 = vpow2.f32 %v8801_v58  ;;  %v8803_v15 = vmul.f32 -1.442695, %v14214_v57  ;;  %v10675_v13 = vpop.f32.mrb[10].mxu1 }
 0x68b   : > { %v7844_v24 = vadd.f32 1.0, %v11713_v28  ;;  %11726 = vpow2.f32 %v8804_v49  ;;  %v14219_v61 = vadd.f32 %v10675_v13, %v14176_v39  ;;  %v7566_v34 = vpop.f32.mrb[11].mxu1 }
 0x68c   : > { %11728 = vrcp.f32 %v7845_v33  ;;  %v14222_v53 = vadd.f32 %v14176_v39, %v7566_v34  ;;  %v7975_v33 = vld [vmem:[%s12218_s12 + $0x28] sm:$0xff] }
 0x68d   : > { %v11715_v60 = vpop.eup %11714  ;;  %11730 = vrcp.f32 %v7844_v24  ;;  %v8806_v52 = vmul.f32 -1.442695, %v14219_v61 }
 0x68e   : > { %v11717_v43 = vpop.eup %11716  ;;  %v7847_v25 = vadd.f32 1.0, %v11715_v60  ;;  %11732 = vpow2.f32 %v8803_v15  ;;  %v8805_v19 = vmul.f32 -1.442695, %v14222_v53  ;;  %v10678_v11 = vpop.f32.mrb[12].mxu1  ;;  %v7974_v60 = vld [vmem:[%s12218_s12 + $0x20] sm:$0xff] }
 0x68f   : > { %v7846_v18 = vadd.f32 1.0, %v11717_v43  ;;  %11734 = vpow2.f32 %v8806_v52  ;;  %v14227_v47 = vadd.f32 %v10678_v11, %v14176_v39  ;;  %v7576_v32 = vpop.f32.mrb[13].mxu1 }
 0x690   : > { %11736 = vrcp.f32 %v7847_v25  ;;  %v14230_v40 = vadd.f32 %v14176_v39, %v7576_v32 }
 0x691   : > { %v11719_v45 = vpop.eup %11718  ;;  %11738 = vrcp.f32 %v7846_v18  ;;  %v8808_v8 = vmul.f32 -1.442695, %v14227_v47 }
 0x692   : > { %v11721_v29 = vpop.eup %11720  ;;  %v7849_v0 = vadd.f32 1.0, %v11719_v45  ;;  %11740 = vpow2.f32 %v8805_v19  ;;  %v8807_v59 = vmul.f32 -1.442695, %v14230_v40  ;;  %v10681_v17 = vpop.f32.mrb[14].mxu1 }
 0x693   : > { %v11723_v12 = vpop.eup %11722  ;;  %v7939_v6 = vmul.f32 %v11721_v29, %v14179_v54  ;;  %11742 = vpow2.f32 %v8808_v8  ;;  %v14238_v30 = vadd.f32 %v10681_v17, %v14176_v39  ;;  %v7586_v16 = vpop.f32.mrb[15].mxu1 }
 0x694   : > { %v11725_v62 = vpop.eup %11724  ;;  %v7938_v14 = vmul.f32 %v11723_v12, %v14182_v21  ;;  %11744 = vrcp.f32 %v7849_v0  ;;  %v14242_v4 = vadd.f32 %v14176_v39, %v7586_v16 }
 0x695   : > { %v11727_v10 = vpop.eup %11726  ;;  %v8003_v41 = vadd.f32 %v7971_v63, %v7939_v6  ;;  %v7848_v9 = vadd.f32 1.0, %v11725_v62  ;;  %11746 = vpow2.f32 %v8807_v59  ;;  %v8810_v54 = vmul.f32 -1.442695, %v14238_v30  ;;  %v7977_v63 = vld [vmem:[%s12218_s12 + $0x38] sm:$0xff] }
 0x696   : > { %v11729_v35 = vpop.eup %11728  ;;  %v8002_v42 = vadd.f32 %v7970_v44, %v7938_v14  ;;  %v7851_v20 = vadd.f32 1.0, %v11727_v10  ;;  %v8809_v22 = vmul.f32 -1.442695, %v14242_v4  ;;  %v10684_v23 = vpop.f32.mrb[16].mxu1 }
 0x697   : > { %v11731_v2 = vpop.eup %11730  ;;  %8035 = vst.msk [vmem:[%s14249_s10 + $0x8] sm:$0xff] %vm272_vm0, %v8003_v41  ;;  %v7941_v21 = vmul.f32 %v11729_v35, %v14187_v50  ;;  %11748 = vrcp.f32 %v7848_v9  ;;  %v14256_v7 = vadd.f32 %v10684_v23, %v14176_v39  ;;  %v7596_v37 = vpop.f32.mrb[17].mxu1  ;;  %v7976_v41 = vld [vmem:[%s12218_s12 + $0x30] sm:$0xff]  ;;  %v7979_v35 = vld [vmem:[%s12218_s12 + $0x48] sm:$0xff] }
 0x698   : > { %v11733_v3 = vpop.eup %11732  ;;  %8034 = vst.msk [vmem:[%s14249_s10] sm:$0xff] %vm272_vm0, %v8002_v42  ;;  %v7940_v58 = vmul.f32 %v11731_v2, %v14190_v38  ;;  %11750 = vrcp.f32 %v7851_v20  ;;  %v14262_v46 = vadd.f32 %v14176_v39, %v7596_v37 }
 0x699   : > { %v11735_v51 = vpop.eup %11734  ;;  %v8005_v50 = vadd.f32 %v7973_v56, %v7941_v21  ;;  %v7850_v31 = vadd.f32 1.0, %v11733_v3  ;;  %11752 = vpow2.f32 %v8810_v54  ;;  %v8812_v26 = vmul.f32 -1.442695, %v14256_v7 }
 0x69a   : > { %v11737_v49 = vpop.eup %11736  ;;  %v8004_v28 = vadd.f32 %v7972_v1, %v7940_v58  ;;  %v7853_v15 = vadd.f32 1.0, %v11735_v51  ;;  %11754 = vpow2.f32 %v8809_v22  ;;  %v8811_v38 = vmul.f32 -1.442695, %v14262_v46  ;;  %v10687_v13 = vpop.f32.mrb[18].mxu1  ;;  %v7978_v51 = vld [vmem:[%s12218_s12 + $0x40] sm:$0xff] }
 0x69b   : > { %v11739_v24 = vpop.eup %11738  ;;  %8037 = vst.msk [vmem:[%s14249_s10 + $0x18] sm:$0xff] %vm272_vm0, %v8005_v50  ;;  %v7943_v34 = vmul.f32 %v11737_v49, %v14195_v36  ;;  %11756 = vrcp.f32 %v7850_v31  ;;  %v14272_v52 = vadd.f32 %v10687_v13, %v14176_v39  ;;  %v7606_v43 = vpop.f32.mrb[19].mxu1  ;;  %v7981_v49 = vld [vmem:[%s12218_s12 + $0x58] sm:$0xff] }
 0x69c   : > { %v11741_v25 = vpop.eup %11740  ;;  %8036 = vst.msk [vmem:[%s14249_s10 + $0x10] sm:$0xff] %vm272_vm0, %v8004_v28  ;;  %v7942_v19 = vmul.f32 %v11739_v24, %v14198_v27  ;;  %11758 = vrcp.f32 %v7853_v15  ;;  %v14278_v11 = vadd.f32 %v14176_v39, %v7606_v43 }
 0x69d   : > { %v11743_v18 = vpop.eup %11742  ;;  %v8007_v32 = vadd.f32 %v7975_v33, %v7943_v34  ;;  %v7852_v36 = vadd.f32 1.0, %v11741_v25  ;;  %11760 = vpow2.f32 %v8812_v26  ;;  %v8814_v45 = vmul.f32 -1.442695, %v14272_v52 }
 0x69e   : > { %v11745_v8 = vpop.eup %11744  ;;  %v8006_v29 = vadd.f32 %v7974_v60, %v7942_v19  ;;  %v7855_v0 = vadd.f32 1.0, %v11743_v18  ;;  %11762 = vpow2.f32 %v8811_v38  ;;  %v10690_v59 = vpop.f32.mrb[20].mxu1  ;;  %v8813_v12 = vmul.f32 -1.442695, %v14278_v11  ;;  %v7980_v18 = vld [vmem:[%s12218_s12 + $0x50] sm:$0xff] }
 0x69f   : > { %v11747_v17 = vpop.eup %11746  ;;  %8039 = vst.msk [vmem:[%s14249_s10 + $0x28] sm:$0xff] %vm272_vm0, %v8007_v32  ;;  %v7945_v27 = vmul.f32 %v11745_v8, %v14203_v48  ;;  %11764 = vrcp.f32 %v7852_v36  ;;  %v14287_v6 = vadd.f32 %v10690_v59, %v14176_v39  ;;  %v7616_v44 = vpop.f32.mrb[21].mxu1  ;;  %v7983_v8 = vld [vmem:[%s12218_s12 + $0x68] sm:$0xff] }
 0x6a0   : > { %8038 = vst.msk [vmem:[%s14249_s10 + $0x20] sm:$0xff] %vm272_vm0, %v8006_v29  ;;  %11766 = vrcp.f32 %v7855_v0  ;;  %v7854_v16 = vadd.f32 1.0, %v11747_v17  ;;  %v14292_v62 = vadd.f32 %v14176_v39, %v7616_v44 }
 0x6a1   : > { %v11749_v14 = vpop.eup %11748  ;;  %v8009_v10 = vadd.f32 %v7977_v63, %v7945_v27  ;;  %11768 = vpow2.f32 %v8814_v45  ;;  %v8816_v48 = vmul.f32 -1.442695, %v14287_v6 }
 0x6a2   : > { %v11751_v9 = vpop.eup %11750  ;;  %v7944_v54 = vmul.f32 %v11749_v14, %v14206_v5  ;;  %11770 = vrcp.f32 %v7854_v16  ;;  %v8815_v42 = vmul.f32 -1.442695, %v14292_v62  ;;  %v10693_v56 = vpop.f32.mrb[22].mxu1  ;;  %v7982_v16 = vld [vmem:[%s12218_s12 + $0x60] sm:$0xff] }
 0x6a3   : > { %v11753_v20 = vpop.eup %11752  ;;  %8041 = vst.msk [vmem:[%s14249_s10 + $0x38] sm:$0xff] %vm272_vm0, %v8009_v10  ;;  %v7947_v22 = vmul.f32 %v11751_v9, %v14211_v55  ;;  %11772 = vpow2.f32 %v8813_v12  ;;  %v14303_v23 = vadd.f32 %v10693_v56, %v14176_v39  ;;  %v7626_v2 = vpop.f32.mrb[23].mxu1 }
 0x6a4   : > { %v11755_v21 = vpop.eup %11754  ;;  %v8008_v5 = vadd.f32 %v7976_v41, %v7944_v54  ;;  %v7857_v1 = vadd.f32 1.0, %v11753_v20  ;;  %11774 = vpow2.f32 %v8816_v48  ;;  %v14306_v37 = vadd.f32 %v14176_v39, %v7626_v2 }
 0x6a5   : > { %v11757_v3 = vpop.eup %11756  ;;  %v8011_v58 = vadd.f32 %v7979_v35, %v7947_v22  ;;  %v7856_v50 = vadd.f32 1.0, %v11755_v21  ;;  %11776 = vpow2.f32 %v8815_v42  ;;  %v8818_v55 = vmul.f32 -1.442695, %v14303_v23 }
 0x6a6   : > { %v11759_v31 = vpop.eup %11758  ;;  %8040 = vst.msk [vmem:[%s14249_s10 + $0x30] sm:$0xff] %vm272_vm0, %v8008_v5  ;;  %v7946_v26 = vmul.f32 %v11757_v3, %v14214_v57  ;;  %11778 = vrcp.f32 %v7857_v1  ;;  %v8817_v28 = vmul.f32 -1.442695, %v14306_v37  ;;  %v10696_v33 = vpop.f32.mrb[24].mxu1  ;;  %v7985_v5 = vld [vmem:[%s12218_s12 + $0x78] sm:$0xff] }
 0x6a7   : > { %v11761_v15 = vpop.eup %11760  ;;  %8043 = vst.msk [vmem:[%s14249_s10 + $0x48] sm:$0xff] %vm272_vm0, %v8011_v58  ;;  %v7949_v38 = vmul.f32 %v11759_v31, %v14219_v61  ;;  %11780 = vrcp.f32 %v7856_v50  ;;  %v14319_v13 = vadd.f32 %v10696_v33, %v14176_v39  ;;  %v7636_v24 = vpop.f32.mrb[25].mxu1  ;;  %v7984_v50 = vld [vmem:[%s12218_s12 + $0x70] sm:$0xff] }
 0x6a8   : > { %v11763_v34 = vpop.eup %11762  ;;  %v8010_v57 = vadd.f32 %v7978_v51, %v7946_v26  ;;  %v7859_v60 = vadd.f32 1.0, %v11761_v15  ;;  %11782 = vpow2.f32 %v8818_v55  ;;  %v14322_v43 = vadd.f32 %v14176_v39, %v7636_v24 }
 0x6a9   : > { %v11765_v25 = vpop.eup %11764  ;;  %v8013_v19 = vadd.f32 %v7981_v49, %v7949_v38  ;;  %v7858_v32 = vadd.f32 1.0, %v11763_v34  ;;  %11784 = vpow2.f32 %v8817_v28  ;;  %v8820_v61 = vmul.f32 -1.442695, %v14319_v13 }
 0x6aa   : > { %v11767_v36 = vpop.eup %11766  ;;  %8042 = vst.msk [vmem:[%s14249_s10 + $0x40] sm:$0xff] %vm272_vm0, %v8010_v57  ;;  %v7948_v45 = vmul.f32 %v11765_v25, %v14222_v53  ;;  %11786 = vrcp.f32 %v7859_v60  ;;  %v8819_v29 = vmul.f32 -1.442695, %v14322_v43  ;;  %v10699_v63 = vpop.f32.mrb[26].mxu1  ;;  %v7987_v60 = vld [vmem:[%s12218_s12 + $0x88] sm:$0xff] }
 0x6ab   : > { %v11769_v0 = vpop.eup %11768  ;;  %8045 = vst.msk [vmem:[%s14249_s10 + $0x58] sm:$0xff] %vm272_vm0, %v8013_v19  ;;  %v7951_v59 = vmul.f32 %v11767_v36, %v14227_v47  ;;  %11788 = vrcp.f32 %v7858_v32  ;;  %v14335_v17 = vadd.f32 %v10699_v63, %v14176_v39  ;;  %v7646_v27 = vpop.f32.mrb[27].mxu1  ;;  %v7986_v32 = vld [vmem:[%s12218_s12 + $0x80] sm:$0xff] }
 0x6ac   : > { %v11771_v12 = vpop.eup %11770  ;;  %v8012_v44 = vadd.f32 %v7980_v18, %v7948_v45  ;;  %v7861_v53 = vadd.f32 1.0, %v11769_v0  ;;  %11790 = vpow2.f32 %v8820_v61  ;;  %v14339_v14 = vadd.f32 %v14176_v39, %v7646_v27 }
 0x6ad   : > { %v11773_v10 = vpop.eup %11772  ;;  %v8015_v41 = vadd.f32 %v7983_v8, %v7951_v59  ;;  %v7950_v48 = vmul.f32 %v11771_v12, %v14230_v40  ;;  %11792 = vpow2.f32 %v8819_v29  ;;  %v8822_v47 = vmul.f32 -1.442695, %v14335_v17  ;;  %v7989_v59 = vld [vmem:[%s12218_s12 + $0x98] sm:$0xff] }
 0x6ae   : > { %v11775_v9 = vpop.eup %11774  ;;  %8044 = vst.msk [vmem:[%s14249_s10 + $0x50] sm:$0xff] %vm272_vm0, %v8012_v44  ;;  %11794 = vrcp.f32 %v7861_v53  ;;  %v7860_v54 = vadd.f32 1.0, %v11773_v10  ;;  %v8821_v35 = vmul.f32 -1.442695, %v14339_v14  ;;  %v10702_v42 = vpop.f32.mrb[28].mxu1 }
 0x6af   : > { %v11777_v56 = vpop.eup %11776  ;;  %8047 = vst.msk [vmem:[%s14249_s10 + $0x68] sm:$0xff] %vm272_vm0, %v8015_v41  ;;  %v8014_v20 = vadd.f32 %v7982_v16, %v7950_v48  ;;  %v7863_v22 = vadd.f32 1.0, %v11775_v9  ;;  %11796 = vpow2.f32 %v8822_v47  ;;  %v14349_v40 = vadd.f32 %v10702_v42, %v14176_v39  ;;  %v7656_v2 = vpop.f32.mrb[29].mxu1  ;;  %v7988_v16 = vld [vmem:[%s12218_s12 + $0x90] sm:$0xff]  ;;  %v7991_v47 = vld [vmem:[%s12218_s12 + $0xa8] sm:$0xff] }
 0x6b0   : > { %v11779_v21 = vpop.eup %11778  ;;  %11798 = vrcp.f32 %v7860_v54  ;;  %v7862_v1 = vadd.f32 1.0, %v11777_v56  ;;  %v14353_v3 = vadd.f32 %v14176_v39, %v7656_v2 }
 0x6b1   : > { %v11781_v58 = vpop.eup %11780  ;;  %8046 = vst.msk [vmem:[%s14249_s10 + $0x60] sm:$0xff] %vm272_vm0, %v8014_v20  ;;  %v7953_v51 = vmul.f32 %v11779_v21, %v14238_v30  ;;  %11800 = vrcp.f32 %v7863_v22  ;;  %v8824_v55 = vmul.f32 -1.442695, %v14349_v40 }
 0x6b2   : > { %v11783_v31 = vpop.eup %11782  ;;  %v7952_v26 = vmul.f32 %v11781_v58, %v14242_v4  ;;  %11802 = vrcp.f32 %v7862_v1  ;;  %v8823_v49 = vmul.f32 -1.442695, %v14353_v3  ;;  %v10705_v28 = vpop.f32.mrb[30].mxu1 }
 0x6b3   : > { %v11785_v33 = vpop.eup %11784  ;;  %v8017_v15 = vadd.f32 %v7985_v5, %v7953_v51  ;;  %v7865_v38 = vadd.f32 1.0, %v11783_v31  ;;  %11804 = vpow2.f32 %v8821_v35  ;;  %v14363_v30 = vadd.f32 %v10705_v28, %v14176_v39  ;;  %v7666_v24 = vpop.f32.mrb[31].mxu1  ;;  %v7993_v5 = vld [vmem:[%s12218_s12 + $0xb8] sm:$0xff]  ;;  %v7992_v51 = vld [vmem:[%s12218_s12 + $0xb0] sm:$0xff] }
 0x6b4   : > { %v11787_v34 = vpop.eup %11786  ;;  %v8016_v57 = vadd.f32 %v7984_v50, %v7952_v26  ;;  %v7864_v25 = vadd.f32 1.0, %v11785_v33  ;;  %11806 = vpow2.f32 %v8824_v55  ;;  %v14367_v4 = vadd.f32 %v14176_v39, %v7666_v24  ;;  %v7995_v33 = vld [vmem:[%s12218_s12 + $0xc8] sm:$0xff]  ;;  %v7994_v24 = vld [vmem:[%s12218_s12 + $0xc0] sm:$0xff] }
 0x6b5   : > { %v11789_v19 = vpop.eup %11788  ;;  %8049 = vst.msk [vmem:[%s14249_s10 + $0x78] sm:$0xff] %vm272_vm0, %v8017_v15  ;;  %v7955_v18 = vmul.f32 %v11787_v34, %v14256_v7  ;;  %11808 = vrcp.f32 %v7865_v38  ;;  %v8826_v61 = vmul.f32 -1.442695, %v14363_v30 }
 0x6b6   : > { %v11791_v36 = vpop.eup %11790  ;;  %8048 = vst.msk [vmem:[%s14249_s10 + $0x70] sm:$0xff] %vm272_vm0, %v8016_v57  ;;  %v7954_v45 = vmul.f32 %v11789_v19, %v14262_v46  ;;  %11810 = vrcp.f32 %v7864_v25  ;;  %v8825_v63 = vmul.f32 -1.442695, %v14367_v4  ;;  %v7997_v25 = vld [vmem:[%s12218_s12 + $0xd8] sm:$0xff] }
 0x6b7   : > { %v11793_v39 = vpop.eup %11792  ;;  %v8019_v8 = vadd.f32 %v7987_v60, %v7955_v18  ;;  %v7867_v29 = vadd.f32 1.0, %v11791_v36  ;;  %11812 = vpow2.f32 %v8823_v49 }
 0x6b8   : > { %v11795_v7 = vpop.eup %11794  ;;  %v8018_v0 = vadd.f32 %v7986_v32, %v7954_v45  ;;  %v7866_v27 = vadd.f32 1.0, %v11793_v39  ;;  %11814 = vpow2.f32 %v8826_v61  ;;  %v7996_v61 = vld [vmem:[%s12218_s12 + $0xd0] sm:$0xff]  ;;  %v7999_v39 = vld [vmem:[%s12218_s12 + $0xe8] sm:$0xff] }
 0x6b9   : > { %v11797_v12 = vpop.eup %11796  ;;  %8051 = vst.msk [vmem:[%s14249_s10 + $0x88] sm:$0xff] %vm272_vm0, %v8019_v8  ;;  %v7957_v46 = vmul.f32 %v11795_v7, %v14272_v52  ;;  %11816 = vrcp.f32 %v7867_v29  ;;  %v7990_v52 = vld [vmem:[%s12218_s12 + $0xa0] sm:$0xff] }
 0x6ba   : > { %v11799_v44 = vpop.eup %11798  ;;  %8050 = vst.msk [vmem:[%s14249_s10 + $0x80] sm:$0xff] %vm272_vm0, %v8018_v0  ;;  %11818 = vrcp.f32 %v7866_v27  ;;  %v7869_v53 = vadd.f32 1.0, %v11797_v12  ;;  %v7998_v7 = vld [vmem:[%s12218_s12 + $0xe0] sm:$0xff]  ;;  %v8001_v27 = vld [vmem:[%s12218_s12 + $0xf8] sm:$0xff] }
 0x6bb   : > { %v11801_v10 = vpop.eup %11800  ;;  %v8021_v41 = vadd.f32 %v7989_v59, %v7957_v46  ;;  %v7956_v48 = vmul.f32 %v11799_v44, %v14278_v11  ;;  %11820 = vpow2.f32 %v8825_v63  ;;  %v8000_v44 = vld [vmem:[%s12218_s12 + $0xf0] sm:$0xff] }
 0x6bc   : > { %v11803_v9 = vpop.eup %11802  ;;  %v7959_v54 = vmul.f32 %v11801_v10, %v14287_v6  ;;  %11822 = vrcp.f32 %v7869_v53 }
 0x6bd   : > { %v11805_v35 = vpop.eup %11804  ;;  %8053 = vst.msk [vmem:[%s14249_s10 + $0x98] sm:$0xff] %vm272_vm0, %v8021_v41  ;;  %v8020_v42 = vadd.f32 %v7988_v16, %v7956_v48  ;;  %v7958_v56 = vmul.f32 %v11803_v9, %v14292_v62 }
 0x6be   : > { %v11807_v20 = vpop.eup %11806  ;;  %v8023_v22 = vadd.f32 %v7991_v47, %v7959_v54  ;;  %v7868_v11 = vadd.f32 1.0, %v11805_v35 }
 0x6bf   : > { %v11809_v2 = vpop.eup %11808  ;;  %8052 = vst.msk [vmem:[%s14249_s10 + $0x90] sm:$0xff] %vm272_vm0, %v8020_v42  ;;  %v8022_v21 = vadd.f32 %v7990_v52, %v7958_v56  ;;  %v7871_v6 = vadd.f32 1.0, %v11807_v20 }
 0x6c0   : > { %v11811_v1 = vpop.eup %11810  ;;  %8055 = vst.msk [vmem:[%s14249_s10 + $0xa8] sm:$0xff] %vm272_vm0, %v8023_v22  ;;  %v7961_v58 = vmul.f32 %v11809_v2, %v14303_v23  ;;  %11824 = vrcp.f32 %v7868_v11 }
 0x6c1   : > { %v11813_v62 = vpop.eup %11812  ;;  %8054 = vst.msk [vmem:[%s14249_s10 + $0xa0] sm:$0xff] %vm272_vm0, %v8022_v21  ;;  %v7960_v50 = vmul.f32 %v11811_v1, %v14306_v37  ;;  %11826 = vrcp.f32 %v7871_v6 }
 0x6c2   : > { %v11815_v55 = vpop.eup %11814  ;;  %v8025_v31 = vadd.f32 %v7993_v5, %v7961_v58  ;;  %v7870_v26 = vadd.f32 1.0, %v11813_v62 }
 0x6c3   : > { %v11817_v49 = vpop.eup %11816  ;;  %v8024_v28 = vadd.f32 %v7992_v51, %v7960_v50  ;;  %v7873_v15 = vadd.f32 1.0, %v11815_v55 }
 0x6c4   : > { %v11819_v23 = vpop.eup %11818  ;;  %8057 = vst.msk [vmem:[%s14249_s10 + $0xb8] sm:$0xff] %vm272_vm0, %v8025_v31  ;;  %v7963_v38 = vmul.f32 %v11817_v49, %v14319_v13  ;;  %11828 = vrcp.f32 %v7870_v26 }
 0x6c5   : > { %v11821_v37 = vpop.eup %11820  ;;  %8056 = vst.msk [vmem:[%s14249_s10 + $0xb0] sm:$0xff] %vm272_vm0, %v8024_v28  ;;  %v7962_v34 = vmul.f32 %v11819_v23, %v14322_v43  ;;  %11830 = vrcp.f32 %v7873_v15 }
 0x6c6   : > { %v11823_v57 = vpop.eup %11822  ;;  %v8027_v60 = vadd.f32 %v7995_v33, %v7963_v38  ;;  %v7872_v19 = vadd.f32 1.0, %v11821_v37 }
 0x6c7   : > { %v8026_v18 = vadd.f32 %v7994_v24, %v7962_v34  ;;  %v7965_v32 = vmul.f32 %v11823_v57, %v14335_v17 }
 0x6c8   : > { %8059 = vst.msk [vmem:[%s14249_s10 + $0xc8] sm:$0xff] %vm272_vm0, %v8027_v60  ;;  %11832 = vrcp.f32 %v7872_v19 }
 0x6c9   : > { %8058 = vst.msk [vmem:[%s14249_s10 + $0xc0] sm:$0xff] %vm272_vm0, %v8026_v18  ;;  %v8029_v13 = vadd.f32 %v7997_v25, %v7965_v32 }
 0x6ca   : > { %v11825_v43 = vpop.eup %11824 }
 0x6cb   : > { %v11827_v36 = vpop.eup %11826  ;;  %8061 = vst.msk [vmem:[%s14249_s10 + $0xd8] sm:$0xff] %vm272_vm0, %v8029_v13  ;;  %v7964_v45 = vmul.f32 %v11825_v43, %v14339_v14 }
 0x6cc   : > { %v7967_v17 = vmul.f32 %v11827_v36, %v14349_v40 }
 0x6cd   : > { %v8028_v8 = vadd.f32 %v7996_v61, %v7964_v45 }
 0x6ce   : > { %v11829_v29 = vpop.eup %11828  ;;  %v8031_v63 = vadd.f32 %v7999_v39, %v7967_v17 }
 0x6cf   : > { %v11831_v0 = vpop.eup %11830  ;;  %8060 = vst.msk [vmem:[%s14249_s10 + $0xd0] sm:$0xff] %vm272_vm0, %v8028_v8  ;;  %v7966_v59 = vmul.f32 %v11829_v29, %v14353_v3 }
 0x6d0   : > { %8063 = vst.msk [vmem:[%s14249_s10 + $0xe8] sm:$0xff] %vm272_vm0, %v8031_v63  ;;  %v7969_v14 = vmul.f32 %v11831_v0, %v14363_v30 }
 0x6d1   : > { %v8030_v40 = vadd.f32 %v7998_v7, %v7966_v59 }
 0x6d2   : > { %v11833_v12 = vpop.eup %11832  ;;  %v8033_v46 = vadd.f32 %v8001_v27, %v7969_v14 }
 0x6d3   : > { %8062 = vst.msk [vmem:[%s14249_s10 + $0xe0] sm:$0xff] %vm272_vm0, %v8030_v40  ;;  %v7968_v16 = vmul.f32 %v11833_v12, %v14367_v4 }
 0x6d4   : > { %8065 = vst.msk [vmem:[%s14249_s10 + $0xf8] sm:$0xff] %vm272_vm0, %v8033_v46 }
 0x6d5   : > { %v8032_v3 = vadd.f32 %v8000_v44, %v7968_v16 }
 0x6d7   : > { %8064 = vst.msk [vmem:[%s14249_s10 + $0xf0] sm:$0xff] %vm272_vm0, %v8032_v3 }
 0x6d8   : > { %11933 = shalt.err (!%p11930_p1)
}
 0x6d9   : > { %s11934_s12 = scalar_lea.hbm %s14441_s11, 4096  ;;  %s11938_s15 = scalar_lea.hbm %s14494_s5, 8192 }
 0x6da   : > { %p11935_p13 = scmp.ne.s32.totalorder %s14441_s11, %s11934_s12  ;;  %p11939_p4 = scmp.lt.u32.totalorder %s14441_s11, %s14494_s5 }
 0x6db   : > { %p11940_p5 = scmp.lt.u32.totalorder %s11938_s15, %s11934_s12  ;;  %p11942_p11 = scmp.lt.u32.totalorder %s11934_s12, %s14441_s11 }
 0x6dc   : > { %p11936_p6 = pnand %p11935_p13, %p14790_p0 }
 0x6dd   : > { %p11941_p8 = por %p11940_p5, %p11939_p4 }
 0x6de   : > { %p11937_p10 = pneg %p11936_p6 }
 0x6df   : > { %p11943_p2 = por %p11942_p11, %p11941_p8 }
 0x6e1   : > { %p11944_p3 = pnand %p11943_p2, %p11937_p10 }
 0x6e3   : > { %11947 = shalt.err (!%p11944_p3)
}
 0x6e4   : > { %s11999_s28 = smov 128   ;;  %s12000_s9 = smov 8  }
 0x6e5   : > { %11516 = dma.vmem_to_hbm [thread:$0]  (%p14790_p0), %s14443_s13, 4096, %s14441_s11, %s8067_s22, %s11999_s28, %s11999_s28, %s12000_s9  }
 0x6e6 PF: > { %s8095_s30 = sand.u32 1, %s11978_s18   ;;  %p14791_p7 = scmp.ne.s32.totalorder %s14623_s25, 0 }
 0x6e7   : > { %p14792_p9 = scmp.ge.s32.totalorder %s11990_s21, 2  ;;  %s8096_s17 = scalar_lea.sflag [#allocation6], %s8095_s30 }
 0x6e9   : > { %p11530_p12 = pnand %p14792_p9, %p14791_p7 }
 0x6eb   : > { %11973 = dma.done.wait (!%p11530_p12), %s8096_s17, 4096  }
 0x6ec   : > { %11975 = vsyncadd (!%p11530_p12), %s8096_s17, 4294963200  ;;  %p19_p1 = scmp.ge.s32.totalorder %s12147_s29, 4   ;;  %s14793_s18 = smov %s11982_s19 }
 0x6ed   : > { %s14794_s19 = smov %s11986_s20  ;;  %s14795_s20 = smov %s12163_s27 }
 0x6ee   : > { %s14796_s21 = smov %s12147_s29  ;;  %21 = sbr.rel (!%p19_p1) target bundleno = 6 (0x6), region = 113 }
 0x6f5   :  { %8101 = vsyncpa [#allocation5], 1 }
 0x6f6   :  { %8103 = vsyncpa [#allocation5 + $0x1], 1 }
 0x6f7   :  { %8104 = vsyncpa [#allocation8], 1 }
 0x6f8   :  { %8105 = vsyncpa [#allocation6], 1 }
 0x6f9   :  { %8107 = vsyncpa [#allocation6 + $0x1], 1 }

</bundles_post_ra>
